<compile_context>
chip_gen: v7x
topology: tpu7x:2x2x1
jax: 0.10.0
libtpu: 0.0.40
codegen_flags: <defaults>
</compile_context>

<pallas_src>
import functools
import math

import jax
import jax.numpy as jnp
from jax.experimental import pallas as pl
from jax.experimental.pallas import tpu as pltpu

F32 = jnp.float32
BF16 = jnp.bfloat16
NEG_INF = -1e9


# -----------------------------------------------------------------------------
# Small helpers
# -----------------------------------------------------------------------------
def full_spec(shape):
    """BlockSpec that maps the whole (small) array as a single VMEM block."""
    nd = len(shape)
    return pl.BlockSpec(shape, lambda *_: (0,) * nd)


def _gelu(x):
    # TODO(synk): HF BERT uses exact erf-GELU; tanh approximation kept for
    # guaranteed Mosaic lowering across generations.
    return 0.5 * x * (1.0 + jnp.tanh(0.7978845608028654 * (x + 0.044715 * x * x * x)))


def _layernorm(x, g, b, eps=1e-12):
    mu = jnp.mean(x, axis=-1, keepdims=True)
    var = jnp.mean((x - mu) ** 2, axis=-1, keepdims=True)
    return (x - mu) * jax.lax.rsqrt(var + eps) * g + b


def _additive_mask(pad, rows, causal):
    """pad: (1, Sk) int32 for one batch element -> additive mask broadcastable
    against (rows, Sk) scores. Built in-kernel; no O(S^2) HBM tensor."""
    Sk = pad.shape[-1]
    valid = pad != 0                                       # (1, Sk)
    if causal:
        row = jax.lax.broadcasted_iota(jnp.int32, (rows, Sk), 0)
        col = jax.lax.broadcasted_iota(jnp.int32, (rows, Sk), 1)
        valid = jnp.logical_and(valid, col <= row)         # (rows, Sk)
    return jnp.where(valid, 0.0, NEG_INF)


def _attention(x, kv, mask_add, refs, heads, scale):
    """Multi-head attention + residual + layernorm for one batch element.
    Weights are pre-split per head in the wrapper, so the head loop only
    indexes the leading axis of refs (no lane-offset slicing)."""
    (wq, bq, wk, bk, wv, bv, wo, bo, g, b) = refs
    x_bf = x.astype(BF16)
    kv_bf = kv.astype(BF16)
    out = x + bo[...]                          # residual + output bias
    for h in range(heads):                     # static unroll
        q_h = (jnp.dot(x_bf, wq[h], preferred_element_type=F32) + bq[h]) * scale
        k_h = jnp.dot(kv_bf, wk[h], preferred_element_type=F32) + bk[h]
        v_h = jnp.dot(kv_bf, wv[h], preferred_element_type=F32) + bv[h]
        s = jax.lax.dot_general(q_h.astype(BF16), k_h.astype(BF16),
                                (((1,), (1,)), ((), ())),
                                preferred_element_type=F32) + mask_add
        s = s - jnp.max(s, axis=-1, keepdims=True)
        p = jnp.exp(s)
        p = p * pl.reciprocal(jnp.sum(p, axis=-1, keepdims=True), approx=False)
        ctx = jnp.dot(p.astype(BF16), v_h.astype(BF16), preferred_element_type=F32)
        # output projection folded per head: ctx @ W_o == sum_h ctx_h @ W_o[h]
        out = out + jnp.dot(ctx.astype(BF16), wo[h], preferred_element_type=F32)
    return _layernorm(out, g[...], b[...])


def _ffn(x, refs):
    (wi, bi, wo, bo, g, b) = refs
    h = _gelu(jnp.dot(x.astype(BF16), wi[...], preferred_element_type=F32) + bi[...])
    out = jnp.dot(h.astype(BF16), wo[...], preferred_element_type=F32) + bo[...] + x
    return _layernorm(out, g[...], b[...])


# -----------------------------------------------------------------------------
# Pallas kernels (fused per transformer layer / head)
# -----------------------------------------------------------------------------
def _ln_kernel(x_ref, g_ref, b_ref, o_ref):
    o_ref[0] = _layernorm(x_ref[0], g_ref[...], b_ref[...])


def _encoder_layer_kernel(x_ref, pad_ref,
                          wq, bq, wk, bk, wv, bv, wo, bo, sg, sb,
                          wi, bi, wo2, bo2, fg, fb,
                          o_ref, *, heads, scale):
    x = x_ref[0]                                           # (S, H)
    m = _additive_mask(pad_ref[0], x.shape[0], causal=False)
    y = _attention(x, x, m, (wq, bq, wk, bk, wv, bv, wo, bo, sg, sb), heads, scale)
    o_ref[0] = _ffn(y, (wi, bi, wo2, bo2, fg, fb))


def _decoder_layer_kernel(x_ref, self_pad_ref, enc_ref, enc_pad_ref,
                          s_wq, s_bq, s_wk, s_bk, s_wv, s_bv, s_wo, s_bo, s_g, s_b,
                          c_wq, c_bq, c_wk, c_bk, c_wv, c_bv, c_wo, c_bo, c_g, c_b,
                          wi, bi, wo2, bo2, f_g, f_b,
                          o_ref, *, heads, scale):
    x = x_ref[0]                                           # (S, H)
    enc = enc_ref[0]                                       # (Se, H)
    S = x.shape[0]
    self_mask = _additive_mask(self_pad_ref[0], S, causal=True)
    cross_mask = _additive_mask(enc_pad_ref[0], S, causal=False)
    y = _attention(x, x, self_mask,
                   (s_wq, s_bq, s_wk, s_bk, s_wv, s_bv, s_wo, s_bo, s_g, s_b),
                   heads, scale)
    y = _attention(y, enc, cross_mask,
                   (c_wq, c_bq, c_wk, c_bk, c_wv, c_bv, c_wo, c_bo, c_g, c_b),
                   heads, scale)
    o_ref[0] = _ffn(y, (wi, bi, wo2, bo2, f_g, f_b))


def _lm_head_ce_kernel(x_ref, y_ref, wt_ref, bt_ref, g_ref, b_ref,
                       wd_ref, bd_ref, logits_ref, loss_ref):
    x = x_ref[0]                                           # (S, H)
    h = _gelu(jnp.dot(x.astype(BF16), wt_ref[...], preferred_element_type=F32)
              + bt_ref[...])
    h = _layernorm(h, g_ref[...], b_ref[...])
    z = jnp.dot(h.astype(BF16), wd_ref[...], preferred_element_type=F32) + bd_ref[...]
    logits_ref[0] = z
    # fused shifted cross-entropy (labels pre-shifted in the wrapper; -100 = ignore)
    y = y_ref[0]                                           # (S, 1) int32
    m = jnp.max(z, axis=-1, keepdims=True)
    lse = jnp.log(jnp.sum(jnp.exp(z - m), axis=-1, keepdims=True)) + m
    col = jax.lax.broadcasted_iota(jnp.int32, z.shape, 1)
    tgt = jnp.sum(jnp.where(col == y, z, 0.0), axis=-1, keepdims=True)
    valid = (y >= 0).astype(F32)
    nll = (lse - tgt) * valid                              # (S, 1)
    idx = jax.lax.broadcasted_iota(jnp.int32, (1, 1, 2), 2)
    loss_ref[...] = jnp.where(idx == 0, jnp.sum(nll), jnp.sum(valid))


# -----------------------------------------------------------------------------
# Wrappers (one pallas_call per transformer layer; grid over batch)
# -----------------------------------------------------------------------------
_PARALLEL_B = pltpu.CompilerParams(dimension_semantics=("parallel",))


def layernorm_bsh(x, g, b):
    B, S, H = x.shape
    return pl.pallas_call(
        _ln_kernel,
        out_shape=jax.ShapeDtypeStruct((B, S, H), F32),
        grid=(B,),
        in_specs=[pl.BlockSpec((1, S, H), lambda i: (i, 0, 0)),
                  full_spec((1, H)), full_spec((1, H))],
        out_specs=pl.BlockSpec((1, S, H), lambda i: (i, 0, 0)),
        compiler_params=_PARALLEL_B,
    )(x, g.reshape(1, H), b.reshape(1, H))


def _prep_attn(p, heads):
    """Split Q/K/V/O weights per head (done once, in plain JAX) and cast to bf16."""
    H = p["q_w"].shape[0]
    Dh = H // heads

    def w_split(w):     # (H, H) -> (heads, H, Dh)
        return jnp.transpose(w.reshape(H, heads, Dh), (1, 0, 2)).astype(BF16)

    def b_split(b):     # (H,) -> (heads, 1, Dh)
        return b.reshape(heads, 1, Dh).astype(F32)

    return (w_split(p["q_w"]), b_split(p["q_b"]),
            w_split(p["k_w"]), b_split(p["k_b"]),
            w_split(p["v_w"]), b_split(p["v_b"]),
            p["o_w"].reshape(heads, Dh, H).astype(BF16), p["o_b"].reshape(1, H),
            p["ln_g"].reshape(1, H), p["ln_b"].reshape(1, H))


def _attn_specs(heads, H):
    Dh = H // heads
    return [full_spec((heads, H, Dh)), full_spec((heads, 1, Dh)),
            full_spec((heads, H, Dh)), full_spec((heads, 1, Dh)),
            full_spec((heads, H, Dh)), full_spec((heads, 1, Dh)),
            full_spec((heads, Dh, H)), full_spec((1, H)),
            full_spec((1, H)), full_spec((1, H))]


def _prep_ffn(p):
    H, F = p["i_w"].shape
    return (p["i_w"].astype(BF16), p["i_b"].reshape(1, F),
            p["o_w"].astype(BF16), p["o_b"].reshape(1, H),
            p["ln_g"].reshape(1, H), p["ln_b"].reshape(1, H))


def _ffn_specs(H, F):
    return [full_spec((H, F)), full_spec((1, F)),
            full_spec((F, H)), full_spec((1, H)),
            full_spec((1, H)), full_spec((1, H))]


def encoder_layer(x, pad_mask, lyr, heads):
    B, S, H = x.shape
    F = lyr["ffn"]["i_w"].shape[1]
    scale = 1.0 / math.sqrt(H // heads)
    kernel = functools.partial(_encoder_layer_kernel, heads=heads, scale=scale)
    return pl.pallas_call(
        kernel,
        out_shape=jax.ShapeDtypeStruct((B, S, H), F32),
        grid=(B,),
        in_specs=[pl.BlockSpec((1, S, H), lambda i: (i, 0, 0)),
                  pl.BlockSpec((1, 1, S), lambda i: (i, 0, 0))]
                 + _attn_specs(heads, H) + _ffn_specs(H, F),
        out_specs=pl.BlockSpec((1, S, H), lambda i: (i, 0, 0)),
        compiler_params=_PARALLEL_B,
    )(x, pad_mask.reshape(B, 1, S).astype(jnp.int32),
      *_prep_attn(lyr["self"], heads), *_prep_ffn(lyr["ffn"]))


def decoder_layer(x, self_pad, enc, enc_pad, lyr, heads):
    B, S, H = x.shape
    Se = enc.shape[1]
    F = lyr["ffn"]["i_w"].shape[1]
    scale = 1.0 / math.sqrt(H // heads)
    kernel = functools.partial(_decoder_layer_kernel, heads=heads, scale=scale)
    return pl.pallas_call(
        kernel,
        out_shape=jax.ShapeDtypeStruct((B, S, H), F32),
        grid=(B,),
        in_specs=[pl.BlockSpec((1, S, H), lambda i: (i, 0, 0)),
                  pl.BlockSpec((1, 1, S), lambda i: (i, 0, 0)),
                  pl.BlockSpec((1, Se, H), lambda i: (i, 0, 0)),
                  pl.BlockSpec((1, 1, Se), lambda i: (i, 0, 0))]
                 + _attn_specs(heads, H) + _attn_specs(heads, H) + _ffn_specs(H, F),
        out_specs=pl.BlockSpec((1, S, H), lambda i: (i, 0, 0)),
        compiler_params=_PARALLEL_B,
    )(x, self_pad.reshape(B, 1, S).astype(jnp.int32),
      enc, enc_pad.reshape(B, 1, Se).astype(jnp.int32),
      *_prep_attn(lyr["self"], heads),
      *_prep_attn(lyr["cross"], heads),
      *_prep_ffn(lyr["ffn"]))


def lm_head_ce(x, labels_shifted, p):
    """Fused LM head (transform + LN + tied vocab projection) + shifted CE."""
    B, S, H = x.shape
    V = p["dec_w"].shape[1]
    logits, loss_parts = pl.pallas_call(
        _lm_head_ce_kernel,
        out_shape=(jax.ShapeDtypeStruct((B, S, V), F32),
                   jax.ShapeDtypeStruct((B, 1, 2), F32)),
        grid=(B,),
        in_specs=[pl.BlockSpec((1, S, H), lambda i: (i, 0, 0)),
                  pl.BlockSpec((1, S, 1), lambda i: (i, 0, 0)),
                  full_spec((H, H)), full_spec((1, H)),
                  full_spec((1, H)), full_spec((1, H)),
                  full_spec((H, V)), full_spec((1, V))],
        out_specs=(pl.BlockSpec((1, S, V), lambda i: (i, 0, 0)),
                   pl.BlockSpec((1, 1, 2), lambda i: (i, 0, 0))),
        compiler_params=_PARALLEL_B,
    )(x, labels_shifted.reshape(B, S, 1).astype(jnp.int32),
      p["t_w"].astype(BF16), p["t_b"].reshape(1, H),
      p["ln_g"].reshape(1, H), p["ln_b"].reshape(1, H),
      p["dec_w"].astype(BF16), p["dec_b"].reshape(1, V))
    sum_nll = jnp.sum(loss_parts[:, 0, 0])
    n_valid = jnp.sum(loss_parts[:, 0, 1])
    loss = sum_nll / jnp.maximum(n_valid, 1.0)
    return logits, loss


# -----------------------------------------------------------------------------
# BERT building blocks (glue around the Pallas kernels)
# -----------------------------------------------------------------------------
def embed(ids, p):
    B, S = ids.shape
    x = jnp.take(p["word"], ids, axis=0) + p["pos"][:S][None] + p["type"][0][None, None]
    return layernorm_bsh(x, p["ln_g"], p["ln_b"])


def encoder_forward(p, ids, mask, cfg):
    x = embed(ids, p["emb"])
    for lyr in p["layers"]:
        x = encoder_layer(x, mask, lyr, cfg["heads"])
    return x


def decoder_forward(p, ids, self_mask, enc_hidden, enc_mask, labels_shifted, cfg):
    x = embed(ids, p["emb"])
    for lyr in p["layers"]:
        x = decoder_layer(x, self_mask, enc_hidden, enc_mask, lyr, cfg["heads"])
    return lm_head_ce(x, labels_shifted, p["lm"])


def bert2bert_forward(params, src_tok, src_mask, src_event_loc, src_event_pad_mask,
                      tar_tok, tar_mask, *, cfg, et_sep=True):
    B = src_tok.shape[0]
    # decoder_label: pad token (0) -> ignore index -100; shift-by-one for CE
    labels = jnp.where(tar_tok == 0, -100, tar_tok)
    labels_shifted = jnp.concatenate(
        [labels[:, 1:], jnp.full((B, 1), -100, labels.dtype)], axis=1)
    enc = encoder_forward(params["encoder"], src_tok, src_mask, cfg)
    if et_sep:
        enc = enc[jnp.arange(B)[:, None], src_event_loc]     # gather event locations
        enc_mask = src_event_pad_mask
    else:
        enc_mask = src_mask
    logits, loss = decoder_forward(params["decoder"], tar_tok, tar_mask, enc,
                                   enc_mask, labels_shifted, cfg)
    return {"loss": loss, "logits": logits}


# -----------------------------------------------------------------------------
# Deterministic parameter init (synthetic; shapes follow a tiny BERT config)
# -----------------------------------------------------------------------------
def init_params(key, cfg):
    H, F, V = cfg["hidden"], cfg["ffn"], cfg["vocab"]
    keys = iter(jax.random.split(key, 160))

    def dense(fi, fo):
        return jax.random.normal(next(keys), (fi, fo), F32) * 0.02

    def emb_block():
        return {
            "word": jax.random.normal(next(keys), (V, H), F32) * 0.02,
            "pos": jax.random.normal(next(keys), (cfg["max_pos"], H), F32) * 0.02,
            "type": jax.random.normal(next(keys), (2, H), F32) * 0.02,
            "ln_g": jnp.ones(H, F32),
            "ln_b": jnp.zeros(H, F32),
        }

    def attn():
        return {
            "q_w": dense(H, H), "q_b": jnp.zeros(H, F32),
            "k_w": dense(H, H), "k_b": jnp.zeros(H, F32),
            "v_w": dense(H, H), "v_b": jnp.zeros(H, F32),
            "o_w": dense(H, H), "o_b": jnp.zeros(H, F32),
            "ln_g": jnp.ones(H, F32), "ln_b": jnp.zeros(H, F32),
        }

    def ffn():
        return {
            "i_w": dense(H, F), "i_b": jnp.zeros(F, F32),
            "o_w": dense(F, H), "o_b": jnp.zeros(H, F32),
            "ln_g": jnp.ones(H, F32), "ln_b": jnp.zeros(H, F32),
        }

    enc = {
        "emb": emb_block(),
        "layers": [{"self": attn(), "ffn": ffn()} for _ in range(cfg["enc_layers"])],
    }
    dec_emb = emb_block()
    dec = {
        "emb": dec_emb,
        "layers": [{"self": attn(), "cross": attn(), "ffn": ffn()}
                   for _ in range(cfg["dec_layers"])],
        "lm": {
            "t_w": dense(H, H), "t_b": jnp.zeros(H, F32),
            "ln_g": jnp.ones(H, F32), "ln_b": jnp.zeros(H, F32),
            "dec_w": dec_emb["word"].T,        # tied output projection (H, V)
            "dec_b": jnp.zeros(V, F32),
        },
    }
    return {"encoder": enc, "decoder": dec}


# -----------------------------------------------------------------------------
# Main
# -----------------------------------------------------------------------------
if __name__ == "__main__":
    CFG = dict(vocab=64, hidden=32, heads=2, ffn=64,
               enc_layers=1, dec_layers=1, max_pos=32)
    B, S_SRC, S_TGT, E = 2, 16, 8, 4

    key = jax.random.PRNGKey(0)
    k_params, k1, k2, k3 = jax.random.split(key, 4)
    params = init_params(k_params, CFG)

    src_text_tok = jax.random.randint(k1, (B, S_SRC), 1, CFG["vocab"], dtype=jnp.int32)
    src_text_mask = jnp.concatenate(
        [jnp.ones((B, S_SRC - 3), jnp.int32), jnp.zeros((B, 3), jnp.int32)], axis=1)
    src_event_loc = jax.random.randint(k2, (B, E), 0, S_SRC, dtype=jnp.int32)
    src_event_pad_mask = jnp.array([[1, 1, 1, 0], [1, 1, 0, 0]], dtype=jnp.int32)
    tar_text_tok = jax.random.randint(k3, (B, S_TGT), 1, CFG["vocab"], dtype=jnp.int32)
    tar_text_tok = tar_text_tok.at[:, -2:].set(0)   # pad tokens -> label -100
    tar_pad_mask = (tar_text_tok != 0).astype(jnp.int32)

    fwd = jax.jit(functools.partial(bert2bert_forward, cfg=CFG, et_sep=True))
    out = fwd(params, src_text_tok, src_text_mask, src_event_loc,
              src_event_pad_mask, tar_text_tok, tar_pad_mask)
    jax.block_until_ready(out)

    assert out["logits"].shape == (B, S_TGT, CFG["vocab"])
    assert bool(jnp.isfinite(out["loss"])) and bool(jnp.all(jnp.isfinite(out["logits"])))
    print("KERNEL_OK")
</pallas_src>

<mosaic_0001>
module attributes {stable_mosaic.version = 11 : i64} {
  func.func @_ln_kernel(%arg0: i32, %arg1: memref<1x8x32xf32, #tpu.memory_space<vmem>>, %arg2: memref<1x32xf32, #tpu.memory_space<vmem>>, %arg3: memref<1x32xf32, #tpu.memory_space<vmem>>, %arg4: memref<1x8x32xf32, #tpu.memory_space<vmem>>) attributes {dimension_semantics = [#tpu.dimension_semantics<parallel>], iteration_bounds = array<i64: 2>, scalar_prefetch = 0 : i64, scratch_operands = 0 : i64, tpu.core_type = #tpu.core_type<tc>, window_params = [{transform_indices = @transform_0, window_bounds = array<i64: 1, 8, 32>}, {pipeline_mode = #tpu.pipeline_mode<synchronous>, transform_indices = @transform_1, window_bounds = array<i64: 1, 32>}, {pipeline_mode = #tpu.pipeline_mode<synchronous>, transform_indices = @transform_2, window_bounds = array<i64: 1, 32>}, {transform_indices = @transform_3, window_bounds = array<i64: 1, 8, 32>}]} {
    %c0 = arith.constant 0 : index
    %c0_0 = arith.constant 0 : index
    %c0_1 = arith.constant 0 : index
    %0 = vector.load %arg1[%c0, %c0_0, %c0_1] : memref<1x8x32xf32, #tpu.memory_space<vmem>>, vector<1x8x32xf32>
    %1 = vector.shape_cast %0 : vector<1x8x32xf32> to vector<8x32xf32>
    %c0_2 = arith.constant 0 : index
    %c0_3 = arith.constant 0 : index
    %2 = vector.load %arg2[%c0_2, %c0_3] : memref<1x32xf32, #tpu.memory_space<vmem>>, vector<1x32xf32>
    %c0_4 = arith.constant 0 : index
    %c0_5 = arith.constant 0 : index
    %3 = vector.load %arg3[%c0_4, %c0_5] : memref<1x32xf32, #tpu.memory_space<vmem>>, vector<1x32xf32>
    %cst = arith.constant dense<0.000000e+00> : vector<8xf32>
    %4 = vector.multi_reduction <add>, %1, %cst [1] : vector<8x32xf32> to vector<8xf32>
    %5 = vector.shape_cast %4 : vector<8xf32> to vector<8x1xf32>
    %cst_6 = arith.constant 3.200000e+01 : f32
    %6 = vector.broadcast %cst_6 : f32 to vector<8x1xf32>
    %7 = arith.divf %5, %6 : vector<8x1xf32>
    %8 = vector.broadcast %7 : vector<8x1xf32> to vector<8x32xf32>
    %9 = arith.subf %1, %8 : vector<8x32xf32>
    %10 = arith.mulf %9, %9 : vector<8x32xf32>
    %cst_7 = arith.constant dense<0.000000e+00> : vector<8xf32>
    %11 = vector.multi_reduction <add>, %10, %cst_7 [1] : vector<8x32xf32> to vector<8xf32>
    %12 = vector.shape_cast %11 : vector<8xf32> to vector<8x1xf32>
    %cst_8 = arith.constant 3.200000e+01 : f32
    %13 = vector.broadcast %cst_8 : f32 to vector<8x1xf32>
    %14 = arith.divf %12, %13 : vector<8x1xf32>
    %15 = vector.broadcast %7 : vector<8x1xf32> to vector<8x32xf32>
    %16 = arith.subf %1, %15 : vector<8x32xf32>
    %cst_9 = arith.constant 9.99999996E-13 : f32
    %17 = vector.broadcast %cst_9 : f32 to vector<8x1xf32>
    %18 = arith.addf %14, %17 : vector<8x1xf32>
    %19 = math.rsqrt %18 : vector<8x1xf32>
    %20 = vector.broadcast %19 : vector<8x1xf32> to vector<8x32xf32>
    %21 = arith.mulf %16, %20 : vector<8x32xf32>
    %22 = vector.broadcast %2 : vector<1x32xf32> to vector<8x32xf32>
    %23 = arith.mulf %21, %22 : vector<8x32xf32>
    %24 = vector.broadcast %3 : vector<1x32xf32> to vector<8x32xf32>
    %25 = arith.addf %23, %24 : vector<8x32xf32>
    %c0_10 = arith.constant 0 : index
    %c0_11 = arith.constant 0 : index
    %c0_12 = arith.constant 0 : index
    %26 = vector.load %arg4[%c0_10, %c0_11, %c0_12] : memref<1x8x32xf32, #tpu.memory_space<vmem>>, vector<1x8x32xf32>
    %27 = vector.shape_cast %26 : vector<1x8x32xf32> to vector<8x32xf32>
    %28 = vector.shape_cast %25 : vector<8x32xf32> to vector<1x8x32xf32>
    tpu.vector_store %arg4[%c0_10, %c0_11, %c0_12], %28 {strides = array<i32>} : memref<1x8x32xf32, #tpu.memory_space<vmem>>, vector<1x8x32xf32>,
    return
  }
  func.func @transform_0(%arg0: i32) -> (i32, i32, i32) {
    %c0_i32 = arith.constant 0 : i32
    %c0_i32_0 = arith.constant 0 : i32
    %c0_i32_1 = arith.constant 0 : i32
    return %arg0, %c0_i32, %c0_i32_0 : i32, i32, i32
  }
  func.func @transform_1(%arg0: i32) -> (i32, i32) {
    %c0_i32 = arith.constant 0 : i32
    %c0_i32_0 = arith.constant 0 : i32
    %c0_i32_1 = arith.constant 0 : i32
    return %c0_i32, %c0_i32_0 : i32, i32
  }
  func.func @transform_2(%arg0: i32) -> (i32, i32) {
    %c0_i32 = arith.constant 0 : i32
    %c0_i32_0 = arith.constant 0 : i32
    %c0_i32_1 = arith.constant 0 : i32
    return %c0_i32, %c0_i32_0 : i32, i32
  }
  func.func @transform_3(%arg0: i32) -> (i32, i32, i32) {
    %c0_i32 = arith.constant 0 : i32
    %c0_i32_0 = arith.constant 0 : i32
    %c0_i32_1 = arith.constant 0 : i32
    return %arg0, %c0_i32, %c0_i32_0 : i32, i32, i32
  }
}

module attributes {stable_mosaic.version = 11 : i64} {
  func.func @_ln_kernel(%arg0: i32, %arg1: memref<1x16x32xf32, #tpu.memory_space<vmem>>, %arg2: memref<1x32xf32, #tpu.memory_space<vmem>>, %arg3: memref<1x32xf32, #tpu.memory_space<vmem>>, %arg4: memref<1x16x32xf32, #tpu.memory_space<vmem>>) attributes {dimension_semantics = [#tpu.dimension_semantics<parallel>], iteration_bounds = array<i64: 2>, scalar_prefetch = 0 : i64, scratch_operands = 0 : i64, tpu.core_type = #tpu.core_type<tc>, window_params = [{transform_indices = @transform_0, window_bounds = array<i64: 1, 16, 32>}, {pipeline_mode = #tpu.pipeline_mode<synchronous>, transform_indices = @transform_1, window_bounds = array<i64: 1, 32>}, {pipeline_mode = #tpu.pipeline_mode<synchronous>, transform_indices = @transform_2, window_bounds = array<i64: 1, 32>}, {transform_indices = @transform_3, window_bounds = array<i64: 1, 16, 32>}]} {
    %c0 = arith.constant 0 : index
    %c0_0 = arith.constant 0 : index
    %c0_1 = arith.constant 0 : index
    %0 = vector.load %arg1[%c0, %c0_0, %c0_1] : memref<1x16x32xf32, #tpu.memory_space<vmem>>, vector<1x16x32xf32>
    %1 = vector.shape_cast %0 : vector<1x16x32xf32> to vector<16x32xf32>
    %c0_2 = arith.constant 0 : index
    %c0_3 = arith.constant 0 : index
    %2 = vector.load %arg2[%c0_2, %c0_3] : memref<1x32xf32, #tpu.memory_space<vmem>>, vector<1x32xf32>
    %c0_4 = arith.constant 0 : index
    %c0_5 = arith.constant 0 : index
    %3 = vector.load %arg3[%c0_4, %c0_5] : memref<1x32xf32, #tpu.memory_space<vmem>>, vector<1x32xf32>
    %cst = arith.constant dense<0.000000e+00> : vector<16xf32>
    %4 = vector.multi_reduction <add>, %1, %cst [1] : vector<16x32xf32> to vector<16xf32>
    %5 = vector.shape_cast %4 : vector<16xf32> to vector<16x1xf32>
    %cst_6 = arith.constant 3.200000e+01 : f32
    %6 = vector.broadcast %cst_6 : f32 to vector<16x1xf32>
    %7 = arith.divf %5, %6 : vector<16x1xf32>
    %8 = vector.broadcast %7 : vector<16x1xf32> to vector<16x32xf32>
    %9 = arith.subf %1, %8 : vector<16x32xf32>
    %10 = arith.mulf %9, %9 : vector<16x32xf32>
    %cst_7 = arith.constant dense<0.000000e+00> : vector<16xf32>
    %11 = vector.multi_reduction <add>, %10, %cst_7 [1] : vector<16x32xf32> to vector<16xf32>
    %12 = vector.shape_cast %11 : vector<16xf32> to vector<16x1xf32>
    %cst_8 = arith.constant 3.200000e+01 : f32
    %13 = vector.broadcast %cst_8 : f32 to vector<16x1xf32>
    %14 = arith.divf %12, %13 : vector<16x1xf32>
    %15 = vector.broadcast %7 : vector<16x1xf32> to vector<16x32xf32>
    %16 = arith.subf %1, %15 : vector<16x32xf32>
    %cst_9 = arith.constant 9.99999996E-13 : f32
    %17 = vector.broadcast %cst_9 : f32 to vector<16x1xf32>
    %18 = arith.addf %14, %17 : vector<16x1xf32>
    %19 = math.rsqrt %18 : vector<16x1xf32>
    %20 = vector.broadcast %19 : vector<16x1xf32> to vector<16x32xf32>
    %21 = arith.mulf %16, %20 : vector<16x32xf32>
    %22 = vector.broadcast %2 : vector<1x32xf32> to vector<16x32xf32>
    %23 = arith.mulf %21, %22 : vector<16x32xf32>
    %24 = vector.broadcast %3 : vector<1x32xf32> to vector<16x32xf32>
    %25 = arith.addf %23, %24 : vector<16x32xf32>
    %c0_10 = arith.constant 0 : index
    %c0_11 = arith.constant 0 : index
    %c0_12 = arith.constant 0 : index
    %26 = vector.load %arg4[%c0_10, %c0_11, %c0_12] : memref<1x16x32xf32, #tpu.memory_space<vmem>>, vector<1x16x32xf32>
    %27 = vector.shape_cast %26 : vector<1x16x32xf32> to vector<16x32xf32>
    %28 = vector.shape_cast %25 : vector<16x32xf32> to vector<1x16x32xf32>
    tpu.vector_store %arg4[%c0_10, %c0_11, %c0_12], %28 {strides = array<i32>} : memref<1x16x32xf32, #tpu.memory_space<vmem>>, vector<1x16x32xf32>,
    return
  }
  func.func @transform_0(%arg0: i32) -> (i32, i32, i32) {
    %c0_i32 = arith.constant 0 : i32
    %c0_i32_0 = arith.constant 0 : i32
    %c0_i32_1 = arith.constant 0 : i32
    return %arg0, %c0_i32, %c0_i32_0 : i32, i32, i32
  }
  func.func @transform_1(%arg0: i32) -> (i32, i32) {
    %c0_i32 = arith.constant 0 : i32
    %c0_i32_0 = arith.constant 0 : i32
    %c0_i32_1 = arith.constant 0 : i32
    return %c0_i32, %c0_i32_0 : i32, i32
  }
  func.func @transform_2(%arg0: i32) -> (i32, i32) {
    %c0_i32 = arith.constant 0 : i32
    %c0_i32_0 = arith.constant 0 : i32
    %c0_i32_1 = arith.constant 0 : i32
    return %c0_i32, %c0_i32_0 : i32, i32
  }
  func.func @transform_3(%arg0: i32) -> (i32, i32, i32) {
    %c0_i32 = arith.constant 0 : i32
    %c0_i32_0 = arith.constant 0 : i32
    %c0_i32_1 = arith.constant 0 : i32
    return %arg0, %c0_i32, %c0_i32_0 : i32, i32, i32
  }
}

module attributes {stable_mosaic.version = 11 : i64} {
  func.func @_encoder_layer_kernel(%arg0: i32, %arg1: memref<1x16x32xf32, #tpu.memory_space<vmem>>, %arg2: memref<1x1x16xi32, #tpu.memory_space<vmem>>, %arg3: memref<2x32x16xbf16, #tpu.memory_space<vmem>>, %arg4: memref<2x1x16xf32, #tpu.memory_space<vmem>>, %arg5: memref<2x32x16xbf16, #tpu.memory_space<vmem>>, %arg6: memref<2x1x16xf32, #tpu.memory_space<vmem>>, %arg7: memref<2x32x16xbf16, #tpu.memory_space<vmem>>, %arg8: memref<2x1x16xf32, #tpu.memory_space<vmem>>, %arg9: memref<2x16x32xbf16, #tpu.memory_space<vmem>>, %arg10: memref<1x32xf32, #tpu.memory_space<vmem>>, %arg11: memref<1x32xf32, #tpu.memory_space<vmem>>, %arg12: memref<1x32xf32, #tpu.memory_space<vmem>>, %arg13: memref<32x64xbf16, #tpu.memory_space<vmem>>, %arg14: memref<1x64xf32, #tpu.memory_space<vmem>>, %arg15: memref<64x32xbf16, #tpu.memory_space<vmem>>, %arg16: memref<1x32xf32, #tpu.memory_space<vmem>>, %arg17: memref<1x32xf32, #tpu.memory_space<vmem>>, %arg18: memref<1x32xf32, #tpu.memory_space<vmem>>, %arg19: memref<1x16x32xf32, #tpu.memory_space<vmem>>) attributes {dimension_semantics = [#tpu.dimension_semantics<parallel>], iteration_bounds = array<i64: 2>, scalar_prefetch = 0 : i64, scratch_operands = 0 : i64, tpu.core_type = #tpu.core_type<tc>, window_params = [{transform_indices = @transform_0, window_bounds = array<i64: 1, 16, 32>}, {transform_indices = @transform_1, window_bounds = array<i64: 1, 1, 16>}, {pipeline_mode = #tpu.pipeline_mode<synchronous>, transform_indices = @transform_2, window_bounds = array<i64: 2, 32, 16>}, {pipeline_mode = #tpu.pipeline_mode<synchronous>, transform_indices = @transform_3, window_bounds = array<i64: 2, 1, 16>}, {pipeline_mode = #tpu.pipeline_mode<synchronous>, transform_indices = @transform_4, window_bounds = array<i64: 2, 32, 16>}, {pipeline_mode = #tpu.pipeline_mode<synchronous>, transform_indices = @transform_5, window_bounds = array<i64: 2, 1, 16>}, {pipeline_mode = #tpu.pipeline_mode<synchronous>, transform_indices = @transform_6, window_bounds = array<i64: 2, 32, 16>}, {pipeline_mode = #tpu.pipeline_mode<synchronous>, transform_indices = @transform_7, window_bounds = array<i64: 2, 1, 16>}, {pipeline_mode = #tpu.pipeline_mode<synchronous>, transform_indices = @transform_8, window_bounds = array<i64: 2, 16, 32>}, {pipeline_mode = #tpu.pipeline_mode<synchronous>, transform_indices = @transform_9, window_bounds = array<i64: 1, 32>}, {pipeline_mode = #tpu.pipeline_mode<synchronous>, transform_indices = @transform_10, window_bounds = array<i64: 1, 32>}, {pipeline_mode = #tpu.pipeline_mode<synchronous>, transform_indices = @transform_11, window_bounds = array<i64: 1, 32>}, {pipeline_mode = #tpu.pipeline_mode<synchronous>, transform_indices = @transform_12, window_bounds = array<i64: 32, 64>}, {pipeline_mode = #tpu.pipeline_mode<synchronous>, transform_indices = @transform_13, window_bounds = array<i64: 1, 64>}, {pipeline_mode = #tpu.pipeline_mode<synchronous>, transform_indices = @transform_14, window_bounds = array<i64: 64, 32>}, {pipeline_mode = #tpu.pipeline_mode<synchronous>, transform_indices = @transform_15, window_bounds = array<i64: 1, 32>}, {pipeline_mode = #tpu.pipeline_mode<synchronous>, transform_indices = @transform_16, window_bounds = array<i64: 1, 32>}, {pipeline_mode = #tpu.pipeline_mode<synchronous>, transform_indices = @transform_17, window_bounds = array<i64: 1, 32>}, {transform_indices = @transform_18, window_bounds = array<i64: 1, 16, 32>}]} {
    %c0 = arith.constant 0 : index
    %c0_0 = arith.constant 0 : index
    %c0_1 = arith.constant 0 : index
    %0 = vector.load %arg1[%c0, %c0_0, %c0_1] : memref<1x16x32xf32, #tpu.memory_space<vmem>>, vector<1x16x32xf32>
    %1 = vector.shape_cast %0 : vector<1x16x32xf32> to vector<16x32xf32>
    %c0_2 = arith.constant 0 : index
    %c0_3 = arith.constant 0 : index
    %c0_4 = arith.constant 0 : index
    %2 = vector.load %arg2[%c0_2, %c0_3, %c0_4] : memref<1x1x16xi32, #tpu.memory_space<vmem>>, vector<1x1x16xi32>
    %3 = vector.shape_cast %2 : vector<1x1x16xi32> to vector<1x16xi32>
    %c0_i32 = arith.constant 0 : i32
    %4 = vector.broadcast %c0_i32 : i32 to vector<1x16xi32>
    %5 = arith.cmpi ne, %3, %4 : vector<1x16xi32>
    %cst = arith.constant 0.000000e+00 : f32
    %cst_5 = arith.constant -1.000000e+09 : f32
    %6 = vector.broadcast %cst : f32 to vector<1x16xf32>
    %7 = vector.broadcast %cst_5 : f32 to vector<1x16xf32>
    %8 = arith.select %5, %6, %7 : vector<1x16xi1>, vector<1x16xf32>
    %9 = arith.truncf %1 : vector<16x32xf32> to vector<16x32xbf16>
    %10 = arith.truncf %1 : vector<16x32xf32> to vector<16x32xbf16>
    %c0_6 = arith.constant 0 : index
    %c0_7 = arith.constant 0 : index
    %11 = vector.load %arg10[%c0_6, %c0_7] : memref<1x32xf32, #tpu.memory_space<vmem>>, vector<1x32xf32>
    %12 = vector.broadcast %11 : vector<1x32xf32> to vector<16x32xf32>
    %13 = arith.addf %1, %12 : vector<16x32xf32>
    %c0_8 = arith.constant 0 : index
    %c0_9 = arith.constant 0 : index
    %c0_10 = arith.constant 0 : index
    %14 = vector.load %arg3[%c0_8, %c0_9, %c0_10] : memref<2x32x16xbf16, #tpu.memory_space<vmem>>, vector<1x32x16xbf16>
    %15 = vector.shape_cast %14 : vector<1x32x16xbf16> to vector<32x16xbf16>
    %cst_11 = arith.constant dense<0.000000e+00> : vector<16x16xf32>
    %16 = tpu.matmul %9, %15, %cst_11 {dimension_numbers = #tpu.dot_dimension_numbers<[1], [0], [0], [1], [0, 0, 1, 1], [], []>} : vector<16x32xbf16>, vector<32x16xbf16>, vector<16x16xf32> -> vector<16x16xf32>
    %c0_12 = arith.constant 0 : index
    %c0_13 = arith.constant 0 : index
    %c0_14 = arith.constant 0 : index
    %17 = vector.load %arg4[%c0_12, %c0_13, %c0_14] : memref<2x1x16xf32, #tpu.memory_space<vmem>>, vector<1x1x16xf32>
    %18 = vector.shape_cast %17 : vector<1x1x16xf32> to vector<1x16xf32>
    %19 = vector.broadcast %18 : vector<1x16xf32> to vector<16x16xf32>
    %20 = arith.addf %16, %19 : vector<16x16xf32>
    %cst_15 = arith.constant 2.500000e-01 : f32
    %21 = vector.broadcast %cst_15 : f32 to vector<16x16xf32>
    %22 = arith.mulf %20, %21 : vector<16x16xf32>
    %c0_16 = arith.constant 0 : index
    %c0_17 = arith.constant 0 : index
    %c0_18 = arith.constant 0 : index
    %23 = vector.load %arg5[%c0_16, %c0_17, %c0_18] : memref<2x32x16xbf16, #tpu.memory_space<vmem>>, vector<1x32x16xbf16>
    %24 = vector.shape_cast %23 : vector<1x32x16xbf16> to vector<32x16xbf16>
    %cst_19 = arith.constant dense<0.000000e+00> : vector<16x16xf32>
    %25 = tpu.matmul %10, %24, %cst_19 {dimension_numbers = #tpu.dot_dimension_numbers<[1], [0], [0], [1], [0, 0, 1, 1], [], []>} : vector<16x32xbf16>, vector<32x16xbf16>, vector<16x16xf32> -> vector<16x16xf32>
    %c0_20 = arith.constant 0 : index
    %c0_21 = arith.constant 0 : index
    %c0_22 = arith.constant 0 : index
    %26 = vector.load %arg6[%c0_20, %c0_21, %c0_22] : memref<2x1x16xf32, #tpu.memory_space<vmem>>, vector<1x1x16xf32>
    %27 = vector.shape_cast %26 : vector<1x1x16xf32> to vector<1x16xf32>
    %28 = vector.broadcast %27 : vector<1x16xf32> to vector<16x16xf32>
    %29 = arith.addf %25, %28 : vector<16x16xf32>
    %c0_23 = arith.constant 0 : index
    %c0_24 = arith.constant 0 : index
    %c0_25 = arith.constant 0 : index
    %30 = vector.load %arg7[%c0_23, %c0_24, %c0_25] : memref<2x32x16xbf16, #tpu.memory_space<vmem>>, vector<1x32x16xbf16>
    %31 = vector.shape_cast %30 : vector<1x32x16xbf16> to vector<32x16xbf16>
    %cst_26 = arith.constant dense<0.000000e+00> : vector<16x16xf32>
    %32 = tpu.matmul %10, %31, %cst_26 {dimension_numbers = #tpu.dot_dimension_numbers<[1], [0], [0], [1], [0, 0, 1, 1], [], []>} : vector<16x32xbf16>, vector<32x16xbf16>, vector<16x16xf32> -> vector<16x16xf32>
    %c0_27 = arith.constant 0 : index
    %c0_28 = arith.constant 0 : index
    %c0_29 = arith.constant 0 : index
    %33 = vector.load %arg8[%c0_27, %c0_28, %c0_29] : memref<2x1x16xf32, #tpu.memory_space<vmem>>, vector<1x1x16xf32>
    %34 = vector.shape_cast %33 : vector<1x1x16xf32> to vector<1x16xf32>
    %35 = vector.broadcast %34 : vector<1x16xf32> to vector<16x16xf32>
    %36 = arith.addf %32, %35 : vector<16x16xf32>
    %37 = arith.truncf %22 : vector<16x16xf32> to vector<16x16xbf16>
    %38 = arith.truncf %29 : vector<16x16xf32> to vector<16x16xbf16>
    %cst_30 = arith.constant dense<0.000000e+00> : vector<16x16xf32>
    %39 = tpu.matmul %37, %38, %cst_30 {dimension_numbers = #tpu.dot_dimension_numbers<[1], [1], [0], [0], [0, 0, 1, 0], [], []>} : vector<16x16xbf16>, vector<16x16xbf16>, vector<16x16xf32> -> vector<16x16xf32>
    %40 = vector.broadcast %8 : vector<1x16xf32> to vector<16x16xf32>
    %41 = arith.addf %39, %40 : vector<16x16xf32>
    %cst_31 = arith.constant dense<0xFF800000> : vector<16xf32>
    %42 = vector.multi_reduction <maximumf>, %41, %cst_31 [1] : vector<16x16xf32> to vector<16xf32>
    %43 = vector.shape_cast %42 : vector<16xf32> to vector<16x1xf32>
    %44 = vector.broadcast %43 : vector<16x1xf32> to vector<16x16xf32>
    %45 = arith.subf %41, %44 : vector<16x16xf32>
    %46 = math.exp %45 : vector<16x16xf32>
    %cst_32 = arith.constant dense<0.000000e+00> : vector<16xf32>
    %47 = vector.multi_reduction <add>, %46, %cst_32 [1] : vector<16x16xf32> to vector<16xf32>
    %48 = vector.shape_cast %47 : vector<16xf32> to vector<16x1xf32>
    %49 = tpu.reciprocal %48 : vector<16x1xf32> -> vector<16x1xf32>
    %50 = vector.broadcast %49 : vector<16x1xf32> to vector<16x16xf32>
    %51 = arith.mulf %46, %50 : vector<16x16xf32>
    %52 = arith.truncf %51 : vector<16x16xf32> to vector<16x16xbf16>
    %53 = arith.truncf %36 : vector<16x16xf32> to vector<16x16xbf16>
    %cst_33 = arith.constant dense<0.000000e+00> : vector<16x16xf32>
    %54 = tpu.matmul %52, %53, %cst_33 {dimension_numbers = #tpu.dot_dimension_numbers<[1], [0], [0], [1], [0, 0, 1, 1], [], []>} : vector<16x16xbf16>, vector<16x16xbf16>, vector<16x16xf32> -> vector<16x16xf32>
    %55 = arith.truncf %54 : vector<16x16xf32> to vector<16x16xbf16>
    %c0_34 = arith.constant 0 : index
    %c0_35 = arith.constant 0 : index
    %c0_36 = arith.constant 0 : index
    %56 = vector.load %arg9[%c0_34, %c0_35, %c0_36] : memref<2x16x32xbf16, #tpu.memory_space<vmem>>, vector<1x16x32xbf16>
    %57 = vector.shape_cast %56 : vector<1x16x32xbf16> to vector<16x32xbf16>
    %cst_37 = arith.constant dense<0.000000e+00> : vector<16x32xf32>
    %58 = tpu.matmul %55, %57, %cst_37 {dimension_numbers = #tpu.dot_dimension_numbers<[1], [0], [0], [1], [0, 0, 1, 1], [], []>} : vector<16x16xbf16>, vector<16x32xbf16>, vector<16x32xf32> -> vector<16x32xf32>
    %59 = arith.addf %13, %58 : vector<16x32xf32>
    %c1 = arith.constant 1 : index
    %c0_38 = arith.constant 0 : index
    %c0_39 = arith.constant 0 : index
    %60 = vector.load %arg3[%c1, %c0_38, %c0_39] : memref<2x32x16xbf16, #tpu.memory_space<vmem>>, vector<1x32x16xbf16>
    %61 = vector.shape_cast %60 : vector<1x32x16xbf16> to vector<32x16xbf16>
    %cst_40 = arith.constant dense<0.000000e+00> : vector<16x16xf32>
    %62 = tpu.matmul %9, %61, %cst_40 {dimension_numbers = #tpu.dot_dimension_numbers<[1], [0], [0], [1], [0, 0, 1, 1], [], []>} : vector<16x32xbf16>, vector<32x16xbf16>, vector<16x16xf32> -> vector<16x16xf32>
    %c1_41 = arith.constant 1 : index
    %c0_42 = arith.constant 0 : index
    %c0_43 = arith.constant 0 : index
    %63 = vector.load %arg4[%c1_41, %c0_42, %c0_43] : memref<2x1x16xf32, #tpu.memory_space<vmem>>, vector<1x1x16xf32>
    %64 = vector.shape_cast %63 : vector<1x1x16xf32> to vector<1x16xf32>
    %65 = vector.broadcast %64 : vector<1x16xf32> to vector<16x16xf32>
    %66 = arith.addf %62, %65 : vector<16x16xf32>
    %cst_44 = arith.constant 2.500000e-01 : f32
    %67 = vector.broadcast %cst_44 : f32 to vector<16x16xf32>
    %68 = arith.mulf %66, %67 : vector<16x16xf32>
    %c1_45 = arith.constant 1 : index
    %c0_46 = arith.constant 0 : index
    %c0_47 = arith.constant 0 : index
    %69 = vector.load %arg5[%c1_45, %c0_46, %c0_47] : memref<2x32x16xbf16, #tpu.memory_space<vmem>>, vector<1x32x16xbf16>
    %70 = vector.shape_cast %69 : vector<1x32x16xbf16> to vector<32x16xbf16>
    %cst_48 = arith.constant dense<0.000000e+00> : vector<16x16xf32>
    %71 = tpu.matmul %10, %70, %cst_48 {dimension_numbers = #tpu.dot_dimension_numbers<[1], [0], [0], [1], [0, 0, 1, 1], [], []>} : vector<16x32xbf16>, vector<32x16xbf16>, vector<16x16xf32> -> vector<16x16xf32>
    %c1_49 = arith.constant 1 : index
    %c0_50 = arith.constant 0 : index
    %c0_51 = arith.constant 0 : index
    %72 = vector.load %arg6[%c1_49, %c0_50, %c0_51] : memref<2x1x16xf32, #tpu.memory_space<vmem>>, vector<1x1x16xf32>
    %73 = vector.shape_cast %72 : vector<1x1x16xf32> to vector<1x16xf32>
    %74 = vector.broadcast %73 : vector<1x16xf32> to vector<16x16xf32>
    %75 = arith.addf %71, %74 : vector<16x16xf32>
    %c1_52 = arith.constant 1 : index
    %c0_53 = arith.constant 0 : index
    %c0_54 = arith.constant 0 : index
    %76 = vector.load %arg7[%c1_52, %c0_53, %c0_54] : memref<2x32x16xbf16, #tpu.memory_space<vmem>>, vector<1x32x16xbf16>
    %77 = vector.shape_cast %76 : vector<1x32x16xbf16> to vector<32x16xbf16>
    %cst_55 = arith.constant dense<0.000000e+00> : vector<16x16xf32>
    %78 = tpu.matmul %10, %77, %cst_55 {dimension_numbers = #tpu.dot_dimension_numbers<[1], [0], [0], [1], [0, 0, 1, 1], [], []>} : vector<16x32xbf16>, vector<32x16xbf16>, vector<16x16xf32> -> vector<16x16xf32>
    %c1_56 = arith.constant 1 : index
    %c0_57 = arith.constant 0 : index
    %c0_58 = arith.constant 0 : index
    %79 = vector.load %arg8[%c1_56, %c0_57, %c0_58] : memref<2x1x16xf32, #tpu.memory_space<vmem>>, vector<1x1x16xf32>
    %80 = vector.shape_cast %79 : vector<1x1x16xf32> to vector<1x16xf32>
    %81 = vector.broadcast %80 : vector<1x16xf32> to vector<16x16xf32>
    %82 = arith.addf %78, %81 : vector<16x16xf32>
    %83 = arith.truncf %68 : vector<16x16xf32> to vector<16x16xbf16>
    %84 = arith.truncf %75 : vector<16x16xf32> to vector<16x16xbf16>
    %cst_59 = arith.constant dense<0.000000e+00> : vector<16x16xf32>
    %85 = tpu.matmul %83, %84, %cst_59 {dimension_numbers = #tpu.dot_dimension_numbers<[1], [1], [0], [0], [0, 0, 1, 0], [], []>} : vector<16x16xbf16>, vector<16x16xbf16>, vector<16x16xf32> -> vector<16x16xf32>
    %86 = vector.broadcast %8 : vector<1x16xf32> to vector<16x16xf32>
    %87 = arith.addf %85, %86 : vector<16x16xf32>
    %cst_60 = arith.constant dense<0xFF800000> : vector<16xf32>
    %88 = vector.multi_reduction <maximumf>, %87, %cst_60 [1] : vector<16x16xf32> to vector<16xf32>
    %89 = vector.shape_cast %88 : vector<16xf32> to vector<16x1xf32>
    %90 = vector.broadcast %89 : vector<16x1xf32> to vector<16x16xf32>
    %91 = arith.subf %87, %90 : vector<16x16xf32>
    %92 = math.exp %91 : vector<16x16xf32>
    %cst_61 = arith.constant dense<0.000000e+00> : vector<16xf32>
    %93 = vector.multi_reduction <add>, %92, %cst_61 [1] : vector<16x16xf32> to vector<16xf32>
    %94 = vector.shape_cast %93 : vector<16xf32> to vector<16x1xf32>
    %95 = tpu.reciprocal %94 : vector<16x1xf32> -> vector<16x1xf32>
    %96 = vector.broadcast %95 : vector<16x1xf32> to vector<16x16xf32>
    %97 = arith.mulf %92, %96 : vector<16x16xf32>
    %98 = arith.truncf %97 : vector<16x16xf32> to vector<16x16xbf16>
    %99 = arith.truncf %82 : vector<16x16xf32> to vector<16x16xbf16>
    %cst_62 = arith.constant dense<0.000000e+00> : vector<16x16xf32>
    %100 = tpu.matmul %98, %99, %cst_62 {dimension_numbers = #tpu.dot_dimension_numbers<[1], [0], [0], [1], [0, 0, 1, 1], [], []>} : vector<16x16xbf16>, vector<16x16xbf16>, vector<16x16xf32> -> vector<16x16xf32>
    %101 = arith.truncf %100 : vector<16x16xf32> to vector<16x16xbf16>
    %c1_63 = arith.constant 1 : index
    %c0_64 = arith.constant 0 : index
    %c0_65 = arith.constant 0 : index
    %102 = vector.load %arg9[%c1_63, %c0_64, %c0_65] : memref<2x16x32xbf16, #tpu.memory_space<vmem>>, vector<1x16x32xbf16>
    %103 = vector.shape_cast %102 : vector<1x16x32xbf16> to vector<16x32xbf16>
    %cst_66 = arith.constant dense<0.000000e+00> : vector<16x32xf32>
    %104 = tpu.matmul %101, %103, %cst_66 {dimension_numbers = #tpu.dot_dimension_numbers<[1], [0], [0], [1], [0, 0, 1, 1], [], []>} : vector<16x16xbf16>, vector<16x32xbf16>, vector<16x32xf32> -> vector<16x32xf32>
    %105 = arith.addf %59, %104 : vector<16x32xf32>
    %c0_67 = arith.constant 0 : index
    %c0_68 = arith.constant 0 : index
    %106 = vector.load %arg11[%c0_67, %c0_68] : memref<1x32xf32, #tpu.memory_space<vmem>>, vector<1x32xf32>
    %c0_69 = arith.constant 0 : index
    %c0_70 = arith.constant 0 : index
    %107 = vector.load %arg12[%c0_69, %c0_70] : memref<1x32xf32, #tpu.memory_space<vmem>>, vector<1x32xf32>
    %cst_71 = arith.constant dense<0.000000e+00> : vector<16xf32>
    %108 = vector.multi_reduction <add>, %105, %cst_71 [1] : vector<16x32xf32> to vector<16xf32>
    %109 = vector.shape_cast %108 : vector<16xf32> to vector<16x1xf32>
    %cst_72 = arith.constant 3.200000e+01 : f32
    %110 = vector.broadcast %cst_72 : f32 to vector<16x1xf32>
    %111 = arith.divf %109, %110 : vector<16x1xf32>
    %112 = vector.broadcast %111 : vector<16x1xf32> to vector<16x32xf32>
    %113 = arith.subf %105, %112 : vector<16x32xf32>
    %114 = arith.mulf %113, %113 : vector<16x32xf32>
    %cst_73 = arith.constant dense<0.000000e+00> : vector<16xf32>
    %115 = vector.multi_reduction <add>, %114, %cst_73 [1] : vector<16x32xf32> to vector<16xf32>
    %116 = vector.shape_cast %115 : vector<16xf32> to vector<16x1xf32>
    %cst_74 = arith.constant 3.200000e+01 : f32
    %117 = vector.broadcast %cst_74 : f32 to vector<16x1xf32>
    %118 = arith.divf %116, %117 : vector<16x1xf32>
    %119 = vector.broadcast %111 : vector<16x1xf32> to vector<16x32xf32>
    %120 = arith.subf %105, %119 : vector<16x32xf32>
    %cst_75 = arith.constant 9.99999996E-13 : f32
    %121 = vector.broadcast %cst_75 : f32 to vector<16x1xf32>
    %122 = arith.addf %118, %121 : vector<16x1xf32>
    %123 = math.rsqrt %122 : vector<16x1xf32>
    %124 = vector.broadcast %123 : vector<16x1xf32> to vector<16x32xf32>
    %125 = arith.mulf %120, %124 : vector<16x32xf32>
    %126 = vector.broadcast %106 : vector<1x32xf32> to vector<16x32xf32>
    %127 = arith.mulf %125, %126 : vector<16x32xf32>
    %128 = vector.broadcast %107 : vector<1x32xf32> to vector<16x32xf32>
    %129 = arith.addf %127, %128 : vector<16x32xf32>
    %130 = arith.truncf %129 : vector<16x32xf32> to vector<16x32xbf16>
    %c0_76 = arith.constant 0 : index
    %c0_77 = arith.constant 0 : index
    %131 = vector.load %arg13[%c0_76, %c0_77] : memref<32x64xbf16, #tpu.memory_space<vmem>>, vector<32x64xbf16>
    %cst_78 = arith.constant dense<0.000000e+00> : vector<16x64xf32>
    %132 = tpu.matmul %130, %131, %cst_78 {dimension_numbers = #tpu.dot_dimension_numbers<[1], [0], [0], [1], [0, 0, 1, 1], [], []>} : vector<16x32xbf16>, vector<32x64xbf16>, vector<16x64xf32> -> vector<16x64xf32>
    %c0_79 = arith.constant 0 : index
    %c0_80 = arith.constant 0 : index
    %133 = vector.load %arg14[%c0_79, %c0_80] : memref<1x64xf32, #tpu.memory_space<vmem>>, vector<1x64xf32>
    %134 = vector.broadcast %133 : vector<1x64xf32> to vector<16x64xf32>
    %135 = arith.addf %132, %134 : vector<16x64xf32>
    %cst_81 = arith.constant 5.000000e-01 : f32
    %136 = vector.broadcast %cst_81 : f32 to vector<16x64xf32>
    %137 = arith.mulf %136, %135 : vector<16x64xf32>
    %cst_82 = arith.constant 4.471500e-02 : f32
    %138 = vector.broadcast %cst_82 : f32 to vector<16x64xf32>
    %139 = arith.mulf %138, %135 : vector<16x64xf32>
    %140 = arith.mulf %139, %135 : vector<16x64xf32>
    %141 = arith.mulf %140, %135 : vector<16x64xf32>
    %142 = arith.addf %135, %141 : vector<16x64xf32>
    %cst_83 = arith.constant 0.797884583 : f32
    %143 = vector.broadcast %cst_83 : f32 to vector<16x64xf32>
    %144 = arith.mulf %143, %142 : vector<16x64xf32>
    %145 = math.tanh %144 : vector<16x64xf32>
    %cst_84 = arith.constant 1.000000e+00 : f32
    %146 = vector.broadcast %cst_84 : f32 to vector<16x64xf32>
    %147 = arith.addf %146, %145 : vector<16x64xf32>
    %148 = arith.mulf %137, %147 : vector<16x64xf32>
    %149 = arith.truncf %148 : vector<16x64xf32> to vector<16x64xbf16>
    %c0_85 = arith.constant 0 : index
    %c0_86 = arith.constant 0 : index
    %150 = vector.load %arg15[%c0_85, %c0_86] : memref<64x32xbf16, #tpu.memory_space<vmem>>, vector<64x32xbf16>
    %cst_87 = arith.constant dense<0.000000e+00> : vector<16x32xf32>
    %151 = tpu.matmul %149, %150, %cst_87 {dimension_numbers = #tpu.dot_dimension_numbers<[1], [0], [0], [1], [0, 0, 1, 1], [], []>} : vector<16x64xbf16>, vector<64x32xbf16>, vector<16x32xf32> -> vector<16x32xf32>
    %c0_88 = arith.constant 0 : index
    %c0_89 = arith.constant 0 : index
    %152 = vector.load %arg16[%c0_88, %c0_89] : memref<1x32xf32, #tpu.memory_space<vmem>>, vector<1x32xf32>
    %153 = vector.broadcast %152 : vector<1x32xf32> to vector<16x32xf32>
    %154 = arith.addf %151, %153 : vector<16x32xf32>
    %155 = arith.addf %154, %129 : vector<16x32xf32>
    %c0_90 = arith.constant 0 : index
    %c0_91 = arith.constant 0 : index
    %156 = vector.load %arg17[%c0_90, %c0_91] : memref<1x32xf32, #tpu.memory_space<vmem>>, vector<1x32xf32>
    %c0_92 = arith.constant 0 : index
    %c0_93 = arith.constant 0 : index
    %157 = vector.load %arg18[%c0_92, %c0_93] : memref<1x32xf32, #tpu.memory_space<vmem>>, vector<1x32xf32>
    %cst_94 = arith.constant dense<0.000000e+00> : vector<16xf32>
    %158 = vector.multi_reduction <add>, %155, %cst_94 [1] : vector<16x32xf32> to vector<16xf32>
    %159 = vector.shape_cast %158 : vector<16xf32> to vector<16x1xf32>
    %cst_95 = arith.constant 3.200000e+01 : f32
    %160 = vector.broadcast %cst_95 : f32 to vector<16x1xf32>
    %161 = arith.divf %159, %160 : vector<16x1xf32>
    %162 = vector.broadcast %161 : vector<16x1xf32> to vector<16x32xf32>
    %163 = arith.subf %155, %162 : vector<16x32xf32>
    %164 = arith.mulf %163, %163 : vector<16x32xf32>
    %cst_96 = arith.constant dense<0.000000e+00> : vector<16xf32>
    %165 = vector.multi_reduction <add>, %164, %cst_96 [1] : vector<16x32xf32> to vector<16xf32>
    %166 = vector.shape_cast %165 : vector<16xf32> to vector<16x1xf32>
    %cst_97 = arith.constant 3.200000e+01 : f32
    %167 = vector.broadcast %cst_97 : f32 to vector<16x1xf32>
    %168 = arith.divf %166, %167 : vector<16x1xf32>
    %169 = vector.broadcast %161 : vector<16x1xf32> to vector<16x32xf32>
    %170 = arith.subf %155, %169 : vector<16x32xf32>
    %cst_98 = arith.constant 9.99999996E-13 : f32
    %171 = vector.broadcast %cst_98 : f32 to vector<16x1xf32>
    %172 = arith.addf %168, %171 : vector<16x1xf32>
    %173 = math.rsqrt %172 : vector<16x1xf32>
    %174 = vector.broadcast %173 : vector<16x1xf32> to vector<16x32xf32>
    %175 = arith.mulf %170, %174 : vector<16x32xf32>
    %176 = vector.broadcast %156 : vector<1x32xf32> to vector<16x32xf32>
    %177 = arith.mulf %175, %176 : vector<16x32xf32>
    %178 = vector.broadcast %157 : vector<1x32xf32> to vector<16x32xf32>
    %179 = arith.addf %177, %178 : vector<16x32xf32>
    %c0_99 = arith.constant 0 : index
    %c0_100 = arith.constant 0 : index
    %c0_101 = arith.constant 0 : index
    %180 = vector.load %arg19[%c0_99, %c0_100, %c0_101] : memref<1x16x32xf32, #tpu.memory_space<vmem>>, vector<1x16x32xf32>
    %181 = vector.shape_cast %180 : vector<1x16x32xf32> to vector<16x32xf32>
    %182 = vector.shape_cast %179 : vector<16x32xf32> to vector<1x16x32xf32>
    tpu.vector_store %arg19[%c0_99, %c0_100, %c0_101], %182 {strides = array<i32>} : memref<1x16x32xf32, #tpu.memory_space<vmem>>, vector<1x16x32xf32>,
    return
  }
  func.func @transform_0(%arg0: i32) -> (i32, i32, i32) {
    %c0_i32 = arith.constant 0 : i32
    %c0_i32_0 = arith.constant 0 : i32
    %c0_i32_1 = arith.constant 0 : i32
    return %arg0, %c0_i32, %c0_i32_0 : i32, i32, i32
  }
  func.func @transform_1(%arg0: i32) -> (i32, i32, i32) {
    %c0_i32 = arith.constant 0 : i32
    %c0_i32_0 = arith.constant 0 : i32
    %c0_i32_1 = arith.constant 0 : i32
    return %arg0, %c0_i32, %c0_i32_0 : i32, i32, i32
  }
  func.func @transform_2(%arg0: i32) -> (i32, i32, i32) {
    %c0_i32 = arith.constant 0 : i32
    %c0_i32_0 = arith.constant 0 : i32
    %c0_i32_1 = arith.constant 0 : i32
    %c0_i32_2 = arith.constant 0 : i32
    return %c0_i32, %c0_i32_0, %c0_i32_1 : i32, i32, i32
  }
  func.func @transform_3(%arg0: i32) -> (i32, i32, i32) {
    %c0_i32 = arith.constant 0 : i32
    %c0_i32_0 = arith.constant 0 : i32
    %c0_i32_1 = arith.constant 0 : i32
    %c0_i32_2 = arith.constant 0 : i32
    return %c0_i32, %c0_i32_0, %c0_i32_1 : i32, i32, i32
  }
  func.func @transform_4(%arg0: i32) -> (i32, i32, i32) {
    %c0_i32 = arith.constant 0 : i32
    %c0_i32_0 = arith.constant 0 : i32
    %c0_i32_1 = arith.constant 0 : i32
    %c0_i32_2 = arith.constant 0 : i32
    return %c0_i32, %c0_i32_0, %c0_i32_1 : i32, i32, i32
  }
  func.func @transform_5(%arg0: i32) -> (i32, i32, i32) {
    %c0_i32 = arith.constant 0 : i32
    %c0_i32_0 = arith.constant 0 : i32
    %c0_i32_1 = arith.constant 0 : i32
    %c0_i32_2 = arith.constant 0 : i32
    return %c0_i32, %c0_i32_0, %c0_i32_1 : i32, i32, i32
  }
  func.func @transform_6(%arg0: i32) -> (i32, i32, i32) {
    %c0_i32 = arith.constant 0 : i32
    %c0_i32_0 = arith.constant 0 : i32
    %c0_i32_1 = arith.constant 0 : i32
    %c0_i32_2 = arith.constant 0 : i32
    return %c0_i32, %c0_i32_0, %c0_i32_1 : i32, i32, i32
  }
  func.func @transform_7(%arg0: i32) -> (i32, i32, i32) {
    %c0_i32 = arith.constant 0 : i32
    %c0_i32_0 = arith.constant 0 : i32
    %c0_i32_1 = arith.constant 0 : i32
    %c0_i32_2 = arith.constant 0 : i32
    return %c0_i32, %c0_i32_0, %c0_i32_1 : i32, i32, i32
  }
  func.func @transform_8(%arg0: i32) -> (i32, i32, i32) {
    %c0_i32 = arith.constant 0 : i32
    %c0_i32_0 = arith.constant 0 : i32
    %c0_i32_1 = arith.constant 0 : i32
    %c0_i32_2 = arith.constant 0 : i32
    return %c0_i32, %c0_i32_0, %c0_i32_1 : i32, i32, i32
  }
  func.func @transform_9(%arg0: i32) -> (i32, i32) {
    %c0_i32 = arith.constant 0 : i32
    %c0_i32_0 = arith.constant 0 : i32
    %c0_i32_1 = arith.constant 0 : i32
    return %c0_i32, %c0_i32_0 : i32, i32
  }
  func.func @transform_10(%arg0: i32) -> (i32, i32) {
    %c0_i32 = arith.constant 0 : i32
    %c0_i32_0 = arith.constant 0 : i32
    %c0_i32_1 = arith.constant 0 : i32
    return %c0_i32, %c0_i32_0 : i32, i32
  }
  func.func @transform_11(%arg0: i32) -> (i32, i32) {
    %c0_i32 = arith.constant 0 : i32
    %c0_i32_0 = arith.constant 0 : i32
    %c0_i32_1 = arith.constant 0 : i32
    return %c0_i32, %c0_i32_0 : i32, i32
  }
  func.func @transform_12(%arg0: i32) -> (i32, i32) {
    %c0_i32 = arith.constant 0 : i32
    %c0_i32_0 = arith.constant 0 : i32
    %c0_i32_1 = arith.constant 0 : i32
    return %c0_i32, %c0_i32_0 : i32, i32
  }
  func.func @transform_13(%arg0: i32) -> (i32, i32) {
    %c0_i32 = arith.constant 0 : i32
    %c0_i32_0 = arith.constant 0 : i32
    %c0_i32_1 = arith.constant 0 : i32
    return %c0_i32, %c0_i32_0 : i32, i32
  }
  func.func @transform_14(%arg0: i32) -> (i32, i32) {
    %c0_i32 = arith.constant 0 : i32
    %c0_i32_0 = arith.constant 0 : i32
    %c0_i32_1 = arith.constant 0 : i32
    return %c0_i32, %c0_i32_0 : i32, i32
  }
  func.func @transform_15(%arg0: i32) -> (i32, i32) {
    %c0_i32 = arith.constant 0 : i32
    %c0_i32_0 = arith.constant 0 : i32
    %c0_i32_1 = arith.constant 0 : i32
    return %c0_i32, %c0_i32_0 : i32, i32
  }
  func.func @transform_16(%arg0: i32) -> (i32, i32) {
    %c0_i32 = arith.constant 0 : i32
    %c0_i32_0 = arith.constant 0 : i32
    %c0_i32_1 = arith.constant 0 : i32
    return %c0_i32, %c0_i32_0 : i32, i32
  }
  func.func @transform_17(%arg0: i32) -> (i32, i32) {
    %c0_i32 = arith.constant 0 : i32
    %c0_i32_0 = arith.constant 0 : i32
    %c0_i32_1 = arith.constant 0 : i32
    return %c0_i32, %c0_i32_0 : i32, i32
  }
  func.func @transform_18(%arg0: i32) -> (i32, i32, i32) {
    %c0_i32 = arith.constant 0 : i32
    %c0_i32_0 = arith.constant 0 : i32
    %c0_i32_1 = arith.constant 0 : i32
    return %arg0, %c0_i32, %c0_i32_0 : i32, i32, i32
  }
}

module attributes {stable_mosaic.version = 11 : i64} {
  func.func @_decoder_layer_kernel(%arg0: i32, %arg1: memref<1x8x32xf32, #tpu.memory_space<vmem>>, %arg2: memref<1x1x8xi32, #tpu.memory_space<vmem>>, %arg3: memref<1x4x32xf32, #tpu.memory_space<vmem>>, %arg4: memref<1x1x4xi32, #tpu.memory_space<vmem>>, %arg5: memref<2x32x16xbf16, #tpu.memory_space<vmem>>, %arg6: memref<2x1x16xf32, #tpu.memory_space<vmem>>, %arg7: memref<2x32x16xbf16, #tpu.memory_space<vmem>>, %arg8: memref<2x1x16xf32, #tpu.memory_space<vmem>>, %arg9: memref<2x32x16xbf16, #tpu.memory_space<vmem>>, %arg10: memref<2x1x16xf32, #tpu.memory_space<vmem>>, %arg11: memref<2x16x32xbf16, #tpu.memory_space<vmem>>, %arg12: memref<1x32xf32, #tpu.memory_space<vmem>>, %arg13: memref<1x32xf32, #tpu.memory_space<vmem>>, %arg14: memref<1x32xf32, #tpu.memory_space<vmem>>, %arg15: memref<2x32x16xbf16, #tpu.memory_space<vmem>>, %arg16: memref<2x1x16xf32, #tpu.memory_space<vmem>>, %arg17: memref<2x32x16xbf16, #tpu.memory_space<vmem>>, %arg18: memref<2x1x16xf32, #tpu.memory_space<vmem>>, %arg19: memref<2x32x16xbf16, #tpu.memory_space<vmem>>, %arg20: memref<2x1x16xf32, #tpu.memory_space<vmem>>, %arg21: memref<2x16x32xbf16, #tpu.memory_space<vmem>>, %arg22: memref<1x32xf32, #tpu.memory_space<vmem>>, %arg23: memref<1x32xf32, #tpu.memory_space<vmem>>, %arg24: memref<1x32xf32, #tpu.memory_space<vmem>>, %arg25: memref<32x64xbf16, #tpu.memory_space<vmem>>, %arg26: memref<1x64xf32, #tpu.memory_space<vmem>>, %arg27: memref<64x32xbf16, #tpu.memory_space<vmem>>, %arg28: memref<1x32xf32, #tpu.memory_space<vmem>>, %arg29: memref<1x32xf32, #tpu.memory_space<vmem>>, %arg30: memref<1x32xf32, #tpu.memory_space<vmem>>, %arg31: memref<1x8x32xf32, #tpu.memory_space<vmem>>) attributes {dimension_semantics = [#tpu.dimension_semantics<parallel>], iteration_bounds = array<i64: 2>, scalar_prefetch = 0 : i64, scratch_operands = 0 : i64, tpu.core_type = #tpu.core_type<tc>, window_params = [{transform_indices = @transform_0, window_bounds = array<i64: 1, 8, 32>}, {transform_indices = @transform_1, window_bounds = array<i64: 1, 1, 8>}, {transform_indices = @transform_2, window_bounds = array<i64: 1, 4, 32>}, {transform_indices = @transform_3, window_bounds = array<i64: 1, 1, 4>}, {pipeline_mode = #tpu.pipeline_mode<synchronous>, transform_indices = @transform_4, window_bounds = array<i64: 2, 32, 16>}, {pipeline_mode = #tpu.pipeline_mode<synchronous>, transform_indices = @transform_5, window_bounds = array<i64: 2, 1, 16>}, {pipeline_mode = #tpu.pipeline_mode<synchronous>, transform_indices = @transform_6, window_bounds = array<i64: 2, 32, 16>}, {pipeline_mode = #tpu.pipeline_mode<synchronous>, transform_indices = @transform_7, window_bounds = array<i64: 2, 1, 16>}, {pipeline_mode = #tpu.pipeline_mode<synchronous>, transform_indices = @transform_8, window_bounds = array<i64: 2, 32, 16>}, {pipeline_mode = #tpu.pipeline_mode<synchronous>, transform_indices = @transform_9, window_bounds = array<i64: 2, 1, 16>}, {pipeline_mode = #tpu.pipeline_mode<synchronous>, transform_indices = @transform_10, window_bounds = array<i64: 2, 16, 32>}, {pipeline_mode = #tpu.pipeline_mode<synchronous>, transform_indices = @transform_11, window_bounds = array<i64: 1, 32>}, {pipeline_mode = #tpu.pipeline_mode<synchronous>, transform_indices = @transform_12, window_bounds = array<i64: 1, 32>}, {pipeline_mode = #tpu.pipeline_mode<synchronous>, transform_indices = @transform_13, window_bounds = array<i64: 1, 32>}, {pipeline_mode = #tpu.pipeline_mode<synchronous>, transform_indices = @transform_14, window_bounds = array<i64: 2, 32, 16>}, {pipeline_mode = #tpu.pipeline_mode<synchronous>, transform_indices = @transform_15, window_bounds = array<i64: 2, 1, 16>}, {pipeline_mode = #tpu.pipeline_mode<synchronous>, transform_indices = @transform_16, window_bounds = array<i64: 2, 32, 16>}, {pipeline_mode = #tpu.pipeline_mode<synchronous>, transform_indices = @transform_17, window_bounds = array<i64: 2, 1, 16>}, {pipeline_mode = #tpu.pipeline_mode<synchronous>, transform_indices = @transform_18, window_bounds = array<i64: 2, 32, 16>}, {pipeline_mode = #tpu.pipeline_mode<synchronous>, transform_indices = @transform_19, window_bounds = array<i64: 2, 1, 16>}, {pipeline_mode = #tpu.pipeline_mode<synchronous>, transform_indices = @transform_20, window_bounds = array<i64: 2, 16, 32>}, {pipeline_mode = #tpu.pipeline_mode<synchronous>, transform_indices = @transform_21, window_bounds = array<i64: 1, 32>}, {pipeline_mode = #tpu.pipeline_mode<synchronous>, transform_indices = @transform_22, window_bounds = array<i64: 1, 32>}, {pipeline_mode = #tpu.pipeline_mode<synchronous>, transform_indices = @transform_23, window_bounds = array<i64: 1, 32>}, {pipeline_mode = #tpu.pipeline_mode<synchronous>, transform_indices = @transform_24, window_bounds = array<i64: 32, 64>}, {pipeline_mode = #tpu.pipeline_mode<synchronous>, transform_indices = @transform_25, window_bounds = array<i64: 1, 64>}, {pipeline_mode = #tpu.pipeline_mode<synchronous>, transform_indices = @transform_26, window_bounds = array<i64: 64, 32>}, {pipeline_mode = #tpu.pipeline_mode<synchronous>, transform_indices = @transform_27, window_bounds = array<i64: 1, 32>}, {pipeline_mode = #tpu.pipeline_mode<synchronous>, transform_indices = @transform_28, window_bounds = array<i64: 1, 32>}, {pipeline_mode = #tpu.pipeline_mode<synchronous>, transform_indices = @transform_29, window_bounds = array<i64: 1, 32>}, {transform_indices = @transform_30, window_bounds = array<i64: 1, 8, 32>}]} {
    %c0 = arith.constant 0 : index
    %c0_0 = arith.constant 0 : index
    %c0_1 = arith.constant 0 : index
    %0 = vector.load %arg1[%c0, %c0_0, %c0_1] : memref<1x8x32xf32, #tpu.memory_space<vmem>>, vector<1x8x32xf32>
    %1 = vector.shape_cast %0 : vector<1x8x32xf32> to vector<8x32xf32>
    %c0_2 = arith.constant 0 : index
    %c0_3 = arith.constant 0 : index
    %c0_4 = arith.constant 0 : index
    %2 = vector.load %arg3[%c0_2, %c0_3, %c0_4] : memref<1x4x32xf32, #tpu.memory_space<vmem>>, vector<1x4x32xf32>
    %3 = vector.shape_cast %2 : vector<1x4x32xf32> to vector<4x32xf32>
    %c0_5 = arith.constant 0 : index
    %c0_6 = arith.constant 0 : index
    %c0_7 = arith.constant 0 : index
    %4 = vector.load %arg2[%c0_5, %c0_6, %c0_7] : memref<1x1x8xi32, #tpu.memory_space<vmem>>, vector<1x1x8xi32>
    %5 = vector.shape_cast %4 : vector<1x1x8xi32> to vector<1x8xi32>
    %c0_i32 = arith.constant 0 : i32
    %6 = vector.broadcast %c0_i32 : i32 to vector<1x8xi32>
    %7 = arith.cmpi ne, %5, %6 : vector<1x8xi32>
    %8 = tpu.iota {dimensions = array<i32: 0>} : vector<8x8xi32>
    %9 = tpu.iota {dimensions = array<i32: 1>} : vector<8x8xi32>
    %10 = arith.cmpi sle, %9, %8 : vector<8x8xi32>
    %11 = vector.broadcast %7 : vector<1x8xi1> to vector<8x8xi1>
    %12 = arith.andi %11, %10 : vector<8x8xi1>
    %cst = arith.constant 0.000000e+00 : f32
    %cst_8 = arith.constant -1.000000e+09 : f32
    %13 = vector.broadcast %cst : f32 to vector<8x8xf32>
    %14 = vector.broadcast %cst_8 : f32 to vector<8x8xf32>
    %15 = arith.select %12, %13, %14 : vector<8x8xi1>, vector<8x8xf32>
    %c0_9 = arith.constant 0 : index
    %c0_10 = arith.constant 0 : index
    %c0_11 = arith.constant 0 : index
    %16 = vector.load %arg4[%c0_9, %c0_10, %c0_11] : memref<1x1x4xi32, #tpu.memory_space<vmem>>, vector<1x1x4xi32>
    %17 = vector.shape_cast %16 : vector<1x1x4xi32> to vector<1x4xi32>
    %c0_i32_12 = arith.constant 0 : i32
    %18 = vector.broadcast %c0_i32_12 : i32 to vector<1x4xi32>
    %19 = arith.cmpi ne, %17, %18 : vector<1x4xi32>
    %cst_13 = arith.constant 0.000000e+00 : f32
    %cst_14 = arith.constant -1.000000e+09 : f32
    %20 = vector.broadcast %cst_13 : f32 to vector<1x4xf32>
    %21 = vector.broadcast %cst_14 : f32 to vector<1x4xf32>
    %22 = arith.select %19, %20, %21 : vector<1x4xi1>, vector<1x4xf32>
    %23 = arith.truncf %1 : vector<8x32xf32> to vector<8x32xbf16>
    %24 = arith.truncf %1 : vector<8x32xf32> to vector<8x32xbf16>
    %c0_15 = arith.constant 0 : index
    %c0_16 = arith.constant 0 : index
    %25 = vector.load %arg12[%c0_15, %c0_16] : memref<1x32xf32, #tpu.memory_space<vmem>>, vector<1x32xf32>
    %26 = vector.broadcast %25 : vector<1x32xf32> to vector<8x32xf32>
    %27 = arith.addf %1, %26 : vector<8x32xf32>
    %c0_17 = arith.constant 0 : index
    %c0_18 = arith.constant 0 : index
    %c0_19 = arith.constant 0 : index
    %28 = vector.load %arg5[%c0_17, %c0_18, %c0_19] : memref<2x32x16xbf16, #tpu.memory_space<vmem>>, vector<1x32x16xbf16>
    %29 = vector.shape_cast %28 : vector<1x32x16xbf16> to vector<32x16xbf16>
    %cst_20 = arith.constant dense<0.000000e+00> : vector<8x16xf32>
    %30 = tpu.matmul %23, %29, %cst_20 {dimension_numbers = #tpu.dot_dimension_numbers<[1], [0], [0], [1], [0, 0, 1, 1], [], []>} : vector<8x32xbf16>, vector<32x16xbf16>, vector<8x16xf32> -> vector<8x16xf32>
    %c0_21 = arith.constant 0 : index
    %c0_22 = arith.constant 0 : index
    %c0_23 = arith.constant 0 : index
    %31 = vector.load %arg6[%c0_21, %c0_22, %c0_23] : memref<2x1x16xf32, #tpu.memory_space<vmem>>, vector<1x1x16xf32>
    %32 = vector.shape_cast %31 : vector<1x1x16xf32> to vector<1x16xf32>
    %33 = vector.broadcast %32 : vector<1x16xf32> to vector<8x16xf32>
    %34 = arith.addf %30, %33 : vector<8x16xf32>
    %cst_24 = arith.constant 2.500000e-01 : f32
    %35 = vector.broadcast %cst_24 : f32 to vector<8x16xf32>
    %36 = arith.mulf %34, %35 : vector<8x16xf32>
    %c0_25 = arith.constant 0 : index
    %c0_26 = arith.constant 0 : index
    %c0_27 = arith.constant 0 : index
    %37 = vector.load %arg7[%c0_25, %c0_26, %c0_27] : memref<2x32x16xbf16, #tpu.memory_space<vmem>>, vector<1x32x16xbf16>
    %38 = vector.shape_cast %37 : vector<1x32x16xbf16> to vector<32x16xbf16>
    %cst_28 = arith.constant dense<0.000000e+00> : vector<8x16xf32>
    %39 = tpu.matmul %24, %38, %cst_28 {dimension_numbers = #tpu.dot_dimension_numbers<[1], [0], [0], [1], [0, 0, 1, 1], [], []>} : vector<8x32xbf16>, vector<32x16xbf16>, vector<8x16xf32> -> vector<8x16xf32>
    %c0_29 = arith.constant 0 : index
    %c0_30 = arith.constant 0 : index
    %c0_31 = arith.constant 0 : index
    %40 = vector.load %arg8[%c0_29, %c0_30, %c0_31] : memref<2x1x16xf32, #tpu.memory_space<vmem>>, vector<1x1x16xf32>
    %41 = vector.shape_cast %40 : vector<1x1x16xf32> to vector<1x16xf32>
    %42 = vector.broadcast %41 : vector<1x16xf32> to vector<8x16xf32>
    %43 = arith.addf %39, %42 : vector<8x16xf32>
    %c0_32 = arith.constant 0 : index
    %c0_33 = arith.constant 0 : index
    %c0_34 = arith.constant 0 : index
    %44 = vector.load %arg9[%c0_32, %c0_33, %c0_34] : memref<2x32x16xbf16, #tpu.memory_space<vmem>>, vector<1x32x16xbf16>
    %45 = vector.shape_cast %44 : vector<1x32x16xbf16> to vector<32x16xbf16>
    %cst_35 = arith.constant dense<0.000000e+00> : vector<8x16xf32>
    %46 = tpu.matmul %24, %45, %cst_35 {dimension_numbers = #tpu.dot_dimension_numbers<[1], [0], [0], [1], [0, 0, 1, 1], [], []>} : vector<8x32xbf16>, vector<32x16xbf16>, vector<8x16xf32> -> vector<8x16xf32>
    %c0_36 = arith.constant 0 : index
    %c0_37 = arith.constant 0 : index
    %c0_38 = arith.constant 0 : index
    %47 = vector.load %arg10[%c0_36, %c0_37, %c0_38] : memref<2x1x16xf32, #tpu.memory_space<vmem>>, vector<1x1x16xf32>
    %48 = vector.shape_cast %47 : vector<1x1x16xf32> to vector<1x16xf32>
    %49 = vector.broadcast %48 : vector<1x16xf32> to vector<8x16xf32>
    %50 = arith.addf %46, %49 : vector<8x16xf32>
    %51 = arith.truncf %36 : vector<8x16xf32> to vector<8x16xbf16>
    %52 = arith.truncf %43 : vector<8x16xf32> to vector<8x16xbf16>
    %cst_39 = arith.constant dense<0.000000e+00> : vector<8x8xf32>
    %53 = tpu.matmul %51, %52, %cst_39 {dimension_numbers = #tpu.dot_dimension_numbers<[1], [1], [0], [0], [0, 0, 1, 0], [], []>} : vector<8x16xbf16>, vector<8x16xbf16>, vector<8x8xf32> -> vector<8x8xf32>
    %54 = arith.addf %53, %15 : vector<8x8xf32>
    %cst_40 = arith.constant dense<0xFF800000> : vector<8xf32>
    %55 = vector.multi_reduction <maximumf>, %54, %cst_40 [1] : vector<8x8xf32> to vector<8xf32>
    %56 = vector.shape_cast %55 : vector<8xf32> to vector<8x1xf32>
    %57 = vector.broadcast %56 : vector<8x1xf32> to vector<8x8xf32>
    %58 = arith.subf %54, %57 : vector<8x8xf32>
    %59 = math.exp %58 : vector<8x8xf32>
    %cst_41 = arith.constant dense<0.000000e+00> : vector<8xf32>
    %60 = vector.multi_reduction <add>, %59, %cst_41 [1] : vector<8x8xf32> to vector<8xf32>
    %61 = vector.shape_cast %60 : vector<8xf32> to vector<8x1xf32>
    %62 = tpu.reciprocal %61 : vector<8x1xf32> -> vector<8x1xf32>
    %63 = vector.broadcast %62 : vector<8x1xf32> to vector<8x8xf32>
    %64 = arith.mulf %59, %63 : vector<8x8xf32>
    %65 = arith.truncf %64 : vector<8x8xf32> to vector<8x8xbf16>
    %66 = arith.truncf %50 : vector<8x16xf32> to vector<8x16xbf16>
    %cst_42 = arith.constant dense<0.000000e+00> : vector<8x16xf32>
    %67 = tpu.matmul %65, %66, %cst_42 {dimension_numbers = #tpu.dot_dimension_numbers<[1], [0], [0], [1], [0, 0, 1, 1], [], []>} : vector<8x8xbf16>, vector<8x16xbf16>, vector<8x16xf32> -> vector<8x16xf32>
    %68 = arith.truncf %67 : vector<8x16xf32> to vector<8x16xbf16>
    %c0_43 = arith.constant 0 : index
    %c0_44 = arith.constant 0 : index
    %c0_45 = arith.constant 0 : index
    %69 = vector.load %arg11[%c0_43, %c0_44, %c0_45] : memref<2x16x32xbf16, #tpu.memory_space<vmem>>, vector<1x16x32xbf16>
    %70 = vector.shape_cast %69 : vector<1x16x32xbf16> to vector<16x32xbf16>
    %cst_46 = arith.constant dense<0.000000e+00> : vector<8x32xf32>
    %71 = tpu.matmul %68, %70, %cst_46 {dimension_numbers = #tpu.dot_dimension_numbers<[1], [0], [0], [1], [0, 0, 1, 1], [], []>} : vector<8x16xbf16>, vector<16x32xbf16>, vector<8x32xf32> -> vector<8x32xf32>
    %72 = arith.addf %27, %71 : vector<8x32xf32>
    %c1 = arith.constant 1 : index
    %c0_47 = arith.constant 0 : index
    %c0_48 = arith.constant 0 : index
    %73 = vector.load %arg5[%c1, %c0_47, %c0_48] : memref<2x32x16xbf16, #tpu.memory_space<vmem>>, vector<1x32x16xbf16>
    %74 = vector.shape_cast %73 : vector<1x32x16xbf16> to vector<32x16xbf16>
    %cst_49 = arith.constant dense<0.000000e+00> : vector<8x16xf32>
    %75 = tpu.matmul %23, %74, %cst_49 {dimension_numbers = #tpu.dot_dimension_numbers<[1], [0], [0], [1], [0, 0, 1, 1], [], []>} : vector<8x32xbf16>, vector<32x16xbf16>, vector<8x16xf32> -> vector<8x16xf32>
    %c1_50 = arith.constant 1 : index
    %c0_51 = arith.constant 0 : index
    %c0_52 = arith.constant 0 : index
    %76 = vector.load %arg6[%c1_50, %c0_51, %c0_52] : memref<2x1x16xf32, #tpu.memory_space<vmem>>, vector<1x1x16xf32>
    %77 = vector.shape_cast %76 : vector<1x1x16xf32> to vector<1x16xf32>
    %78 = vector.broadcast %77 : vector<1x16xf32> to vector<8x16xf32>
    %79 = arith.addf %75, %78 : vector<8x16xf32>
    %cst_53 = arith.constant 2.500000e-01 : f32
    %80 = vector.broadcast %cst_53 : f32 to vector<8x16xf32>
    %81 = arith.mulf %79, %80 : vector<8x16xf32>
    %c1_54 = arith.constant 1 : index
    %c0_55 = arith.constant 0 : index
    %c0_56 = arith.constant 0 : index
    %82 = vector.load %arg7[%c1_54, %c0_55, %c0_56] : memref<2x32x16xbf16, #tpu.memory_space<vmem>>, vector<1x32x16xbf16>
    %83 = vector.shape_cast %82 : vector<1x32x16xbf16> to vector<32x16xbf16>
    %cst_57 = arith.constant dense<0.000000e+00> : vector<8x16xf32>
    %84 = tpu.matmul %24, %83, %cst_57 {dimension_numbers = #tpu.dot_dimension_numbers<[1], [0], [0], [1], [0, 0, 1, 1], [], []>} : vector<8x32xbf16>, vector<32x16xbf16>, vector<8x16xf32> -> vector<8x16xf32>
    %c1_58 = arith.constant 1 : index
    %c0_59 = arith.constant 0 : index
    %c0_60 = arith.constant 0 : index
    %85 = vector.load %arg8[%c1_58, %c0_59, %c0_60] : memref<2x1x16xf32, #tpu.memory_space<vmem>>, vector<1x1x16xf32>
    %86 = vector.shape_cast %85 : vector<1x1x16xf32> to vector<1x16xf32>
    %87 = vector.broadcast %86 : vector<1x16xf32> to vector<8x16xf32>
    %88 = arith.addf %84, %87 : vector<8x16xf32>
    %c1_61 = arith.constant 1 : index
    %c0_62 = arith.constant 0 : index
    %c0_63 = arith.constant 0 : index
    %89 = vector.load %arg9[%c1_61, %c0_62, %c0_63] : memref<2x32x16xbf16, #tpu.memory_space<vmem>>, vector<1x32x16xbf16>
    %90 = vector.shape_cast %89 : vector<1x32x16xbf16> to vector<32x16xbf16>
    %cst_64 = arith.constant dense<0.000000e+00> : vector<8x16xf32>
    %91 = tpu.matmul %24, %90, %cst_64 {dimension_numbers = #tpu.dot_dimension_numbers<[1], [0], [0], [1], [0, 0, 1, 1], [], []>} : vector<8x32xbf16>, vector<32x16xbf16>, vector<8x16xf32> -> vector<8x16xf32>
    %c1_65 = arith.constant 1 : index
    %c0_66 = arith.constant 0 : index
    %c0_67 = arith.constant 0 : index
    %92 = vector.load %arg10[%c1_65, %c0_66, %c0_67] : memref<2x1x16xf32, #tpu.memory_space<vmem>>, vector<1x1x16xf32>
    %93 = vector.shape_cast %92 : vector<1x1x16xf32> to vector<1x16xf32>
    %94 = vector.broadcast %93 : vector<1x16xf32> to vector<8x16xf32>
    %95 = arith.addf %91, %94 : vector<8x16xf32>
    %96 = arith.truncf %81 : vector<8x16xf32> to vector<8x16xbf16>
    %97 = arith.truncf %88 : vector<8x16xf32> to vector<8x16xbf16>
    %cst_68 = arith.constant dense<0.000000e+00> : vector<8x8xf32>
    %98 = tpu.matmul %96, %97, %cst_68 {dimension_numbers = #tpu.dot_dimension_numbers<[1], [1], [0], [0], [0, 0, 1, 0], [], []>} : vector<8x16xbf16>, vector<8x16xbf16>, vector<8x8xf32> -> vector<8x8xf32>
    %99 = arith.addf %98, %15 : vector<8x8xf32>
    %cst_69 = arith.constant dense<0xFF800000> : vector<8xf32>
    %100 = vector.multi_reduction <maximumf>, %99, %cst_69 [1] : vector<8x8xf32> to vector<8xf32>
    %101 = vector.shape_cast %100 : vector<8xf32> to vector<8x1xf32>
    %102 = vector.broadcast %101 : vector<8x1xf32> to vector<8x8xf32>
    %103 = arith.subf %99, %102 : vector<8x8xf32>
    %104 = math.exp %103 : vector<8x8xf32>
    %cst_70 = arith.constant dense<0.000000e+00> : vector<8xf32>
    %105 = vector.multi_reduction <add>, %104, %cst_70 [1] : vector<8x8xf32> to vector<8xf32>
    %106 = vector.shape_cast %105 : vector<8xf32> to vector<8x1xf32>
    %107 = tpu.reciprocal %106 : vector<8x1xf32> -> vector<8x1xf32>
    %108 = vector.broadcast %107 : vector<8x1xf32> to vector<8x8xf32>
    %109 = arith.mulf %104, %108 : vector<8x8xf32>
    %110 = arith.truncf %109 : vector<8x8xf32> to vector<8x8xbf16>
    %111 = arith.truncf %95 : vector<8x16xf32> to vector<8x16xbf16>
    %cst_71 = arith.constant dense<0.000000e+00> : vector<8x16xf32>
    %112 = tpu.matmul %110, %111, %cst_71 {dimension_numbers = #tpu.dot_dimension_numbers<[1], [0], [0], [1], [0, 0, 1, 1], [], []>} : vector<8x8xbf16>, vector<8x16xbf16>, vector<8x16xf32> -> vector<8x16xf32>
    %113 = arith.truncf %112 : vector<8x16xf32> to vector<8x16xbf16>
    %c1_72 = arith.constant 1 : index
    %c0_73 = arith.constant 0 : index
    %c0_74 = arith.constant 0 : index
    %114 = vector.load %arg11[%c1_72, %c0_73, %c0_74] : memref<2x16x32xbf16, #tpu.memory_space<vmem>>, vector<1x16x32xbf16>
    %115 = vector.shape_cast %114 : vector<1x16x32xbf16> to vector<16x32xbf16>
    %cst_75 = arith.constant dense<0.000000e+00> : vector<8x32xf32>
    %116 = tpu.matmul %113, %115, %cst_75 {dimension_numbers = #tpu.dot_dimension_numbers<[1], [0], [0], [1], [0, 0, 1, 1], [], []>} : vector<8x16xbf16>, vector<16x32xbf16>, vector<8x32xf32> -> vector<8x32xf32>
    %117 = arith.addf %72, %116 : vector<8x32xf32>
    %c0_76 = arith.constant 0 : index
    %c0_77 = arith.constant 0 : index
    %118 = vector.load %arg13[%c0_76, %c0_77] : memref<1x32xf32, #tpu.memory_space<vmem>>, vector<1x32xf32>
    %c0_78 = arith.constant 0 : index
    %c0_79 = arith.constant 0 : index
    %119 = vector.load %arg14[%c0_78, %c0_79] : memref<1x32xf32, #tpu.memory_space<vmem>>, vector<1x32xf32>
    %cst_80 = arith.constant dense<0.000000e+00> : vector<8xf32>
    %120 = vector.multi_reduction <add>, %117, %cst_80 [1] : vector<8x32xf32> to vector<8xf32>
    %121 = vector.shape_cast %120 : vector<8xf32> to vector<8x1xf32>
    %cst_81 = arith.constant 3.200000e+01 : f32
    %122 = vector.broadcast %cst_81 : f32 to vector<8x1xf32>
    %123 = arith.divf %121, %122 : vector<8x1xf32>
    %124 = vector.broadcast %123 : vector<8x1xf32> to vector<8x32xf32>
    %125 = arith.subf %117, %124 : vector<8x32xf32>
    %126 = arith.mulf %125, %125 : vector<8x32xf32>
    %cst_82 = arith.constant dense<0.000000e+00> : vector<8xf32>
    %127 = vector.multi_reduction <add>, %126, %cst_82 [1] : vector<8x32xf32> to vector<8xf32>
    %128 = vector.shape_cast %127 : vector<8xf32> to vector<8x1xf32>
    %cst_83 = arith.constant 3.200000e+01 : f32
    %129 = vector.broadcast %cst_83 : f32 to vector<8x1xf32>
    %130 = arith.divf %128, %129 : vector<8x1xf32>
    %131 = vector.broadcast %123 : vector<8x1xf32> to vector<8x32xf32>
    %132 = arith.subf %117, %131 : vector<8x32xf32>
    %cst_84 = arith.constant 9.99999996E-13 : f32
    %133 = vector.broadcast %cst_84 : f32 to vector<8x1xf32>
    %134 = arith.addf %130, %133 : vector<8x1xf32>
    %135 = math.rsqrt %134 : vector<8x1xf32>
    %136 = vector.broadcast %135 : vector<8x1xf32> to vector<8x32xf32>
    %137 = arith.mulf %132, %136 : vector<8x32xf32>
    %138 = vector.broadcast %118 : vector<1x32xf32> to vector<8x32xf32>
    %139 = arith.mulf %137, %138 : vector<8x32xf32>
    %140 = vector.broadcast %119 : vector<1x32xf32> to vector<8x32xf32>
    %141 = arith.addf %139, %140 : vector<8x32xf32>
    %142 = arith.truncf %141 : vector<8x32xf32> to vector<8x32xbf16>
    %143 = arith.truncf %3 : vector<4x32xf32> to vector<4x32xbf16>
    %c0_85 = arith.constant 0 : index
    %c0_86 = arith.constant 0 : index
    %144 = vector.load %arg22[%c0_85, %c0_86] : memref<1x32xf32, #tpu.memory_space<vmem>>, vector<1x32xf32>
    %145 = vector.broadcast %144 : vector<1x32xf32> to vector<8x32xf32>
    %146 = arith.addf %141, %145 : vector<8x32xf32>
    %c0_87 = arith.constant 0 : index
    %c0_88 = arith.constant 0 : index
    %c0_89 = arith.constant 0 : index
    %147 = vector.load %arg15[%c0_87, %c0_88, %c0_89] : memref<2x32x16xbf16, #tpu.memory_space<vmem>>, vector<1x32x16xbf16>
    %148 = vector.shape_cast %147 : vector<1x32x16xbf16> to vector<32x16xbf16>
    %cst_90 = arith.constant dense<0.000000e+00> : vector<8x16xf32>
    %149 = tpu.matmul %142, %148, %cst_90 {dimension_numbers = #tpu.dot_dimension_numbers<[1], [0], [0], [1], [0, 0, 1, 1], [], []>} : vector<8x32xbf16>, vector<32x16xbf16>, vector<8x16xf32> -> vector<8x16xf32>
    %c0_91 = arith.constant 0 : index
    %c0_92 = arith.constant 0 : index
    %c0_93 = arith.constant 0 : index
    %150 = vector.load %arg16[%c0_91, %c0_92, %c0_93] : memref<2x1x16xf32, #tpu.memory_space<vmem>>, vector<1x1x16xf32>
    %151 = vector.shape_cast %150 : vector<1x1x16xf32> to vector<1x16xf32>
    %152 = vector.broadcast %151 : vector<1x16xf32> to vector<8x16xf32>
    %153 = arith.addf %149, %152 : vector<8x16xf32>
    %cst_94 = arith.constant 2.500000e-01 : f32
    %154 = vector.broadcast %cst_94 : f32 to vector<8x16xf32>
    %155 = arith.mulf %153, %154 : vector<8x16xf32>
    %c0_95 = arith.constant 0 : index
    %c0_96 = arith.constant 0 : index
    %c0_97 = arith.constant 0 : index
    %156 = vector.load %arg17[%c0_95, %c0_96, %c0_97] : memref<2x32x16xbf16, #tpu.memory_space<vmem>>, vector<1x32x16xbf16>
    %157 = vector.shape_cast %156 : vector<1x32x16xbf16> to vector<32x16xbf16>
    %cst_98 = arith.constant dense<0.000000e+00> : vector<4x16xf32>
    %158 = tpu.matmul %143, %157, %cst_98 {dimension_numbers = #tpu.dot_dimension_numbers<[1], [0], [0], [1], [0, 0, 1, 1], [], []>} : vector<4x32xbf16>, vector<32x16xbf16>, vector<4x16xf32> -> vector<4x16xf32>
    %c0_99 = arith.constant 0 : index
    %c0_100 = arith.constant 0 : index
    %c0_101 = arith.constant 0 : index
    %159 = vector.load %arg18[%c0_99, %c0_100, %c0_101] : memref<2x1x16xf32, #tpu.memory_space<vmem>>, vector<1x1x16xf32>
    %160 = vector.shape_cast %159 : vector<1x1x16xf32> to vector<1x16xf32>
    %161 = vector.broadcast %160 : vector<1x16xf32> to vector<4x16xf32>
    %162 = arith.addf %158, %161 : vector<4x16xf32>
    %c0_102 = arith.constant 0 : index
    %c0_103 = arith.constant 0 : index
    %c0_104 = arith.constant 0 : index
    %163 = vector.load %arg19[%c0_102, %c0_103, %c0_104] : memref<2x32x16xbf16, #tpu.memory_space<vmem>>, vector<1x32x16xbf16>
    %164 = vector.shape_cast %163 : vector<1x32x16xbf16> to vector<32x16xbf16>
    %cst_105 = arith.constant dense<0.000000e+00> : vector<4x16xf32>
    %165 = tpu.matmul %143, %164, %cst_105 {dimension_numbers = #tpu.dot_dimension_numbers<[1], [0], [0], [1], [0, 0, 1, 1], [], []>} : vector<4x32xbf16>, vector<32x16xbf16>, vector<4x16xf32> -> vector<4x16xf32>
    %c0_106 = arith.constant 0 : index
    %c0_107 = arith.constant 0 : index
    %c0_108 = arith.constant 0 : index
    %166 = vector.load %arg20[%c0_106, %c0_107, %c0_108] : memref<2x1x16xf32, #tpu.memory_space<vmem>>, vector<1x1x16xf32>
    %167 = vector.shape_cast %166 : vector<1x1x16xf32> to vector<1x16xf32>
    %168 = vector.broadcast %167 : vector<1x16xf32> to vector<4x16xf32>
    %169 = arith.addf %165, %168 : vector<4x16xf32>
    %170 = arith.truncf %155 : vector<8x16xf32> to vector<8x16xbf16>
    %171 = arith.truncf %162 : vector<4x16xf32> to vector<4x16xbf16>
    %cst_109 = arith.constant dense<0.000000e+00> : vector<8x4xf32>
    %172 = tpu.matmul %170, %171, %cst_109 {dimension_numbers = #tpu.dot_dimension_numbers<[1], [1], [0], [0], [0, 0, 1, 0], [], []>} : vector<8x16xbf16>, vector<4x16xbf16>, vector<8x4xf32> -> vector<8x4xf32>
    %173 = vector.broadcast %22 : vector<1x4xf32> to vector<8x4xf32>
    %174 = arith.addf %172, %173 : vector<8x4xf32>
    %cst_110 = arith.constant dense<0xFF800000> : vector<8xf32>
    %175 = vector.multi_reduction <maximumf>, %174, %cst_110 [1] : vector<8x4xf32> to vector<8xf32>
    %176 = vector.shape_cast %175 : vector<8xf32> to vector<8x1xf32>
    %177 = vector.broadcast %176 : vector<8x1xf32> to vector<8x4xf32>
    %178 = arith.subf %174, %177 : vector<8x4xf32>
    %179 = math.exp %178 : vector<8x4xf32>
    %cst_111 = arith.constant dense<0.000000e+00> : vector<8xf32>
    %180 = vector.multi_reduction <add>, %179, %cst_111 [1] : vector<8x4xf32> to vector<8xf32>
    %181 = vector.shape_cast %180 : vector<8xf32> to vector<8x1xf32>
    %182 = tpu.reciprocal %181 : vector<8x1xf32> -> vector<8x1xf32>
    %183 = vector.broadcast %182 : vector<8x1xf32> to vector<8x4xf32>
    %184 = arith.mulf %179, %183 : vector<8x4xf32>
    %185 = arith.truncf %184 : vector<8x4xf32> to vector<8x4xbf16>
    %186 = arith.truncf %169 : vector<4x16xf32> to vector<4x16xbf16>
    %cst_112 = arith.constant dense<0.000000e+00> : vector<8x16xf32>
    %187 = tpu.matmul %185, %186, %cst_112 {dimension_numbers = #tpu.dot_dimension_numbers<[1], [0], [0], [1], [0, 0, 1, 1], [], []>} : vector<8x4xbf16>, vector<4x16xbf16>, vector<8x16xf32> -> vector<8x16xf32>
    %188 = arith.truncf %187 : vector<8x16xf32> to vector<8x16xbf16>
    %c0_113 = arith.constant 0 : index
    %c0_114 = arith.constant 0 : index
    %c0_115 = arith.constant 0 : index
    %189 = vector.load %arg21[%c0_113, %c0_114, %c0_115] : memref<2x16x32xbf16, #tpu.memory_space<vmem>>, vector<1x16x32xbf16>
    %190 = vector.shape_cast %189 : vector<1x16x32xbf16> to vector<16x32xbf16>
    %cst_116 = arith.constant dense<0.000000e+00> : vector<8x32xf32>
    %191 = tpu.matmul %188, %190, %cst_116 {dimension_numbers = #tpu.dot_dimension_numbers<[1], [0], [0], [1], [0, 0, 1, 1], [], []>} : vector<8x16xbf16>, vector<16x32xbf16>, vector<8x32xf32> -> vector<8x32xf32>
    %192 = arith.addf %146, %191 : vector<8x32xf32>
    %c1_117 = arith.constant 1 : index
    %c0_118 = arith.constant 0 : index
    %c0_119 = arith.constant 0 : index
    %193 = vector.load %arg15[%c1_117, %c0_118, %c0_119] : memref<2x32x16xbf16, #tpu.memory_space<vmem>>, vector<1x32x16xbf16>
    %194 = vector.shape_cast %193 : vector<1x32x16xbf16> to vector<32x16xbf16>
    %cst_120 = arith.constant dense<0.000000e+00> : vector<8x16xf32>
    %195 = tpu.matmul %142, %194, %cst_120 {dimension_numbers = #tpu.dot_dimension_numbers<[1], [0], [0], [1], [0, 0, 1, 1], [], []>} : vector<8x32xbf16>, vector<32x16xbf16>, vector<8x16xf32> -> vector<8x16xf32>
    %c1_121 = arith.constant 1 : index
    %c0_122 = arith.constant 0 : index
    %c0_123 = arith.constant 0 : index
    %196 = vector.load %arg16[%c1_121, %c0_122, %c0_123] : memref<2x1x16xf32, #tpu.memory_space<vmem>>, vector<1x1x16xf32>
    %197 = vector.shape_cast %196 : vector<1x1x16xf32> to vector<1x16xf32>
    %198 = vector.broadcast %197 : vector<1x16xf32> to vector<8x16xf32>
    %199 = arith.addf %195, %198 : vector<8x16xf32>
    %cst_124 = arith.constant 2.500000e-01 : f32
    %200 = vector.broadcast %cst_124 : f32 to vector<8x16xf32>
    %201 = arith.mulf %199, %200 : vector<8x16xf32>
    %c1_125 = arith.constant 1 : index
    %c0_126 = arith.constant 0 : index
    %c0_127 = arith.constant 0 : index
    %202 = vector.load %arg17[%c1_125, %c0_126, %c0_127] : memref<2x32x16xbf16, #tpu.memory_space<vmem>>, vector<1x32x16xbf16>
    %203 = vector.shape_cast %202 : vector<1x32x16xbf16> to vector<32x16xbf16>
    %cst_128 = arith.constant dense<0.000000e+00> : vector<4x16xf32>
    %204 = tpu.matmul %143, %203, %cst_128 {dimension_numbers = #tpu.dot_dimension_numbers<[1], [0], [0], [1], [0, 0, 1, 1], [], []>} : vector<4x32xbf16>, vector<32x16xbf16>, vector<4x16xf32> -> vector<4x16xf32>
    %c1_129 = arith.constant 1 : index
    %c0_130 = arith.constant 0 : index
    %c0_131 = arith.constant 0 : index
    %205 = vector.load %arg18[%c1_129, %c0_130, %c0_131] : memref<2x1x16xf32, #tpu.memory_space<vmem>>, vector<1x1x16xf32>
    %206 = vector.shape_cast %205 : vector<1x1x16xf32> to vector<1x16xf32>
    %207 = vector.broadcast %206 : vector<1x16xf32> to vector<4x16xf32>
    %208 = arith.addf %204, %207 : vector<4x16xf32>
    %c1_132 = arith.constant 1 : index
    %c0_133 = arith.constant 0 : index
    %c0_134 = arith.constant 0 : index
    %209 = vector.load %arg19[%c1_132, %c0_133, %c0_134] : memref<2x32x16xbf16, #tpu.memory_space<vmem>>, vector<1x32x16xbf16>
    %210 = vector.shape_cast %209 : vector<1x32x16xbf16> to vector<32x16xbf16>
    %cst_135 = arith.constant dense<0.000000e+00> : vector<4x16xf32>
    %211 = tpu.matmul %143, %210, %cst_135 {dimension_numbers = #tpu.dot_dimension_numbers<[1], [0], [0], [1], [0, 0, 1, 1], [], []>} : vector<4x32xbf16>, vector<32x16xbf16>, vector<4x16xf32> -> vector<4x16xf32>
    %c1_136 = arith.constant 1 : index
    %c0_137 = arith.constant 0 : index
    %c0_138 = arith.constant 0 : index
    %212 = vector.load %arg20[%c1_136, %c0_137, %c0_138] : memref<2x1x16xf32, #tpu.memory_space<vmem>>, vector<1x1x16xf32>
    %213 = vector.shape_cast %212 : vector<1x1x16xf32> to vector<1x16xf32>
    %214 = vector.broadcast %213 : vector<1x16xf32> to vector<4x16xf32>
    %215 = arith.addf %211, %214 : vector<4x16xf32>
    %216 = arith.truncf %201 : vector<8x16xf32> to vector<8x16xbf16>
    %217 = arith.truncf %208 : vector<4x16xf32> to vector<4x16xbf16>
    %cst_139 = arith.constant dense<0.000000e+00> : vector<8x4xf32>
    %218 = tpu.matmul %216, %217, %cst_139 {dimension_numbers = #tpu.dot_dimension_numbers<[1], [1], [0], [0], [0, 0, 1, 0], [], []>} : vector<8x16xbf16>, vector<4x16xbf16>, vector<8x4xf32> -> vector<8x4xf32>
    %219 = vector.broadcast %22 : vector<1x4xf32> to vector<8x4xf32>
    %220 = arith.addf %218, %219 : vector<8x4xf32>
    %cst_140 = arith.constant dense<0xFF800000> : vector<8xf32>
    %221 = vector.multi_reduction <maximumf>, %220, %cst_140 [1] : vector<8x4xf32> to vector<8xf32>
    %222 = vector.shape_cast %221 : vector<8xf32> to vector<8x1xf32>
    %223 = vector.broadcast %222 : vector<8x1xf32> to vector<8x4xf32>
    %224 = arith.subf %220, %223 : vector<8x4xf32>
    %225 = math.exp %224 : vector<8x4xf32>
    %cst_141 = arith.constant dense<0.000000e+00> : vector<8xf32>
    %226 = vector.multi_reduction <add>, %225, %cst_141 [1] : vector<8x4xf32> to vector<8xf32>
    %227 = vector.shape_cast %226 : vector<8xf32> to vector<8x1xf32>
    %228 = tpu.reciprocal %227 : vector<8x1xf32> -> vector<8x1xf32>
    %229 = vector.broadcast %228 : vector<8x1xf32> to vector<8x4xf32>
    %230 = arith.mulf %225, %229 : vector<8x4xf32>
    %231 = arith.truncf %230 : vector<8x4xf32> to vector<8x4xbf16>
    %232 = arith.truncf %215 : vector<4x16xf32> to vector<4x16xbf16>
    %cst_142 = arith.constant dense<0.000000e+00> : vector<8x16xf32>
    %233 = tpu.matmul %231, %232, %cst_142 {dimension_numbers = #tpu.dot_dimension_numbers<[1], [0], [0], [1], [0, 0, 1, 1], [], []>} : vector<8x4xbf16>, vector<4x16xbf16>, vector<8x16xf32> -> vector<8x16xf32>
    %234 = arith.truncf %233 : vector<8x16xf32> to vector<8x16xbf16>
    %c1_143 = arith.constant 1 : index
    %c0_144 = arith.constant 0 : index
    %c0_145 = arith.constant 0 : index
    %235 = vector.load %arg21[%c1_143, %c0_144, %c0_145] : memref<2x16x32xbf16, #tpu.memory_space<vmem>>, vector<1x16x32xbf16>
    %236 = vector.shape_cast %235 : vector<1x16x32xbf16> to vector<16x32xbf16>
    %cst_146 = arith.constant dense<0.000000e+00> : vector<8x32xf32>
    %237 = tpu.matmul %234, %236, %cst_146 {dimension_numbers = #tpu.dot_dimension_numbers<[1], [0], [0], [1], [0, 0, 1, 1], [], []>} : vector<8x16xbf16>, vector<16x32xbf16>, vector<8x32xf32> -> vector<8x32xf32>
    %238 = arith.addf %192, %237 : vector<8x32xf32>
    %c0_147 = arith.constant 0 : index
    %c0_148 = arith.constant 0 : index
    %239 = vector.load %arg23[%c0_147, %c0_148] : memref<1x32xf32, #tpu.memory_space<vmem>>, vector<1x32xf32>
    %c0_149 = arith.constant 0 : index
    %c0_150 = arith.constant 0 : index
    %240 = vector.load %arg24[%c0_149, %c0_150] : memref<1x32xf32, #tpu.memory_space<vmem>>, vector<1x32xf32>
    %cst_151 = arith.constant dense<0.000000e+00> : vector<8xf32>
    %241 = vector.multi_reduction <add>, %238, %cst_151 [1] : vector<8x32xf32> to vector<8xf32>
    %242 = vector.shape_cast %241 : vector<8xf32> to vector<8x1xf32>
    %cst_152 = arith.constant 3.200000e+01 : f32
    %243 = vector.broadcast %cst_152 : f32 to vector<8x1xf32>
    %244 = arith.divf %242, %243 : vector<8x1xf32>
    %245 = vector.broadcast %244 : vector<8x1xf32> to vector<8x32xf32>
    %246 = arith.subf %238, %245 : vector<8x32xf32>
    %247 = arith.mulf %246, %246 : vector<8x32xf32>
    %cst_153 = arith.constant dense<0.000000e+00> : vector<8xf32>
    %248 = vector.multi_reduction <add>, %247, %cst_153 [1] : vector<8x32xf32> to vector<8xf32>
    %249 = vector.shape_cast %248 : vector<8xf32> to vector<8x1xf32>
    %cst_154 = arith.constant 3.200000e+01 : f32
    %250 = vector.broadcast %cst_154 : f32 to vector<8x1xf32>
    %251 = arith.divf %249, %250 : vector<8x1xf32>
    %252 = vector.broadcast %244 : vector<8x1xf32> to vector<8x32xf32>
    %253 = arith.subf %238, %252 : vector<8x32xf32>
    %cst_155 = arith.constant 9.99999996E-13 : f32
    %254 = vector.broadcast %cst_155 : f32 to vector<8x1xf32>
    %255 = arith.addf %251, %254 : vector<8x1xf32>
    %256 = math.rsqrt %255 : vector<8x1xf32>
    %257 = vector.broadcast %256 : vector<8x1xf32> to vector<8x32xf32>
    %258 = arith.mulf %253, %257 : vector<8x32xf32>
    %259 = vector.broadcast %239 : vector<1x32xf32> to vector<8x32xf32>
    %260 = arith.mulf %258, %259 : vector<8x32xf32>
    %261 = vector.broadcast %240 : vector<1x32xf32> to vector<8x32xf32>
    %262 = arith.addf %260, %261 : vector<8x32xf32>
    %263 = arith.truncf %262 : vector<8x32xf32> to vector<8x32xbf16>
    %c0_156 = arith.constant 0 : index
    %c0_157 = arith.constant 0 : index
    %264 = vector.load %arg25[%c0_156, %c0_157] : memref<32x64xbf16, #tpu.memory_space<vmem>>, vector<32x64xbf16>
    %cst_158 = arith.constant dense<0.000000e+00> : vector<8x64xf32>
    %265 = tpu.matmul %263, %264, %cst_158 {dimension_numbers = #tpu.dot_dimension_numbers<[1], [0], [0], [1], [0, 0, 1, 1], [], []>} : vector<8x32xbf16>, vector<32x64xbf16>, vector<8x64xf32> -> vector<8x64xf32>
    %c0_159 = arith.constant 0 : index
    %c0_160 = arith.constant 0 : index
    %266 = vector.load %arg26[%c0_159, %c0_160] : memref<1x64xf32, #tpu.memory_space<vmem>>, vector<1x64xf32>
    %267 = vector.broadcast %266 : vector<1x64xf32> to vector<8x64xf32>
    %268 = arith.addf %265, %267 : vector<8x64xf32>
    %cst_161 = arith.constant 5.000000e-01 : f32
    %269 = vector.broadcast %cst_161 : f32 to vector<8x64xf32>
    %270 = arith.mulf %269, %268 : vector<8x64xf32>
    %cst_162 = arith.constant 4.471500e-02 : f32
    %271 = vector.broadcast %cst_162 : f32 to vector<8x64xf32>
    %272 = arith.mulf %271, %268 : vector<8x64xf32>
    %273 = arith.mulf %272, %268 : vector<8x64xf32>
    %274 = arith.mulf %273, %268 : vector<8x64xf32>
    %275 = arith.addf %268, %274 : vector<8x64xf32>
    %cst_163 = arith.constant 0.797884583 : f32
    %276 = vector.broadcast %cst_163 : f32 to vector<8x64xf32>
    %277 = arith.mulf %276, %275 : vector<8x64xf32>
    %278 = math.tanh %277 : vector<8x64xf32>
    %cst_164 = arith.constant 1.000000e+00 : f32
    %279 = vector.broadcast %cst_164 : f32 to vector<8x64xf32>
    %280 = arith.addf %279, %278 : vector<8x64xf32>
    %281 = arith.mulf %270, %280 : vector<8x64xf32>
    %282 = arith.truncf %281 : vector<8x64xf32> to vector<8x64xbf16>
    %c0_165 = arith.constant 0 : index
    %c0_166 = arith.constant 0 : index
    %283 = vector.load %arg27[%c0_165, %c0_166] : memref<64x32xbf16, #tpu.memory_space<vmem>>, vector<64x32xbf16>
    %cst_167 = arith.constant dense<0.000000e+00> : vector<8x32xf32>
    %284 = tpu.matmul %282, %283, %cst_167 {dimension_numbers = #tpu.dot_dimension_numbers<[1], [0], [0], [1], [0, 0, 1, 1], [], []>} : vector<8x64xbf16>, vector<64x32xbf16>, vector<8x32xf32> -> vector<8x32xf32>
    %c0_168 = arith.constant 0 : index
    %c0_169 = arith.constant 0 : index
    %285 = vector.load %arg28[%c0_168, %c0_169] : memref<1x32xf32, #tpu.memory_space<vmem>>, vector<1x32xf32>
    %286 = vector.broadcast %285 : vector<1x32xf32> to vector<8x32xf32>
    %287 = arith.addf %284, %286 : vector<8x32xf32>
    %288 = arith.addf %287, %262 : vector<8x32xf32>
    %c0_170 = arith.constant 0 : index
    %c0_171 = arith.constant 0 : index
    %289 = vector.load %arg29[%c0_170, %c0_171] : memref<1x32xf32, #tpu.memory_space<vmem>>, vector<1x32xf32>
    %c0_172 = arith.constant 0 : index
    %c0_173 = arith.constant 0 : index
    %290 = vector.load %arg30[%c0_172, %c0_173] : memref<1x32xf32, #tpu.memory_space<vmem>>, vector<1x32xf32>
    %cst_174 = arith.constant dense<0.000000e+00> : vector<8xf32>
    %291 = vector.multi_reduction <add>, %288, %cst_174 [1] : vector<8x32xf32> to vector<8xf32>
    %292 = vector.shape_cast %291 : vector<8xf32> to vector<8x1xf32>
    %cst_175 = arith.constant 3.200000e+01 : f32
    %293 = vector.broadcast %cst_175 : f32 to vector<8x1xf32>
    %294 = arith.divf %292, %293 : vector<8x1xf32>
    %295 = vector.broadcast %294 : vector<8x1xf32> to vector<8x32xf32>
    %296 = arith.subf %288, %295 : vector<8x32xf32>
    %297 = arith.mulf %296, %296 : vector<8x32xf32>
    %cst_176 = arith.constant dense<0.000000e+00> : vector<8xf32>
    %298 = vector.multi_reduction <add>, %297, %cst_176 [1] : vector<8x32xf32> to vector<8xf32>
    %299 = vector.shape_cast %298 : vector<8xf32> to vector<8x1xf32>
    %cst_177 = arith.constant 3.200000e+01 : f32
    %300 = vector.broadcast %cst_177 : f32 to vector<8x1xf32>
    %301 = arith.divf %299, %300 : vector<8x1xf32>
    %302 = vector.broadcast %294 : vector<8x1xf32> to vector<8x32xf32>
    %303 = arith.subf %288, %302 : vector<8x32xf32>
    %cst_178 = arith.constant 9.99999996E-13 : f32
    %304 = vector.broadcast %cst_178 : f32 to vector<8x1xf32>
    %305 = arith.addf %301, %304 : vector<8x1xf32>
    %306 = math.rsqrt %305 : vector<8x1xf32>
    %307 = vector.broadcast %306 : vector<8x1xf32> to vector<8x32xf32>
    %308 = arith.mulf %303, %307 : vector<8x32xf32>
    %309 = vector.broadcast %289 : vector<1x32xf32> to vector<8x32xf32>
    %310 = arith.mulf %308, %309 : vector<8x32xf32>
    %311 = vector.broadcast %290 : vector<1x32xf32> to vector<8x32xf32>
    %312 = arith.addf %310, %311 : vector<8x32xf32>
    %c0_179 = arith.constant 0 : index
    %c0_180 = arith.constant 0 : index
    %c0_181 = arith.constant 0 : index
    %313 = vector.load %arg31[%c0_179, %c0_180, %c0_181] : memref<1x8x32xf32, #tpu.memory_space<vmem>>, vector<1x8x32xf32>
    %314 = vector.shape_cast %313 : vector<1x8x32xf32> to vector<8x32xf32>
    %315 = vector.shape_cast %312 : vector<8x32xf32> to vector<1x8x32xf32>
    tpu.vector_store %arg31[%c0_179, %c0_180, %c0_181], %315 {strides = array<i32>} : memref<1x8x32xf32, #tpu.memory_space<vmem>>, vector<1x8x32xf32>,
    return
  }
  func.func @transform_0(%arg0: i32) -> (i32, i32, i32) {
    %c0_i32 = arith.constant 0 : i32
    %c0_i32_0 = arith.constant 0 : i32
    %c0_i32_1 = arith.constant 0 : i32
    return %arg0, %c0_i32, %c0_i32_0 : i32, i32, i32
  }
  func.func @transform_1(%arg0: i32) -> (i32, i32, i32) {
    %c0_i32 = arith.constant 0 : i32
    %c0_i32_0 = arith.constant 0 : i32
    %c0_i32_1 = arith.constant 0 : i32
    return %arg0, %c0_i32, %c0_i32_0 : i32, i32, i32
  }
  func.func @transform_2(%arg0: i32) -> (i32, i32, i32) {
    %c0_i32 = arith.constant 0 : i32
    %c0_i32_0 = arith.constant 0 : i32
    %c0_i32_1 = arith.constant 0 : i32
    return %arg0, %c0_i32, %c0_i32_0 : i32, i32, i32
  }
  func.func @transform_3(%arg0: i32) -> (i32, i32, i32) {
    %c0_i32 = arith.constant 0 : i32
    %c0_i32_0 = arith.constant 0 : i32
    %c0_i32_1 = arith.constant 0 : i32
    return %arg0, %c0_i32, %c0_i32_0 : i32, i32, i32
  }
  func.func @transform_4(%arg0: i32) -> (i32, i32, i32) {
    %c0_i32 = arith.constant 0 : i32
    %c0_i32_0 = arith.constant 0 : i32
    %c0_i32_1 = arith.constant 0 : i32
    %c0_i32_2 = arith.constant 0 : i32
    return %c0_i32, %c0_i32_0, %c0_i32_1 : i32, i32, i32
  }
  func.func @transform_5(%arg0: i32) -> (i32, i32, i32) {
    %c0_i32 = arith.constant 0 : i32
    %c0_i32_0 = arith.constant 0 : i32
    %c0_i32_1 = arith.constant 0 : i32
    %c0_i32_2 = arith.constant 0 : i32
    return %c0_i32, %c0_i32_0, %c0_i32_1 : i32, i32, i32
  }
  func.func @transform_6(%arg0: i32) -> (i32, i32, i32) {
    %c0_i32 = arith.constant 0 : i32
    %c0_i32_0 = arith.constant 0 : i32
    %c0_i32_1 = arith.constant 0 : i32
    %c0_i32_2 = arith.constant 0 : i32
    return %c0_i32, %c0_i32_0, %c0_i32_1 : i32, i32, i32
  }
  func.func @transform_7(%arg0: i32) -> (i32, i32, i32) {
    %c0_i32 = arith.constant 0 : i32
    %c0_i32_0 = arith.constant 0 : i32
    %c0_i32_1 = arith.constant 0 : i32
    %c0_i32_2 = arith.constant 0 : i32
    return %c0_i32, %c0_i32_0, %c0_i32_1 : i32, i32, i32
  }
  func.func @transform_8(%arg0: i32) -> (i32, i32, i32) {
    %c0_i32 = arith.constant 0 : i32
    %c0_i32_0 = arith.constant 0 : i32
    %c0_i32_1 = arith.constant 0 : i32
    %c0_i32_2 = arith.constant 0 : i32
    return %c0_i32, %c0_i32_0, %c0_i32_1 : i32, i32, i32
  }
  func.func @transform_9(%arg0: i32) -> (i32, i32, i32) {
    %c0_i32 = arith.constant 0 : i32
    %c0_i32_0 = arith.constant 0 : i32
    %c0_i32_1 = arith.constant 0 : i32
    %c0_i32_2 = arith.constant 0 : i32
    return %c0_i32, %c0_i32_0, %c0_i32_1 : i32, i32, i32
  }
  func.func @transform_10(%arg0: i32) -> (i32, i32, i32) {
    %c0_i32 = arith.constant 0 : i32
    %c0_i32_0 = arith.constant 0 : i32
    %c0_i32_1 = arith.constant 0 : i32
    %c0_i32_2 = arith.constant 0 : i32
    return %c0_i32, %c0_i32_0, %c0_i32_1 : i32, i32, i32
  }
  func.func @transform_11(%arg0: i32) -> (i32, i32) {
    %c0_i32 = arith.constant 0 : i32
    %c0_i32_0 = arith.constant 0 : i32
    %c0_i32_1 = arith.constant 0 : i32
    return %c0_i32, %c0_i32_0 : i32, i32
  }
  func.func @transform_12(%arg0: i32) -> (i32, i32) {
    %c0_i32 = arith.constant 0 : i32
    %c0_i32_0 = arith.constant 0 : i32
    %c0_i32_1 = arith.constant 0 : i32
    return %c0_i32, %c0_i32_0 : i32, i32
  }
  func.func @transform_13(%arg0: i32) -> (i32, i32) {
    %c0_i32 = arith.constant 0 : i32
    %c0_i32_0 = arith.constant 0 : i32
    %c0_i32_1 = arith.constant 0 : i32
    return %c0_i32, %c0_i32_0 : i32, i32
  }
  func.func @transform_14(%arg0: i32) -> (i32, i32, i32) {
    %c0_i32 = arith.constant 0 : i32
    %c0_i32_0 = arith.constant 0 : i32
    %c0_i32_1 = arith.constant 0 : i32
    %c0_i32_2 = arith.constant 0 : i32
    return %c0_i32, %c0_i32_0, %c0_i32_1 : i32, i32, i32
  }
  func.func @transform_15(%arg0: i32) -> (i32, i32, i32) {
    %c0_i32 = arith.constant 0 : i32
    %c0_i32_0 = arith.constant 0 : i32
    %c0_i32_1 = arith.constant 0 : i32
    %c0_i32_2 = arith.constant 0 : i32
    return %c0_i32, %c0_i32_0, %c0_i32_1 : i32, i32, i32
  }
  func.func @transform_16(%arg0: i32) -> (i32, i32, i32) {
    %c0_i32 = arith.constant 0 : i32
    %c0_i32_0 = arith.constant 0 : i32
    %c0_i32_1 = arith.constant 0 : i32
    %c0_i32_2 = arith.constant 0 : i32
    return %c0_i32, %c0_i32_0, %c0_i32_1 : i32, i32, i32
  }
  func.func @transform_17(%arg0: i32) -> (i32, i32, i32) {
    %c0_i32 = arith.constant 0 : i32
    %c0_i32_0 = arith.constant 0 : i32
    %c0_i32_1 = arith.constant 0 : i32
    %c0_i32_2 = arith.constant 0 : i32
    return %c0_i32, %c0_i32_0, %c0_i32_1 : i32, i32, i32
  }
  func.func @transform_18(%arg0: i32) -> (i32, i32, i32) {
    %c0_i32 = arith.constant 0 : i32
    %c0_i32_0 = arith.constant 0 : i32
    %c0_i32_1 = arith.constant 0 : i32
    %c0_i32_2 = arith.constant 0 : i32
    return %c0_i32, %c0_i32_0, %c0_i32_1 : i32, i32, i32
  }
  func.func @transform_19(%arg0: i32) -> (i32, i32, i32) {
    %c0_i32 = arith.constant 0 : i32
    %c0_i32_0 = arith.constant 0 : i32
    %c0_i32_1 = arith.constant 0 : i32
    %c0_i32_2 = arith.constant 0 : i32
    return %c0_i32, %c0_i32_0, %c0_i32_1 : i32, i32, i32
  }
  func.func @transform_20(%arg0: i32) -> (i32, i32, i32) {
    %c0_i32 = arith.constant 0 : i32
    %c0_i32_0 = arith.constant 0 : i32
    %c0_i32_1 = arith.constant 0 : i32
    %c0_i32_2 = arith.constant 0 : i32
    return %c0_i32, %c0_i32_0, %c0_i32_1 : i32, i32, i32
  }
  func.func @transform_21(%arg0: i32) -> (i32, i32) {
    %c0_i32 = arith.constant 0 : i32
    %c0_i32_0 = arith.constant 0 : i32
    %c0_i32_1 = arith.constant 0 : i32
    return %c0_i32, %c0_i32_0 : i32, i32
  }
  func.func @transform_22(%arg0: i32) -> (i32, i32) {
    %c0_i32 = arith.constant 0 : i32
    %c0_i32_0 = arith.constant 0 : i32
    %c0_i32_1 = arith.constant 0 : i32
    return %c0_i32, %c0_i32_0 : i32, i32
  }
  func.func @transform_23(%arg0: i32) -> (i32, i32) {
    %c0_i32 = arith.constant 0 : i32
    %c0_i32_0 = arith.constant 0 : i32
    %c0_i32_1 = arith.constant 0 : i32
    return %c0_i32, %c0_i32_0 : i32, i32
  }
  func.func @transform_24(%arg0: i32) -> (i32, i32) {
    %c0_i32 = arith.constant 0 : i32
    %c0_i32_0 = arith.constant 0 : i32
    %c0_i32_1 = arith.constant 0 : i32
    return %c0_i32, %c0_i32_0 : i32, i32
  }
  func.func @transform_25(%arg0: i32) -> (i32, i32) {
    %c0_i32 = arith.constant 0 : i32
    %c0_i32_0 = arith.constant 0 : i32
    %c0_i32_1 = arith.constant 0 : i32
    return %c0_i32, %c0_i32_0 : i32, i32
  }
  func.func @transform_26(%arg0: i32) -> (i32, i32) {
    %c0_i32 = arith.constant 0 : i32
    %c0_i32_0 = arith.constant 0 : i32
    %c0_i32_1 = arith.constant 0 : i32
    return %c0_i32, %c0_i32_0 : i32, i32
  }
  func.func @transform_27(%arg0: i32) -> (i32, i32) {
    %c0_i32 = arith.constant 0 : i32
    %c0_i32_0 = arith.constant 0 : i32
    %c0_i32_1 = arith.constant 0 : i32
    return %c0_i32, %c0_i32_0 : i32, i32
  }
  func.func @transform_28(%arg0: i32) -> (i32, i32) {
    %c0_i32 = arith.constant 0 : i32
    %c0_i32_0 = arith.constant 0 : i32
    %c0_i32_1 = arith.constant 0 : i32
    return %c0_i32, %c0_i32_0 : i32, i32
  }
  func.func @transform_29(%arg0: i32) -> (i32, i32) {
    %c0_i32 = arith.constant 0 : i32
    %c0_i32_0 = arith.constant 0 : i32
    %c0_i32_1 = arith.constant 0 : i32
    return %c0_i32, %c0_i32_0 : i32, i32
  }
  func.func @transform_30(%arg0: i32) -> (i32, i32, i32) {
    %c0_i32 = arith.constant 0 : i32
    %c0_i32_0 = arith.constant 0 : i32
    %c0_i32_1 = arith.constant 0 : i32
    return %arg0, %c0_i32, %c0_i32_0 : i32, i32, i32
  }
}

module attributes {stable_mosaic.version = 11 : i64} {
  func.func @_lm_head_ce_kernel(%arg0: i32, %arg1: memref<1x8x32xf32, #tpu.memory_space<vmem>>, %arg2: memref<1x8x1xi32, #tpu.memory_space<vmem>>, %arg3: memref<32x32xbf16, #tpu.memory_space<vmem>>, %arg4: memref<1x32xf32, #tpu.memory_space<vmem>>, %arg5: memref<1x32xf32, #tpu.memory_space<vmem>>, %arg6: memref<1x32xf32, #tpu.memory_space<vmem>>, %arg7: memref<32x64xbf16, #tpu.memory_space<vmem>>, %arg8: memref<1x64xf32, #tpu.memory_space<vmem>>, %arg9: memref<1x8x64xf32, #tpu.memory_space<vmem>>, %arg10: memref<1x1x2xf32, #tpu.memory_space<vmem>>) attributes {dimension_semantics = [#tpu.dimension_semantics<parallel>], iteration_bounds = array<i64: 2>, scalar_prefetch = 0 : i64, scratch_operands = 0 : i64, tpu.core_type = #tpu.core_type<tc>, window_params = [{transform_indices = @transform_0, window_bounds = array<i64: 1, 8, 32>}, {transform_indices = @transform_1, window_bounds = array<i64: 1, 8, 1>}, {pipeline_mode = #tpu.pipeline_mode<synchronous>, transform_indices = @transform_2, window_bounds = array<i64: 32, 32>}, {pipeline_mode = #tpu.pipeline_mode<synchronous>, transform_indices = @transform_3, window_bounds = array<i64: 1, 32>}, {pipeline_mode = #tpu.pipeline_mode<synchronous>, transform_indices = @transform_4, window_bounds = array<i64: 1, 32>}, {pipeline_mode = #tpu.pipeline_mode<synchronous>, transform_indices = @transform_5, window_bounds = array<i64: 1, 32>}, {pipeline_mode = #tpu.pipeline_mode<synchronous>, transform_indices = @transform_6, window_bounds = array<i64: 32, 64>}, {pipeline_mode = #tpu.pipeline_mode<synchronous>, transform_indices = @transform_7, window_bounds = array<i64: 1, 64>}, {transform_indices = @transform_8, window_bounds = array<i64: 1, 8, 64>}, {transform_indices = @transform_9, window_bounds = array<i64: 1, 1, 2>}]} {
    %c0 = arith.constant 0 : index
    %c0_0 = arith.constant 0 : index
    %c0_1 = arith.constant 0 : index
    %0 = vector.load %arg1[%c0, %c0_0, %c0_1] : memref<1x8x32xf32, #tpu.memory_space<vmem>>, vector<1x8x32xf32>
    %1 = vector.shape_cast %0 : vector<1x8x32xf32> to vector<8x32xf32>
    %2 = arith.truncf %1 : vector<8x32xf32> to vector<8x32xbf16>
    %c0_2 = arith.constant 0 : index
    %c0_3 = arith.constant 0 : index
    %3 = vector.load %arg3[%c0_2, %c0_3] : memref<32x32xbf16, #tpu.memory_space<vmem>>, vector<32x32xbf16>
    %cst = arith.constant dense<0.000000e+00> : vector<8x32xf32>
    %4 = tpu.matmul %2, %3, %cst {dimension_numbers = #tpu.dot_dimension_numbers<[1], [0], [0], [1], [0, 0, 1, 1], [], []>} : vector<8x32xbf16>, vector<32x32xbf16>, vector<8x32xf32> -> vector<8x32xf32>
    %c0_4 = arith.constant 0 : index
    %c0_5 = arith.constant 0 : index
    %5 = vector.load %arg4[%c0_4, %c0_5] : memref<1x32xf32, #tpu.memory_space<vmem>>, vector<1x32xf32>
    %6 = vector.broadcast %5 : vector<1x32xf32> to vector<8x32xf32>
    %7 = arith.addf %4, %6 : vector<8x32xf32>
    %cst_6 = arith.constant 5.000000e-01 : f32
    %8 = vector.broadcast %cst_6 : f32 to vector<8x32xf32>
    %9 = arith.mulf %8, %7 : vector<8x32xf32>
    %cst_7 = arith.constant 4.471500e-02 : f32
    %10 = vector.broadcast %cst_7 : f32 to vector<8x32xf32>
    %11 = arith.mulf %10, %7 : vector<8x32xf32>
    %12 = arith.mulf %11, %7 : vector<8x32xf32>
    %13 = arith.mulf %12, %7 : vector<8x32xf32>
    %14 = arith.addf %7, %13 : vector<8x32xf32>
    %cst_8 = arith.constant 0.797884583 : f32
    %15 = vector.broadcast %cst_8 : f32 to vector<8x32xf32>
    %16 = arith.mulf %15, %14 : vector<8x32xf32>
    %17 = math.tanh %16 : vector<8x32xf32>
    %cst_9 = arith.constant 1.000000e+00 : f32
    %18 = vector.broadcast %cst_9 : f32 to vector<8x32xf32>
    %19 = arith.addf %18, %17 : vector<8x32xf32>
    %20 = arith.mulf %9, %19 : vector<8x32xf32>
    %c0_10 = arith.constant 0 : index
    %c0_11 = arith.constant 0 : index
    %21 = vector.load %arg5[%c0_10, %c0_11] : memref<1x32xf32, #tpu.memory_space<vmem>>, vector<1x32xf32>
    %c0_12 = arith.constant 0 : index
    %c0_13 = arith.constant 0 : index
    %22 = vector.load %arg6[%c0_12, %c0_13] : memref<1x32xf32, #tpu.memory_space<vmem>>, vector<1x32xf32>
    %cst_14 = arith.constant dense<0.000000e+00> : vector<8xf32>
    %23 = vector.multi_reduction <add>, %20, %cst_14 [1] : vector<8x32xf32> to vector<8xf32>
    %24 = vector.shape_cast %23 : vector<8xf32> to vector<8x1xf32>
    %cst_15 = arith.constant 3.200000e+01 : f32
    %25 = vector.broadcast %cst_15 : f32 to vector<8x1xf32>
    %26 = arith.divf %24, %25 : vector<8x1xf32>
    %27 = vector.broadcast %26 : vector<8x1xf32> to vector<8x32xf32>
    %28 = arith.subf %20, %27 : vector<8x32xf32>
    %29 = arith.mulf %28, %28 : vector<8x32xf32>
    %cst_16 = arith.constant dense<0.000000e+00> : vector<8xf32>
    %30 = vector.multi_reduction <add>, %29, %cst_16 [1] : vector<8x32xf32> to vector<8xf32>
    %31 = vector.shape_cast %30 : vector<8xf32> to vector<8x1xf32>
    %cst_17 = arith.constant 3.200000e+01 : f32
    %32 = vector.broadcast %cst_17 : f32 to vector<8x1xf32>
    %33 = arith.divf %31, %32 : vector<8x1xf32>
    %34 = vector.broadcast %26 : vector<8x1xf32> to vector<8x32xf32>
    %35 = arith.subf %20, %34 : vector<8x32xf32>
    %cst_18 = arith.constant 9.99999996E-13 : f32
    %36 = vector.broadcast %cst_18 : f32 to vector<8x1xf32>
    %37 = arith.addf %33, %36 : vector<8x1xf32>
    %38 = math.rsqrt %37 : vector<8x1xf32>
    %39 = vector.broadcast %38 : vector<8x1xf32> to vector<8x32xf32>
    %40 = arith.mulf %35, %39 : vector<8x32xf32>
    %41 = vector.broadcast %21 : vector<1x32xf32> to vector<8x32xf32>
    %42 = arith.mulf %40, %41 : vector<8x32xf32>
    %43 = vector.broadcast %22 : vector<1x32xf32> to vector<8x32xf32>
    %44 = arith.addf %42, %43 : vector<8x32xf32>
    %45 = arith.truncf %44 : vector<8x32xf32> to vector<8x32xbf16>
    %c0_19 = arith.constant 0 : index
    %c0_20 = arith.constant 0 : index
    %46 = vector.load %arg7[%c0_19, %c0_20] : memref<32x64xbf16, #tpu.memory_space<vmem>>, vector<32x64xbf16>
    %cst_21 = arith.constant dense<0.000000e+00> : vector<8x64xf32>
    %47 = tpu.matmul %45, %46, %cst_21 {dimension_numbers = #tpu.dot_dimension_numbers<[1], [0], [0], [1], [0, 0, 1, 1], [], []>} : vector<8x32xbf16>, vector<32x64xbf16>, vector<8x64xf32> -> vector<8x64xf32>
    %c0_22 = arith.constant 0 : index
    %c0_23 = arith.constant 0 : index
    %48 = vector.load %arg8[%c0_22, %c0_23] : memref<1x64xf32, #tpu.memory_space<vmem>>, vector<1x64xf32>
    %49 = vector.broadcast %48 : vector<1x64xf32> to vector<8x64xf32>
    %50 = arith.addf %47, %49 : vector<8x64xf32>
    %c0_24 = arith.constant 0 : index
    %c0_25 = arith.constant 0 : index
    %c0_26 = arith.constant 0 : index
    %51 = vector.load %arg9[%c0_24, %c0_25, %c0_26] : memref<1x8x64xf32, #tpu.memory_space<vmem>>, vector<1x8x64xf32>
    %52 = vector.shape_cast %51 : vector<1x8x64xf32> to vector<8x64xf32>
    %53 = vector.shape_cast %50 : vector<8x64xf32> to vector<1x8x64xf32>
    tpu.vector_store %arg9[%c0_24, %c0_25, %c0_26], %53 {strides = array<i32>} : memref<1x8x64xf32, #tpu.memory_space<vmem>>, vector<1x8x64xf32>,
    %c0_27 = arith.constant 0 : index
    %c0_28 = arith.constant 0 : index
    %c0_29 = arith.constant 0 : index
    %54 = vector.load %arg2[%c0_27, %c0_28, %c0_29] : memref<1x8x1xi32, #tpu.memory_space<vmem>>, vector<1x8x1xi32>
    %55 = vector.shape_cast %54 : vector<1x8x1xi32> to vector<8x1xi32>
    %cst_30 = arith.constant dense<0xFF800000> : vector<8xf32>
    %56 = vector.multi_reduction <maximumf>, %50, %cst_30 [1] : vector<8x64xf32> to vector<8xf32>
    %57 = vector.shape_cast %56 : vector<8xf32> to vector<8x1xf32>
    %58 = vector.broadcast %57 : vector<8x1xf32> to vector<8x64xf32>
    %59 = arith.subf %50, %58 : vector<8x64xf32>
    %60 = math.exp %59 : vector<8x64xf32>
    %cst_31 = arith.constant dense<0.000000e+00> : vector<8xf32>
    %61 = vector.multi_reduction <add>, %60, %cst_31 [1] : vector<8x64xf32> to vector<8xf32>
    %62 = vector.shape_cast %61 : vector<8xf32> to vector<8x1xf32>
    %63 = math.log %62 : vector<8x1xf32>
    %64 = arith.addf %63, %57 : vector<8x1xf32>
    %65 = tpu.iota {dimensions = array<i32: 1>} : vector<8x64xi32>
    %66 = vector.broadcast %55 : vector<8x1xi32> to vector<8x64xi32>
    %67 = arith.cmpi eq, %65, %66 : vector<8x64xi32>
    %cst_32 = arith.constant 0.000000e+00 : f32
    %68 = vector.broadcast %cst_32 : f32 to vector<8x64xf32>
    %69 = arith.select %67, %50, %68 : vector<8x64xi1>, vector<8x64xf32>
    %cst_33 = arith.constant dense<0.000000e+00> : vector<8xf32>
    %70 = vector.multi_reduction <add>, %69, %cst_33 [1] : vector<8x64xf32> to vector<8xf32>
    %71 = vector.shape_cast %70 : vector<8xf32> to vector<8x1xf32>
    %c0_i32 = arith.constant 0 : i32
    %72 = vector.broadcast %c0_i32 : i32 to vector<8x1xi32>
    %73 = arith.cmpi sge, %55, %72 : vector<8x1xi32>
    %74 = arith.extui %73 : vector<8x1xi1> to vector<8x1xi32>
    %75 = arith.sitofp %74 : vector<8x1xi32> to vector<8x1xf32>
    %76 = arith.subf %64, %71 : vector<8x1xf32>
    %77 = arith.mulf %76, %75 : vector<8x1xf32>
    %78 = tpu.iota {dimensions = array<i32: 2>} : vector<1x1x2xi32>
    %c0_i32_34 = arith.constant 0 : i32
    %79 = vector.broadcast %c0_i32_34 : i32 to vector<1x1x2xi32>
    %80 = arith.cmpi eq, %78, %79 : vector<1x1x2xi32>
    %81 = vector.shape_cast %77 : vector<8x1xf32> to vector<1x8x1xf32>
    %cst_35 = arith.constant dense<0.000000e+00> : vector<1xf32>
    %82 = vector.multi_reduction <add>, %81, %cst_35 [1, 2] : vector<1x8x1xf32> to vector<1xf32>
    %83 = vector.shape_cast %82 : vector<1xf32> to vector<1x1x1xf32>
    %84 = vector.extract %83[0, 0, 0] : f32 from vector<1x1x1xf32>
    %85 = vector.shape_cast %75 : vector<8x1xf32> to vector<1x8x1xf32>
    %cst_36 = arith.constant dense<0.000000e+00> : vector<1xf32>
    %86 = vector.multi_reduction <add>, %85, %cst_36 [1, 2] : vector<1x8x1xf32> to vector<1xf32>
    %87 = vector.shape_cast %86 : vector<1xf32> to vector<1x1x1xf32>
    %88 = vector.extract %87[0, 0, 0] : f32 from vector<1x1x1xf32>
    %89 = vector.broadcast %84 : f32 to vector<1x1x2xf32>
    %90 = vector.broadcast %88 : f32 to vector<1x1x2xf32>
    %91 = arith.select %80, %89, %90 : vector<1x1x2xi1>, vector<1x1x2xf32>
    %c0_37 = arith.constant 0 : index
    %c0_38 = arith.constant 0 : index
    %c0_39 = arith.constant 0 : index
    %92 = vector.load %arg10[%c0_37, %c0_38, %c0_39] : memref<1x1x2xf32, #tpu.memory_space<vmem>>, vector<1x1x2xf32>
    tpu.vector_store %arg10[%c0_37, %c0_38, %c0_39], %91 {strides = array<i32>} : memref<1x1x2xf32, #tpu.memory_space<vmem>>, vector<1x1x2xf32>,
    return
  }
  func.func @transform_0(%arg0: i32) -> (i32, i32, i32) {
    %c0_i32 = arith.constant 0 : i32
    %c0_i32_0 = arith.constant 0 : i32
    %c0_i32_1 = arith.constant 0 : i32
    return %arg0, %c0_i32, %c0_i32_0 : i32, i32, i32
  }
  func.func @transform_1(%arg0: i32) -> (i32, i32, i32) {
    %c0_i32 = arith.constant 0 : i32
    %c0_i32_0 = arith.constant 0 : i32
    %c0_i32_1 = arith.constant 0 : i32
    return %arg0, %c0_i32, %c0_i32_0 : i32, i32, i32
  }
  func.func @transform_2(%arg0: i32) -> (i32, i32) {
    %c0_i32 = arith.constant 0 : i32
    %c0_i32_0 = arith.constant 0 : i32
    %c0_i32_1 = arith.constant 0 : i32
    return %c0_i32, %c0_i32_0 : i32, i32
  }
  func.func @transform_3(%arg0: i32) -> (i32, i32) {
    %c0_i32 = arith.constant 0 : i32
    %c0_i32_0 = arith.constant 0 : i32
    %c0_i32_1 = arith.constant 0 : i32
    return %c0_i32, %c0_i32_0 : i32, i32
  }
  func.func @transform_4(%arg0: i32) -> (i32, i32) {
    %c0_i32 = arith.constant 0 : i32
    %c0_i32_0 = arith.constant 0 : i32
    %c0_i32_1 = arith.constant 0 : i32
    return %c0_i32, %c0_i32_0 : i32, i32
  }
  func.func @transform_5(%arg0: i32) -> (i32, i32) {
    %c0_i32 = arith.constant 0 : i32
    %c0_i32_0 = arith.constant 0 : i32
    %c0_i32_1 = arith.constant 0 : i32
    return %c0_i32, %c0_i32_0 : i32, i32
  }
  func.func @transform_6(%arg0: i32) -> (i32, i32) {
    %c0_i32 = arith.constant 0 : i32
    %c0_i32_0 = arith.constant 0 : i32
    %c0_i32_1 = arith.constant 0 : i32
    return %c0_i32, %c0_i32_0 : i32, i32
  }
  func.func @transform_7(%arg0: i32) -> (i32, i32) {
    %c0_i32 = arith.constant 0 : i32
    %c0_i32_0 = arith.constant 0 : i32
    %c0_i32_1 = arith.constant 0 : i32
    return %c0_i32, %c0_i32_0 : i32, i32
  }
  func.func @transform_8(%arg0: i32) -> (i32, i32, i32) {
    %c0_i32 = arith.constant 0 : i32
    %c0_i32_0 = arith.constant 0 : i32
    %c0_i32_1 = arith.constant 0 : i32
    return %arg0, %c0_i32, %c0_i32_0 : i32, i32, i32
  }
  func.func @transform_9(%arg0: i32) -> (i32, i32, i32) {
    %c0_i32 = arith.constant 0 : i32
    %c0_i32_0 = arith.constant 0 : i32
    %c0_i32_1 = arith.constant 0 : i32
    return %arg0, %c0_i32, %c0_i32_0 : i32, i32, i32
  }
}

</mosaic_0001>

<bundles_post_ra>
// kernel: bert2bert_forward.5
= control target key start
LH: loop header
LB: loop body
LE: loop exit
PB: predicated region body
PF: predicated region fallthrough
CT: control target
= control target key end

     0   :  { %s331_s12 = smov 0   ;;  %s367_s0 = inlined_call_operand.vmem [shape: f32[2,16,32], index: 0, kind: input, shape index: {}]   ;;  %s368_s1 = inlined_call_operand.vmem [shape: f32[1,32], index: 1, kind: input, shape index: {}]   ;;  %s369_s2 = inlined_call_operand.vmem [shape: f32[1,32], index: 2, kind: input, shape index: {}]   ;;  %s370_s3 = inlined_call_operand.vmem [shape: f32[2,16,32], index: 3, kind: output, shape index: {}]  }
   0x1 LB: > { %s276_s13 = sadd.s32 4294967295, %s309_s12   ;;  %p280_p0 = scmp.ge.s32.totalorder %s309_s12, 1  ;;  %s309_s12 = sphi %s331_s12, %s13_s12  }
   0x2   : > { %p137_p1 = scmp.lt.s32.totalorder %s309_s12, 3 }
   0x4   : > { %p138_p2 = pnand %p280_p0, %p137_p1 }
   0x5   : > { %p161_p3 = scmp.lt.s32.totalorder (!%p138_p2), %s276_s13, 1  ;;  %vm175_vm0 = vcmask (!%p138_p2), 261120   ;;  %v285_v21 = vld [vmem:[%s368_s1] ss:$0 sm:$0xff] (!%p138_p2) }
   0x6   : > { %141 = sbr.rel (%p138_p2) target bundleno = 335 (0x14f), region = 32  ;;  %v286_v23 = vld [vmem:[%s369_s2] ss:$0 sm:$0xff] (!%p138_p2) }
   0xd   : > { %s372_s13 = smov (!%p161_p3, %s276_s13), 1 }
   0xe   : > { %s289_s14 = sshll.u32 %s372_s13, 4 }
   0xf   : > { %s165_s17 = scalar_lea.vmem %s367_s0, %s289_s14  ;;  %s170_s24 = scalar_lea.vmem %s370_s3, %s289_s14 }
  0x10   : > { %v171_v0 = vld [vmem:[%s165_s17] sm:$0xff]  ;;  %v172_v1 = vld [vmem:[%s165_s17 + $0x8] sm:$0xff] }
  0x11   : > { %v176_v2 = vsel %vm175_vm0, %v171_v0, 0.0  ;;  %v179_v3 = vsel %vm175_vm0, %v172_v1, 0.0 }
  0x12   : > { %177 = vadd.xlane.f32.xlu0 %v176_v2 }
  0x16   : > { %180 = vadd.xlane.f32.xlu0 %v179_v3 }
  0x9f   : > { %v178_v4 = vpop.xlane.xlu0 %177 }
  0xa0   : > { %v183_v5 = vmul.f32 0.03125, %v178_v4 }
  0xa2   : > { %v185_v6 = vsub.f32 %v171_v0, %v183_v5 }
  0xa3   : > { %v181_v7 = vpop.xlane.xlu0 %180 }
  0xa4   : > { %v184_v8 = vmul.f32 0.03125, %v181_v7  ;;  %v187_v9 = vmul.f32 %v185_v6, %v185_v6 }
  0xa6   : > { %v186_v10 = vsub.f32 %v172_v1, %v184_v8  ;;  %v189_v11 = vsel %vm175_vm0, %v187_v9, 0.0 }
  0xa7   : > { %190 = vadd.xlane.f32.xlu1 %v189_v11 }
  0xa8   : > { %v188_v12 = vmul.f32 %v186_v10, %v186_v10 }
  0xaa   : > { %v192_v13 = vsel %vm175_vm0, %v188_v12, 0.0 }
  0xab   : > { %193 = vadd.xlane.f32.xlu1 %v192_v13 }
 0x134   : > { %v191_v14 = vpop.xlane.xlu1 %190 }
 0x135   : > { %v195_v15 = vmul.f32 0.03125, %v191_v14 }
 0x137   : > { %v197_v16 = vadd.f32 1e-12, %v195_v15 }
 0x138   : > { %v194_v17 = vpop.xlane.xlu1 %193 }
 0x139   : > { %299 = vrsqrt.f32 %v197_v16  ;;  %v196_v18 = vmul.f32 0.03125, %v194_v17 }
 0x13b   : > { %v198_v19 = vadd.f32 1e-12, %v196_v18 }
 0x13d   : > { %301 = vrsqrt.f32 %v198_v19 }
 0x143   : > { %v300_v20 = vpop.eup %299 }
 0x144   : > { %v201_v22 = vmul.f32 %v300_v20, %v185_v6 }
 0x146   : > { %v209_v24 = vmul.f32 %v285_v21, %v201_v22 }
 0x147   : > { %v302_v25 = vpop.eup %301 }
 0x148   : > { %v217_v26 = vadd.f32 %v286_v23, %v209_v24  ;;  %v202_v27 = vmul.f32 %v302_v25, %v186_v10 }
 0x14a   : > { %219 = vst.msk [vmem:[%s170_s24] sm:$0xff] %vm175_vm0, %v217_v26  ;;  %v210_v28 = vmul.f32 %v285_v21, %v202_v27 }
 0x14c   : > { %v218_v29 = vadd.f32 %v286_v23, %v210_v28 }
 0x14e   : > { %220 = vst.msk [vmem:[%s170_s24 + $0x8] sm:$0xff] %vm175_vm0, %v218_v29 }
 0x14f PF: > { %s13_s12 = sadd.s32 1, %s309_s12  }
 0x150   : > { %p10_p4 = scmp.ge.s32.totalorder %s13_s12, 4  }
 0x152   :  { %12 = sbr.rel (!%p10_p4) target bundleno = 1 (0x1), region = 62 }

// kernel: bert2bert_forward.7
= control target key start
LH: loop header
LB: loop body
LE: loop exit
PB: predicated region body
PF: predicated region fallthrough
CT: control target
= control target key end

     0   :  { %s301_s12 = smov 0   ;;  %s327_s0 = inlined_call_operand.vmem [shape: f32[2,8,32], index: 0, kind: input, shape index: {}]   ;;  %s328_s1 = inlined_call_operand.vmem [shape: f32[1,32], index: 1, kind: input, shape index: {}]   ;;  %s329_s2 = inlined_call_operand.vmem [shape: f32[1,32], index: 2, kind: input, shape index: {}]   ;;  %s330_s3 = inlined_call_operand.vmem [shape: f32[2,8,32], index: 3, kind: output, shape index: {}]  }
   0x1 LB: > { %s252_s13 = sadd.s32 4294967295, %s279_s12   ;;  %p256_p0 = scmp.ge.s32.totalorder %s279_s12, 1  ;;  %s279_s12 = sphi %s301_s12, %s13_s12  }
   0x2   : > { %p136_p1 = scmp.lt.s32.totalorder %s279_s12, 3 }
   0x4   : > { %p137_p2 = pnand %p256_p0, %p136_p1 }
   0x5   : > { %p158_p3 = scmp.lt.s32.totalorder (!%p137_p2), %s252_s13, 1  ;;  %vm169_vm0 = vcmask (!%p137_p2), 261120   ;;  %v259_v11 = vld [vmem:[%s328_s1] ss:$0 sm:$0xff] (!%p137_p2) }
   0x6   : > { %140 = sbr.rel (%p137_p2) target bundleno = 331 (0x14b), region = 32  ;;  %v260_v13 = vld [vmem:[%s329_s2] ss:$0 sm:$0xff] (!%p137_p2) }
   0xd   : > { %s332_s13 = smov (!%p158_p3, %s252_s13), 1 }
   0xe   : > { %s257_s14 = sshll.u32 %s332_s13, 3 }
   0xf   : > { %s161_s17 = scalar_lea.vmem %s327_s0, %s257_s14  ;;  %s165_s24 = scalar_lea.vmem %s330_s3, %s257_s14 }
  0x10   : > { %v166_v0 = vld [vmem:[%s161_s17] sm:$0xff] }
  0x11   : > { %v170_v1 = vsel %vm169_vm0, %v166_v0, 0.0 }
  0x12   : > { %171 = vadd.xlane.f32.xlu0 %v170_v1 }
  0x9f   : > { %v172_v2 = vpop.xlane.xlu0 %171 }
  0xa0   : > { %v174_v3 = vmul.f32 0.03125, %v172_v2 }
  0xa2   : > { %v175_v4 = vsub.f32 %v166_v0, %v174_v3 }
  0xa4   : > { %v176_v5 = vmul.f32 %v175_v4, %v175_v4 }
  0xa6   : > { %v177_v6 = vsel %vm169_vm0, %v176_v5, 0.0 }
  0xa7   : > { %178 = vadd.xlane.f32.xlu0 %v177_v6 }
 0x134   : > { %v179_v7 = vpop.xlane.xlu0 %178 }
 0x135   : > { %v180_v8 = vmul.f32 0.03125, %v179_v7 }
 0x137   : > { %v181_v9 = vadd.f32 1e-12, %v180_v8 }
 0x139   : > { %271 = vrsqrt.f32 %v181_v9 }
 0x143   : > { %v272_v10 = vpop.eup %271 }
 0x144   : > { %v183_v12 = vmul.f32 %v272_v10, %v175_v4 }
 0x146   : > { %v190_v14 = vmul.f32 %v259_v11, %v183_v12 }
 0x148   : > { %v197_v15 = vadd.f32 %v260_v13, %v190_v14 }
 0x14a   : > { %198 = vst.msk [vmem:[%s165_s24] sm:$0xff] %vm169_vm0, %v197_v15 }
 0x14b PF: > { %s13_s12 = sadd.s32 1, %s279_s12  }
 0x14c   : > { %p10_p4 = scmp.ge.s32.totalorder %s13_s12, 4  }
 0x14e   :  { %12 = sbr.rel (!%p10_p4) target bundleno = 1 (0x1), region = 62 }

// kernel: bert2bert_forward.6
= control target key start
LH: loop header
LB: loop body
LE: loop exit
PB: predicated region body
PF: predicated region fallthrough
CT: control target
= control target key end

     0   :  { %s2074_s27 = smov 0   ;;  %s2308_s0 = inlined_call_operand.vmem [shape: f32[2,16,32], index: 0, kind: input, shape index: {}]   ;;  %s2309_s1 = inlined_call_operand.vmem [shape: s32[2,1,16], index: 1, kind: input, shape index: {}]   ;;  %s2310_s2 = inlined_call_operand.vmem [shape: bf16[2,32,16], index: 2, kind: input, shape index: {}]   ;;  %s2311_s3 = inlined_call_operand.vmem [shape: f32[2,1,16], index: 3, kind: input, shape index: {}]   ;;  %s2312_s4 = inlined_call_operand.vmem [shape: bf16[2,32,16], index: 4, kind: input, shape index: {}]   ;;  %s2313_s5 = inlined_call_operand.vmem [shape: f32[2,1,16], index: 5, kind: input, shape index: {}]   ;;  %s2314_s6 = inlined_call_operand.vmem [shape: bf16[2,32,16], index: 6, kind: input, shape index: {}]   ;;  %s2315_s7 = inlined_call_operand.vmem [shape: f32[2,1,16], index: 7, kind: input, shape index: {}]   ;;  %s2316_s8 = inlined_call_operand.vmem [shape: bf16[2,16,32], index: 8, kind: input, shape index: {}]   ;;  %s2317_s9 = inlined_call_operand.vmem [shape: f32[1,32], index: 9, kind: input, shape index: {}]   ;;  %s2318_s10 = inlined_call_operand.vmem [shape: f32[1,32], index: 10, kind: input, shape index: {}]   ;;  %s2319_s11 = inlined_call_operand.vmem [shape: f32[1,32], index: 11, kind: input, shape index: {}]   ;;  %s2320_s12 = inlined_call_operand.vmem [shape: bf16[32,64], index: 12, kind: input, shape index: {}]   ;;  %s2321_s13 = inlined_call_operand.vmem [shape: f32[1,64], index: 13, kind: input, shape index: {}]   ;;  %s2322_s14 = inlined_call_operand.vmem [shape: bf16[64,32], index: 14, kind: input, shape index: {}]   ;;  %s2323_s15 = inlined_call_operand.vmem [shape: f32[1,32], index: 15, kind: input, shape index: {}]   ;;  %s2324_s16 = inlined_call_operand.vmem [shape: f32[1,32], index: 16, kind: input, shape index: {}]   ;;  %s2325_s17 = inlined_call_operand.vmem [shape: f32[1,32], index: 17, kind: input, shape index: {}]   ;;  %s2326_s18 = inlined_call_operand.vmem [shape: f32[2,16,32], index: 18, kind: output, shape index: {}]  }
   0x1   :  { %2328 = sst [smem:[#allocation2_spill]] %s2308_s0 }
   0x2   :  { %2329 = sst [smem:[#allocation3_spill]] %s2309_s1 }
   0x3   :  { %2330 = sst [smem:[#allocation4_spill]] %s2310_s2 }
   0x4 LB: > { %s1684_s28 = sadd.s32 4294967295, %s1974_s27   ;;  %p1688_p0 = scmp.ge.s32.totalorder %s1974_s27, 1  ;;  %s1974_s27 = sphi %s2074_s27, %s28_s27  }
   0x5   : > { %p520_p1 = scmp.lt.s32.totalorder %s1974_s27, 3 }
   0x7   : > { %p521_p2 = pnand %p1688_p0, %p520_p1 }
   0x8   : > { %v1920_v0 = vld [vmem:[%s2312_s4] sm:$0xff] (!%p521_p2)   ;;  %v1976_v1 = vmov (!%p521_p2), 0.0   ;;  %s2331_s1 = sld [smem:[#allocation4_spill]] (!%p521_p2)  ;;  %v1922_v3 = vld [vmem:[%s2312_s4 + $0x8] sm:$0xff] (!%p521_p2)   ;;  %vm1977_vm0 = vmmov (!%p521_p2), 0   ;;  %p577_p3 = scmp.lt.s32.totalorder (!%p521_p2), %s1684_s28, 1  ;;  %v807_v29 = vlaneseq (!%p521_p2) }
   0x9   : > { %524 = sbr.rel (%p521_p2) target bundleno = 3286 (0xcd6), region = 92  ;;  %1807 = vmatprep.subr.bf16.mxu1 (!%p521_p2), %v1976_v1  ;;  %1799 = vmatprep.subr.bf16.mxu0 (!%p521_p2), %v1976_v1  ;;  %s2332_s26 = sld [smem:[#allocation2_spill]] (!%p521_p2)  ;;  %vm629_vm1 = vcmask (!%p521_p2), 261120   ;;  %v1694_v8 = vld [vmem:[%s2311_s3] ss:$0 sm:$0xff] (!%p521_p2)  ;;  %vm812_vm2 = vcmask (!%p521_p2), 130048  }
   0xa   : > { %1808 = vmatpush3.bf16.msra.mxu1 (!%p521_p2), %v1920_v0  ;;  %1811 = vmatprep.mubr.msk.bf16.mxu1 (!%p521_p2), %vm1977_vm0, %v1976_v1  ;;  %v1698_v9 = vld [vmem:[%s2313_s5] ss:$0 sm:$0xff] (!%p521_p2)  ;;  %v1925_v28 = vld [vmem:[%s2314_s6 + $0x8] sm:$0xff] (!%p521_p2)   ;;  %v808_v31 = vshrl.u32 (!%p521_p2), %v807_v29, 7  ;;  %v1978_v33 = vmov (!%p521_p2), -1e+09  }
   0xb   : > { %1809 = vmatprep.subr.bf16.mxu1 (!%p521_p2), %v1976_v1  ;;  %1803 = vmatprep.mubr.msk.bf16.mxu0 (!%p521_p2), %vm1977_vm0, %v1976_v1  ;;  %v1924_v27 = vld [vmem:[%s2314_s6] sm:$0xff] (!%p521_p2)   ;;  %vm1527_vm4 = vcmask (!%p521_p2), 523264  }
   0xc   : > { %v809_v32 = vsub.s32 (!%p521_p2), 0, %v808_v31  ;;  %v1702_v57 = vld [vmem:[%s2315_s7] ss:$0 sm:$0xff] (!%p521_p2)  ;;  %v1724_v29 = vld [vmem:[%s2313_s5 + $0x1] ss:$0 sm:$0xff] (!%p521_p2) }
   0xd   : > { %v1926_v62 = vld [vmem:[%s2316_s8] sm:$0xff] (!%p521_p2)  }
   0xe   : > { %v1921_v2 = vld [vmem:[%s2331_s1] sm:$0xff] (!%p521_p2)   ;;  %v1923_v4 = vld [vmem:[%s2331_s1 + $0x8] sm:$0xff] (!%p521_p2)   ;;  %1810 = vmatpush3.bf16.msra.mxu1 (!%p521_p2), %v1922_v3 }
   0xf   : > { %1800 = vmatpush3.bf16.msra.mxu0 (!%p521_p2), %v1921_v2  ;;  %1823 = vmatprep.subr.bf16.mxu1 (!%p521_p2), %v1976_v1 }
  0x10   : > { %1801 = vmatprep.subr.bf16.mxu0 %v1976_v1  ;;  %s2335_s28 = smov (!%p577_p3, %s1684_s28), 1 }
  0x11   : > { %s1759_s23 = sshll.u32 %s2335_s28, 4 }
  0x12   : > { %s581_s29 = scalar_lea.vmem %s2332_s26, %s1759_s23  ;;  %s589_s26 = scalar_lea.vmem %s2326_s18, %s1759_s23 }
  0x13   : > { %1802 = vmatpush3.bf16.msra.mxu0 %v1923_v4  ;;  %v2111_v5 = vld [vmem:[%s581_s29] sm:$0xff]  ;;  %v2113_v6 = vld [vmem:[%s581_s29 + $0x8] sm:$0xff]  ;;  %s2333_s29 = sld [smem:[#allocation3_spill]] }
  0x14   : > { %1815 = vmatprep.subr.bf16.mxu0 %v1976_v1  ;;  %v2118_v7 = vpack.c.bf16 %v2113_v6, %v2111_v5 }
  0x16   : > { %1812 = vmatmul.mubr.msk.bf16.vlgmr.msra.gmra.mrb[0].mxu1 %vm629_vm1, %v2118_v7  ;;  %1804 = vmatmul.mubr.msk.bf16.vlgmr.msra.gmra.mrb[0].mxu0 %vm629_vm1, %v2118_v7 }
  0x17   : > { %1825 = vmatprep.mubr.msk.bf16.mxu1 %vm1977_vm0, %v1976_v1  ;;  %1819 = vmatprep.mubr.msk.bf16.mxu0 %vm1977_vm0, %v1976_v1 }
  0x18   : > { %1816 = vmatpush3.bf16.msra.mxu0 %v1924_v27 }
  0x19   : > { %1817 = vmatprep.subr.bf16.mxu0 %v1976_v1  ;;  %s584_s30 = scalar_lea.vmem %s2333_s29, %s2335_s28 }
  0x1a   : > { %v593_v30 = vld [vmem:[%s584_s30] sm:$0x1] }
  0x1b   : > { %vm594_vm3 = vcmp.ne.s32.totalorder %v593_v30, 0 }
  0x1c   : > { %1818 = vmatpush3.bf16.msra.mxu0 %v1925_v28  ;;  %v595_v34 = vsel %vm594_vm3, 0.0, %v1978_v33 }
  0x1d   : > { %1829 = vmatprep.subr.bf16.mxu0 %v1976_v1  ;;  %v2155_v35 = vrot.slane %v595_v34, %v809_v32 }
  0x1f   : > { %1820 = vmatmul.mubr.msk.bf16.vlgmr.msra.gmra.mrb[4].mxu0 %vm629_vm1, %v2118_v7 }
  0x20   : > { %1831 = vmatprep.mubr.msk.bf16.mxu0 %vm1977_vm0, %v1976_v1 }
  0xe9   : > { %v733_v10 = vpop.f32.mrb[0].mxu1  ;;  %v667_v11 = vpop.f32.mrb[0].mxu0 }
  0xea   : > { %v1813_v12 = vpop.f32.mrb[1].mxu1  ;;  %v668_v13 = vadd.f32 %v1694_v8, %v667_v11  ;;  %v1805_v14 = vpop.f32.mrb[1].mxu0  ;;  %v734_v17 = vadd.f32 %v1698_v9, %v733_v10  ;;  %v1928_v10 = vld [vmem:[%s2331_s1 + $0x10] sm:$0xff]   ;;  %v1930_v11 = vld [vmem:[%s2331_s1 + $0x18] sm:$0xff]  }
  0xeb   : > { %v736_v15 = vpop.f32.mrb[2].mxu1  ;;  %v670_v16 = vpop.f32.mrb[2].mxu0 }
  0xec   : > { %v737_v18 = vadd.f32 %v1698_v9, %v736_v15  ;;  %v674_v19 = vmul.f32 0.25, %v668_v13  ;;  %v1814_v20 = vpop.f32.mrb[3].mxu1  ;;  %v671_v21 = vadd.f32 %v1694_v8, %v670_v16  ;;  %v1806_v22 = vpop.f32.mrb[3].mxu0  ;;  %v1927_v15 = vld [vmem:[%s2312_s4 + $0x10] sm:$0xff]  }
  0xee   : > { %v805_v23 = vpack.c.bf16 %v737_v18, %v734_v17  ;;  %v675_v24 = vmul.f32 0.25, %v671_v21  ;;  %v1929_v18 = vld [vmem:[%s2312_s4 + $0x18] sm:$0xff]   ;;  %v1715_v21 = vld [vmem:[%s2311_s3 + $0x1] ss:$0 sm:$0xff] }
  0xf0   : > { %v804_v25 = vpack.c.bf16 %v675_v24, %v674_v19  ;;  %v817_v26 = vsel %vm812_vm2, %v805_v23, 0 }
  0xf1   : > { %1824 = vmatpush3.bf16.xpose.msra.mxu1 %v817_v26 }
  0xf2   : > { %1835 = vmatprep.subr.bf16.mxu1 %v1976_v1  ;;  %v797_v54 = vpop.f32.mrb[4].mxu0 }
  0xf3   : > { %v1821_v55 = vpop.f32.mrb[5].mxu0  ;;  %v798_v59 = vadd.f32 %v1702_v57, %v797_v54 }
  0xf4   : > { %v800_v56 = vpop.f32.mrb[6].mxu0 }
  0xf5   : > { %v1822_v58 = vpop.f32.mrb[7].mxu0  ;;  %v801_v60 = vadd.f32 %v1702_v57, %v800_v56 }
  0xf7   : > { %v883_v61 = vpack.c.bf16 %v801_v60, %v798_v59  ;;  %v1733_v60 = vld [vmem:[%s2315_s7 + $0x1] ss:$0 sm:$0xff] }
  0xf8   : > { %1826 = vmatmul.mubr.msk.bf16.vlgmr.msra.gmra.mrb[4].mxu1 %vm812_vm2, %v804_v25 }
  0xf9   : > { %1837 = vmatprep.mubr.msk.bf16.mxu1 %vm1977_vm0, %v1976_v1  ;;  %1830 = vmatpush3.bf16.msra.mxu0 %v883_v61 }
  0xfa   : > { %1841 = vmatprep.subr.bf16.mxu0 %v1976_v1  ;;  %1836 = vmatpush3.bf16.msra.mxu1 %v1926_v62 }
  0xfb   : > { %1849 = vmatprep.subr.bf16.mxu1 %v1976_v1 }
 0x1cb   : > { %v853_v36 = vpop.f32.mrb[4].mxu1 }
 0x1cc   : > { %v854_v37 = vadd.f32 %v853_v36, %v2155_v35  ;;  %v1827_v38 = vpop.f32.mrb[5].mxu1 }
 0x1cd   : > { %v856_v39 = vpop.f32.mrb[6].mxu1 }
 0x1ce   : > { %v857_v40 = vadd.f32 %v856_v39, %v2155_v35  ;;  %v1828_v41 = vpop.f32.mrb[7].mxu1  ;;  %v860_v42 = vsel %vm812_vm2, %v854_v37, -inf  ;;  %v1931_v39 = vld [vmem:[%s2314_s6 + $0x10] sm:$0xff]  }
 0x1cf   : > { %861 = vmax.xlane.f32.xlu0 %v860_v42 }
 0x1d0   : > { %v863_v43 = vsel %vm812_vm2, %v857_v40, -inf }
 0x1d3   : > { %864 = vmax.xlane.f32.xlu0 %v863_v43 }
 0x25c   : > { %v862_v44 = vpop.xlane.xlu0 %861 }
 0x25d   : > { %v866_v45 = vsub.f32 %v854_v37, %v862_v44 }
 0x25f   : > { %v868_v46 = vmul.f32 1.442695, %v866_v45 }
 0x260   : > { %v865_v47 = vpop.xlane.xlu0 %864 }
 0x261   : > { %1940 = vpow2.f32 %v868_v46  ;;  %v867_v48 = vsub.f32 %v857_v40, %v865_v47  ;;  %v1932_v40 = vld [vmem:[%s2314_s6 + $0x18] sm:$0xff]  }
 0x263   : > { %v870_v49 = vmul.f32 1.442695, %v867_v48 }
 0x265   : > { %1942 = vpow2.f32 %v870_v49 }
 0x26b   : > { %v1941_v50 = vpop.eup %1940 }
 0x26c   : > { %v872_v51 = vsel %vm812_vm2, %v1941_v50, 0.0 }
 0x26d   : > { %873 = vadd.xlane.f32.xlu1 %v872_v51 }
 0x26f   : > { %v1943_v52 = vpop.eup %1942 }
 0x270   : > { %v875_v53 = vsel %vm812_vm2, %v1943_v52, 0.0 }
 0x271   : > { %876 = vadd.xlane.f32.xlu1 %v875_v53 }
 0x2fa   : > { %v874_v63 = vpop.xlane.xlu1 %873 }
 0x2fb   : > { %1944 = vrcp.f32 %v874_v63 }
 0x2fe   : > { %v877_v0 = vpop.xlane.xlu1 %876 }
 0x2ff   : > { %1946 = vrcp.f32 %v877_v0 }
 0x305   : > { %v1945_v2 = vpop.eup %1944 }
 0x306   : > { %v880_v4 = vmul.f32 %v1945_v2, %v1941_v50  ;;  %v1933_v2 = vld [vmem:[%s2316_s8 + $0x8] sm:$0xff]  }
 0x309   : > { %v1947_v3 = vpop.eup %1946 }
 0x30a   : > { %v881_v8 = vmul.f32 %v1947_v3, %v1943_v52 }
 0x30c   : > { %v882_v9 = vpack.c.bf16 %v881_v8, %v880_v4 }
 0x30e   : > { %1832 = vmatmul.mubr.msk.bf16.vlgmr.msra.gmra.mrb[8].mxu0 %vm812_vm2, %v882_v9 }
 0x30f   : > { %1845 = vmatprep.mubr.msk.bf16.mxu0 %vm1977_vm0, %v1976_v1  ;;  %1842 = vmatpush3.bf16.msra.mxu0 %v1928_v10 }
 0x310   : > { %1843 = vmatprep.subr.bf16.mxu0 %v1976_v1 }
 0x313   : > { %1844 = vmatpush3.bf16.msra.mxu0 %v1930_v11 }
 0x314   : > { %1857 = vmatprep.subr.bf16.mxu0 %v1976_v1 }
 0x316   : > { %1846 = vmatmul.mubr.msk.bf16.vlgmr.msra.gmra.mrb[12].mxu0 %vm629_vm1, %v2118_v7 }
 0x317   : > { %1861 = vmatprep.mubr.msk.bf16.mxu0 %vm1977_vm0, %v1976_v1  ;;  %1858 = vmatpush3.bf16.msra.mxu0 %v1931_v39  ;;  %v1935_v39 = vld [vmem:[%s2320_s12 + $0x8] sm:$0xff]  }
 0x318   : > { %1859 = vmatprep.subr.bf16.mxu0 %v1976_v1 }
 0x31b   : > { %1860 = vmatpush3.bf16.msra.mxu0 %v1932_v40 }
 0x31c   : > { %1871 = vmatprep.subr.bf16.mxu0 %v1976_v1 }
 0x31e   : > { %1862 = vmatmul.mubr.msk.bf16.vlgmr.msra.gmra.mrb[16].mxu0 %vm629_vm1, %v2118_v7 }
 0x31f   : > { %1873 = vmatprep.mubr.msk.bf16.mxu0 %vm1977_vm0, %v1976_v1 }
 0x3e1   : > { %v921_v12 = vpop.f32.mrb[8].mxu0 }
 0x3e2   : > { %v1833_v13 = vpop.f32.mrb[9].mxu0 }
 0x3e3   : > { %v924_v14 = vpop.f32.mrb[10].mxu0 }
 0x3e4   : > { %v928_v16 = vpack.c.bf16 %v924_v14, %v921_v12  ;;  %v1834_v17 = vpop.f32.mrb[11].mxu0 }
 0x3e6   : > { %1838 = vmatmul.mubr.msk.bf16.vlgmr.msra.gmra.mrb[8].mxu1 %vm812_vm2, %v928_v16 }
 0x3e7   : > { %1850 = vmatpush3.bf16.msra.mxu1 %v1927_v15  ;;  %1853 = vmatprep.mubr.msk.bf16.mxu1 %vm1977_vm0, %v1976_v1 }
 0x3e8   : > { %1851 = vmatprep.subr.bf16.mxu1 %v1976_v1 }
 0x3e9   : > { %v1042_v19 = vpop.f32.mrb[12].mxu0 }
 0x3ea   : > { %v1847_v20 = vpop.f32.mrb[13].mxu0  ;;  %v1043_v23 = vadd.f32 %v1715_v21, %v1042_v19 }
 0x3eb   : > { %1852 = vmatpush3.bf16.msra.mxu1 %v1929_v18  ;;  %v1045_v22 = vpop.f32.mrb[14].mxu0  ;;  %v1693_v18 = vld [vmem:[%s2317_s9] ss:$0 sm:$0xff] }
 0x3ec   : > { %1865 = vmatprep.subr.bf16.mxu1 %v1976_v1  ;;  %v1046_v24 = vadd.f32 %v1715_v21, %v1045_v22  ;;  %v1848_v25 = vpop.f32.mrb[15].mxu0  ;;  %v1049_v26 = vmul.f32 0.25, %v1043_v23  ;;  %v604_v19 = vadd.f32 %v1693_v18, %v2111_v5  ;;  %v605_v20 = vadd.f32 %v1693_v18, %v2113_v6 }
 0x3ee   : > { %1854 = vmatmul.mubr.msk.bf16.vlgmr.msra.gmra.mrb[12].mxu1 %vm629_vm1, %v2118_v7  ;;  %v1050_v27 = vmul.f32 0.25, %v1046_v24 }
 0x3ef   : > { %1867 = vmatprep.mubr.msk.bf16.mxu1 %vm1977_vm0, %v1976_v1 }
 0x3f0   : > { %v1183_v28 = vpack.c.bf16 %v1050_v27, %v1049_v26 }
 0x3f1   : > { %v1176_v57 = vpop.f32.mrb[16].mxu0 }
 0x3f2   : > { %v1863_v58 = vpop.f32.mrb[17].mxu0  ;;  %v1177_v62 = vadd.f32 %v1733_v60, %v1176_v57  ;;  %v1938_v57 = vld [vmem:[%s2322_s14 + $0x10] sm:$0xff]  }
 0x3f3   : > { %v1179_v59 = vpop.f32.mrb[18].mxu0  ;;  %v1939_v58 = vld [vmem:[%s2322_s14 + $0x18] sm:$0xff]  }
 0x3f4   : > { %v1864_v61 = vpop.f32.mrb[19].mxu0  ;;  %v1180_v63 = vadd.f32 %v1733_v60, %v1179_v59  ;;  %v1745_v59 = vld [vmem:[%s2321_s13] ss:$0 sm:$0xff] }
 0x3f6   : > { %v1255_v0 = vpack.c.bf16 %v1180_v63, %v1177_v62 }
 0x3f8   : > { %1872 = vmatpush3.bf16.msra.mxu0 %v1255_v0 }
 0x3f9   : > { %1883 = vmatprep.subr.bf16.mxu0 %v1976_v1 }
 0x4c1   : > { %v1110_v30 = vpop.f32.mrb[12].mxu1 }
 0x4c2   : > { %v1855_v31 = vpop.f32.mrb[13].mxu1  ;;  %v1111_v33 = vadd.f32 %v1724_v29, %v1110_v30 }
 0x4c3   : > { %v1113_v32 = vpop.f32.mrb[14].mxu1 }
 0x4c4   : > { %v1114_v34 = vadd.f32 %v1724_v29, %v1113_v32  ;;  %v1856_v36 = vpop.f32.mrb[15].mxu1 }
 0x4c6   : > { %v1184_v37 = vpack.c.bf16 %v1114_v34, %v1111_v33 }
 0x4c8   : > { %v1189_v38 = vsel %vm812_vm2, %v1184_v37, 0 }
 0x4c9   : > { %1866 = vmatpush3.bf16.xpose.msra.mxu1 %v1189_v38  ;;  %v1934_v38 = vld [vmem:[%s2320_s12] sm:$0xff]  }
 0x4ca   : > { %1877 = vmatprep.subr.bf16.mxu1 %v1976_v1 }
 0x4d0   : > { %1868 = vmatmul.mubr.msk.bf16.vlgmr.msra.gmra.mrb[16].mxu1 %vm812_vm2, %v1183_v28 }
 0x4d1   : > { %1879 = vmatprep.mubr.msk.bf16.mxu1 %vm1977_vm0, %v1976_v1  ;;  %1878 = vmatpush3.bf16.msra.mxu1 %v1933_v2 }
 0x4d2   : > { %1891 = vmatprep.subr.bf16.mxu1 %v1976_v1 }
 0x5a3   : > { %v1225_v41 = vpop.f32.mrb[16].mxu1 }
 0x5a4   : > { %v1226_v42 = vadd.f32 %v1225_v41, %v2155_v35  ;;  %v1869_v43 = vpop.f32.mrb[17].mxu1 }
 0x5a5   : > { %v1228_v44 = vpop.f32.mrb[18].mxu1 }
 0x5a6   : > { %v1229_v45 = vadd.f32 %v1228_v44, %v2155_v35  ;;  %v1870_v46 = vpop.f32.mrb[19].mxu1  ;;  %v1232_v47 = vsel %vm812_vm2, %v1226_v42, -inf }
 0x5a7   : > { %1233 = vmax.xlane.f32.xlu0 %v1232_v47  ;;  %v1743_v47 = vld [vmem:[%s2318_s10] ss:$0 sm:$0xff] }
 0x5a8   : > { %v1235_v48 = vsel %vm812_vm2, %v1229_v45, -inf }
 0x5a9   : > { %1236 = vmax.xlane.f32.xlu1 %v1235_v48 }
 0x634   : > { %v1234_v49 = vpop.xlane.xlu0 %1233 }
 0x635   : > { %v1238_v50 = vsub.f32 %v1226_v42, %v1234_v49 }
 0x636   : > { %v1237_v7 = vpop.xlane.xlu1 %1236 }
 0x637   : > { %v1240_v51 = vmul.f32 1.442695, %v1238_v50  ;;  %v1239_v52 = vsub.f32 %v1229_v45, %v1237_v7 }
 0x639   : > { %1948 = vpow2.f32 %v1240_v51  ;;  %v1242_v53 = vmul.f32 1.442695, %v1239_v52  ;;  %v1744_v51 = vld [vmem:[%s2319_s11] ss:$0 sm:$0xff] }
 0x63b   : > { %1950 = vpow2.f32 %v1242_v53 }
 0x643   : > { %v1949_v54 = vpop.eup %1948 }
 0x644   : > { %v1244_v55 = vsel %vm812_vm2, %v1949_v54, 0.0 }
 0x645   : > { %v1951_v56 = vpop.eup %1950  ;;  %1245 = vadd.xlane.f32.xlu0 %v1244_v55 }
 0x646   : > { %v1247_v35 = vsel %vm812_vm2, %v1951_v56, 0.0 }
 0x647   : > { %1248 = vadd.xlane.f32.xlu1 %v1247_v35  ;;  %v1937_v35 = vld [vmem:[%s2322_s14 + $0x8] sm:$0xff]  }
 0x6d2   : > { %v1246_v3 = vpop.xlane.xlu0 %1245 }
 0x6d3   : > { %1952 = vrcp.f32 %v1246_v3 }
 0x6d4   : > { %v1249_v4 = vpop.xlane.xlu1 %1248 }
 0x6d5   : > { %1954 = vrcp.f32 %v1249_v4 }
 0x6dd   : > { %v1953_v8 = vpop.eup %1952 }
 0x6de   : > { %v1252_v10 = vmul.f32 %v1953_v8, %v1949_v54 }
 0x6df   : > { %v1955_v9 = vpop.eup %1954 }
 0x6e0   : > { %v1253_v11 = vmul.f32 %v1955_v9, %v1951_v56  ;;  %v1936_v56 = vld [vmem:[%s2322_s14] sm:$0xff]  }
 0x6e2   : > { %v1254_v12 = vpack.c.bf16 %v1253_v11, %v1252_v10 }
 0x6e4   : > { %1874 = vmatmul.mubr.msk.bf16.vlgmr.msra.gmra.mrb[20].mxu0 %vm812_vm2, %v1254_v12 }
 0x6e5   : > { %1887 = vmatprep.mubr.msk.bf16.mxu0 %vm1977_vm0, %v1976_v1  ;;  %1884 = vmatpush3.bf16.msra.mxu0 %v1934_v38 }
 0x6e6   : > { %1885 = vmatprep.subr.bf16.mxu0 %v1976_v1 }
 0x6e9   : > { %1886 = vmatpush3.bf16.msra.mxu0 %v1935_v39 }
 0x7b7   : > { %v1293_v13 = vpop.f32.mrb[20].mxu0 }
 0x7b8   : > { %v1875_v14 = vpop.f32.mrb[21].mxu0 }
 0x7b9   : > { %v1296_v15 = vpop.f32.mrb[22].mxu0 }
 0x7ba   : > { %v1300_v16 = vpack.c.bf16 %v1296_v15, %v1293_v13  ;;  %v1876_v17 = vpop.f32.mrb[23].mxu0 }
 0x7bc   : > { %1880 = vmatmul.mubr.msk.bf16.vlgmr.msra.gmra.mrb[8].mxu1 %vm812_vm2, %v1300_v16 }
 0x7bd   : > { %1899 = vmatprep.mubr.msk.bf16.mxu1 %vm1977_vm0, %v1976_v1  ;;  %1892 = vmatpush3.bf16.msra.mxu1 %v1936_v56 }
 0x7be   : > { %1893 = vmatprep.subr.bf16.mxu1 %v1976_v1 }
 0x7c1   : > { %1894 = vmatpush3.bf16.msra.mxu1 %v1937_v35 }
 0x7c2   : > { %1895 = vmatprep.subr.bf16.mxu1 %v1976_v1 }
 0x7c5   : > { %1896 = vmatpush3.bf16.msra.mxu1 %v1938_v57 }
 0x7c6   : > { %1897 = vmatprep.subr.bf16.mxu1 %v1976_v1 }
 0x7c9   : > { %1898 = vmatpush3.bf16.msra.mxu1 %v1939_v58 }
 0x88f   : > { %v1347_v21 = vpop.f32.mrb[8].mxu1 }
 0x890   : > { %v1903_v22 = vadd.f32 %v1347_v21, %v604_v19  ;;  %v1881_v23 = vpop.f32.mrb[9].mxu1 }
 0x891   : > { %v1350_v24 = vpop.f32.mrb[10].mxu1 }
 0x892   : > { %v1904_v25 = vadd.f32 %v1350_v24, %v605_v20  ;;  %v1882_v26 = vpop.f32.mrb[11].mxu1  ;;  %v1358_v27 = vsel %vm629_vm1, %v1903_v22, 0.0  ;;  %v1749_v24 = vld [vmem:[%s2323_s15] ss:$0 sm:$0xff] }
 0x893   : > { %1359 = vadd.xlane.f32.xlu0 %v1358_v27 }
 0x894   : > { %v1361_v28 = vsel %vm629_vm1, %v1904_v25, 0.0 }
 0x895   : > { %1362 = vadd.xlane.f32.xlu1 %v1361_v28 }
 0x920   : > { %v1360_v29 = vpop.xlane.xlu0 %1359 }
 0x921   : > { %v1365_v30 = vmul.f32 0.03125, %v1360_v29 }
 0x922   : > { %v1363_v31 = vpop.xlane.xlu1 %1362 }
 0x923   : > { %v1367_v32 = vsub.f32 %v1903_v22, %v1365_v30  ;;  %v1366_v33 = vmul.f32 0.03125, %v1363_v31 }
 0x925   : > { %v1368_v5 = vsub.f32 %v1904_v25, %v1366_v33  ;;  %v1369_v34 = vmul.f32 %v1367_v32, %v1367_v32 }
 0x927   : > { %v1371_v6 = vsel %vm629_vm1, %v1369_v34, 0.0  ;;  %v1370_v36 = vmul.f32 %v1368_v5, %v1368_v5 }
 0x928   : > { %1372 = vadd.xlane.f32.xlu0 %v1371_v6 }
 0x929   : > { %v1374_v37 = vsel %vm629_vm1, %v1370_v36, 0.0 }
 0x92a   : > { %1375 = vadd.xlane.f32.xlu1 %v1374_v37 }
 0x9b5   : > { %v1373_v40 = vpop.xlane.xlu0 %1372 }
 0x9b6   : > { %v1377_v41 = vmul.f32 0.03125, %v1373_v40 }
 0x9b7   : > { %v1376_v42 = vpop.xlane.xlu1 %1375 }
 0x9b8   : > { %v1379_v43 = vadd.f32 1e-12, %v1377_v41  ;;  %v1378_v44 = vmul.f32 0.03125, %v1376_v42 }
 0x9ba   : > { %1956 = vrsqrt.f32 %v1379_v43  ;;  %v1380_v45 = vadd.f32 1e-12, %v1378_v44 }
 0x9bc   : > { %1958 = vrsqrt.f32 %v1380_v45 }
 0x9c4   : > { %v1957_v46 = vpop.eup %1956 }
 0x9c5   : > { %v1383_v48 = vmul.f32 %v1957_v46, %v1367_v32 }
 0x9c6   : > { %v1959_v49 = vpop.eup %1958 }
 0x9c7   : > { %v1391_v50 = vmul.f32 %v1743_v47, %v1383_v48  ;;  %v1384_v7 = vmul.f32 %v1959_v49, %v1368_v5 }
 0x9c9   : > { %v1392_v52 = vmul.f32 %v1743_v47, %v1384_v7  ;;  %v1399_v53 = vadd.f32 %v1744_v51, %v1391_v50  ;;  %v1755_v7 = vld [vmem:[%s2324_s16] ss:$0 sm:$0xff] }
 0x9cb   : > { %v1400_v54 = vadd.f32 %v1744_v51, %v1392_v52 }
 0x9cd   : > { %v1401_v55 = vpack.c.bf16 %v1400_v54, %v1399_v53 }
 0x9cf   : > { %1888 = vmatmul.mubr.msk.bf16.vlgmr.msra.gmra.mrb[24].mxu0 %vm629_vm1, %v1401_v55 }
 0xaa2   : > { %v1462_v60 = vpop.f32.mrb[24].mxu0 }
 0xaa3   : > { %v1463_v61 = vadd.f32 %v1745_v59, %v1462_v60  ;;  %v1889_v62 = vpop.f32.mrb[25].mxu0 }
 0xaa4   : > { %v1465_v63 = vpop.f32.mrb[26].mxu0 }
 0xaa5   : > { %v1471_v0 = vmul.f32 0.044715, %v1463_v61  ;;  %v1466_v2 = vadd.f32 %v1745_v59, %v1465_v63  ;;  %v1890_v3 = vpop.f32.mrb[27].mxu0  ;;  %v1469_v18 = vmul.f32 0.5, %v1463_v61 }
 0xaa7   : > { %v1473_v4 = vmul.f32 %v1471_v0, %v1463_v61  ;;  %v1472_v8 = vmul.f32 0.044715, %v1466_v2  ;;  %v1470_v19 = vmul.f32 0.5, %v1466_v2 }
 0xaa9   : > { %v1475_v9 = vmul.f32 %v1473_v4, %v1463_v61  ;;  %v1474_v10 = vmul.f32 %v1472_v8, %v1466_v2 }
 0xaab   : > { %v1477_v11 = vadd.f32 %v1475_v9, %v1463_v61  ;;  %v1476_v12 = vmul.f32 %v1474_v10, %v1466_v2 }
 0xaad   : > { %v1479_v13 = vmul.f32 0.7978846, %v1477_v11  ;;  %v1478_v1 = vadd.f32 %v1476_v12, %v1466_v2 }
 0xaaf   : > { %1960 = vtanh.f32 %v1479_v13  ;;  %v1480_v14 = vmul.f32 0.7978846, %v1478_v1 }
 0xab1   : > { %1962 = vtanh.f32 %v1480_v14 }
 0xab9   : > { %v1961_v15 = vpop.eup %1960 }
 0xaba   : > { %v1483_v16 = vadd.f32 1.0, %v1961_v15 }
 0xabb   : > { %v1963_v17 = vpop.eup %1962 }
 0xabc   : > { %v1484_v20 = vadd.f32 1.0, %v1963_v17  ;;  %v1485_v21 = vmul.f32 %v1483_v16, %v1469_v18 }
 0xabe   : > { %v1486_v22 = vmul.f32 %v1484_v20, %v1470_v19 }
 0xac0   : > { %v1487_v23 = vpack.c.bf16 %v1486_v22, %v1485_v21 }
 0xac2   : > { %1900 = vmatmul.mubr.msk.bf16.vlgmr.msra.gmra.mrb[20].mxu1 %vm1527_vm4, %v1487_v23 }
 0xb95   : > { %v1565_v25 = vpop.f32.mrb[20].mxu1 }
 0xb96   : > { %v1566_v26 = vadd.f32 %v1749_v24, %v1565_v25  ;;  %v1901_v27 = vpop.f32.mrb[21].mxu1 }
 0xb97   : > { %v1568_v28 = vpop.f32.mrb[22].mxu1 }
 0xb98   : > { %v1569_v29 = vadd.f32 %v1749_v24, %v1568_v28  ;;  %v1902_v30 = vpop.f32.mrb[23].mxu1  ;;  %v1572_v31 = vadd.f32 %v1566_v26, %v1399_v53  ;;  %v1756_v53 = vld [vmem:[%s2325_s17] ss:$0 sm:$0xff] }
 0xb9a   : > { %v1576_v32 = vsel %vm629_vm1, %v1572_v31, 0.0  ;;  %v1573_v33 = vadd.f32 %v1569_v29, %v1400_v54 }
 0xb9b   : > { %1577 = vadd.xlane.f32.xlu0 %v1576_v32 }
 0xb9c   : > { %v1579_v5 = vsel %vm629_vm1, %v1573_v33, 0.0 }
 0xb9d   : > { %1580 = vadd.xlane.f32.xlu1 %v1579_v5 }
 0xc28   : > { %v1578_v34 = vpop.xlane.xlu0 %1577 }
 0xc29   : > { %v1582_v6 = vmul.f32 0.03125, %v1578_v34 }
 0xc2a   : > { %v1581_v36 = vpop.xlane.xlu1 %1580 }
 0xc2b   : > { %v1584_v37 = vsub.f32 %v1572_v31, %v1582_v6  ;;  %v1583_v38 = vmul.f32 0.03125, %v1581_v36 }
 0xc2d   : > { %v1585_v39 = vsub.f32 %v1573_v33, %v1583_v38  ;;  %v1586_v40 = vmul.f32 %v1584_v37, %v1584_v37 }
 0xc2f   : > { %v1588_v41 = vsel %vm629_vm1, %v1586_v40, 0.0  ;;  %v1587_v42 = vmul.f32 %v1585_v39, %v1585_v39 }
 0xc30   : > { %1589 = vadd.xlane.f32.xlu0 %v1588_v41 }
 0xc31   : > { %v1591_v43 = vsel %vm629_vm1, %v1587_v42, 0.0 }
 0xc32   : > { %1592 = vadd.xlane.f32.xlu1 %v1591_v43 }
 0xcbd   : > { %v1590_v44 = vpop.xlane.xlu0 %1589 }
 0xcbe   : > { %v1594_v45 = vmul.f32 0.03125, %v1590_v44 }
 0xcbf   : > { %v1593_v46 = vpop.xlane.xlu1 %1592 }
 0xcc0   : > { %v1596_v47 = vadd.f32 1e-12, %v1594_v45  ;;  %v1595_v48 = vmul.f32 0.03125, %v1593_v46 }
 0xcc2   : > { %1964 = vrsqrt.f32 %v1596_v47  ;;  %v1597_v49 = vadd.f32 1e-12, %v1595_v48 }
 0xcc4   : > { %1966 = vrsqrt.f32 %v1597_v49 }
 0xccc   : > { %v1965_v50 = vpop.eup %1964 }
 0xccd   : > { %v1600_v51 = vmul.f32 %v1965_v50, %v1584_v37 }
 0xcce   : > { %v1967_v52 = vpop.eup %1966 }
 0xccf   : > { %v1608_v54 = vmul.f32 %v1755_v7, %v1600_v51  ;;  %v1601_v55 = vmul.f32 %v1967_v52, %v1585_v39 }
 0xcd1   : > { %v1616_v56 = vadd.f32 %v1756_v53, %v1608_v54  ;;  %v1609_v35 = vmul.f32 %v1755_v7, %v1601_v55 }
 0xcd3   : > { %1618 = vst.msk [vmem:[%s589_s26] sm:$0xff] %vm629_vm1, %v1616_v56  ;;  %v1617_v57 = vadd.f32 %v1756_v53, %v1609_v35 }
 0xcd5   : > { %1619 = vst.msk [vmem:[%s589_s26 + $0x8] sm:$0xff] %vm629_vm1, %v1617_v57 }
 0xcd6 PF: > { %s28_s27 = sadd.s32 1, %s1974_s27  }
 0xcd7   : > { %p25_p4 = scmp.ge.s32.totalorder %s28_s27, 4  }
 0xcd9   :  { %27 = sbr.rel (!%p25_p4) target bundleno = 4 (0x4), region = 132 }

// kernel: bert2bert_forward.9
= control target key start
LH: loop header
LB: loop body
LE: loop exit
PB: predicated region body
PF: predicated region fallthrough
CT: control target
= control target key end

     0   :  { %s1081_s0 = inlined_call_operand.vmem [shape: f32[2,8,32], index: 0, kind: input, shape index: {}]   ;;  %s1082_s1 = inlined_call_operand.vmem [shape: s32[2,8,1], index: 1, kind: input, shape index: {}]   ;;  %s1083_s2 = inlined_call_operand.vmem [shape: bf16[32,32], index: 2, kind: input, shape index: {}]   ;;  %s1084_s3 = inlined_call_operand.vmem [shape: f32[1,32], index: 3, kind: input, shape index: {}]   ;;  %s1085_s4 = inlined_call_operand.vmem [shape: f32[1,32], index: 4, kind: input, shape index: {}]   ;;  %s1086_s5 = inlined_call_operand.vmem [shape: f32[1,32], index: 5, kind: input, shape index: {}]   ;;  %s1087_s6 = inlined_call_operand.vmem [shape: bf16[32,64], index: 6, kind: input, shape index: {}]   ;;  %s1088_s7 = inlined_call_operand.vmem [shape: f32[1,64], index: 7, kind: input, shape index: {}]   ;;  %s1089_s8 = inlined_call_operand.hbm [shape: f32[2,8,64], index: 8, kind: output, shape index: {0}]   ;;  %s1090_s9 = inlined_call_operand.vmem [shape: f32[2,1,2], index: 9, kind: output, shape index: {1}]  }
   0x1   :  { %1091 = sst [smem:[#allocation5_spill]] %s1081_s0 }
   0x2   :  { %1092 = sst [smem:[#allocation6_spill]] %s1082_s1 }
   0x3   :  { %15 = vsyncpa [#allocation3], 0 }
   0x4   :  { %17 = vsyncpa [#allocation3 + $0x1], 0  ;;  %s919_s30 = smov 0   ;;  %s921_s10 = smov 0  }
   0x5   :  { %s923_s11 = smov 0   ;;  %s925_s12 = smov 0  }
   0x6 LB: > { %s940_s13 = sadd.s32 4294967295, %s863_s12   ;;  %s697_s14 = sadd.s32 4294967294, %s863_s12   ;;  %s863_s12 = sphi %s925_s12, %s1100_s12   ;;  %s859_s11 = sphi %s923_s11, %s1099_s11   ;;  %s855_s10 = sphi %s921_s10, %s1098_s10   ;;  %s851_s30 = sphi %s919_s30, %s1097_s30  }
   0x7   : > { %s944_s15 = sadd.s32 1, %s863_s12   ;;  %s208_s16 = sadd.s32 1, %s859_s11 }
   0x8   : > { %s205_s17 = ssub.s32 %s863_s12, %s944_s15  ;;  %p218_p0 = scmp.ne.s32.totalorder %s859_s11, %s855_s10 }
   0x9   : > { %p206_p1 = scmp.eq.s32.totalorder %s205_s17, 0  ;;  %p219_p2 = scmp.eq.s32.totalorder %s940_s13, 1 }
   0xa   : > { %p224_p3 = scmp.ne.s32.totalorder %s855_s10, %s851_s30  ;;  %p225_p4 = scmp.eq.s32.totalorder %s697_s14, 1 }
   0xb   : > { %s955_s18 = scalar_select %p206_p1, %s859_s11, %s208_s16  }
   0xc   : > { %p957_p5 = por %p219_p2, %p218_p0  ;;  %p961_p6 = por %p225_p4, %p224_p3 }
   0xd   : > { %p700_p7 = scmp.ge.s32.totalorder %s863_s12, 1  ;;  %p301_p8 = scmp.lt.s32.totalorder %s863_s12, 3 }
   0xf   : > { %p302_p9 = pnand %p700_p7, %p301_p8 }
  0x10   : > { %v789_v0 = vld [vmem:[%s1083_s2] sm:$0xff] (!%p302_p9)   ;;  %v865_v1 = vmov (!%p302_p9), 0.0   ;;  %v790_v2 = vld [vmem:[%s1083_s2 + $0x8] sm:$0xff] (!%p302_p9)   ;;  %vm866_vm0 = vmmov (!%p302_p9), 0   ;;  %p343_p10 = scmp.lt.s32.totalorder (!%p302_p9), %s940_s13, 1  ;;  %s1095_s0 = sld [smem:[#allocation5_spill]] (!%p302_p9)  ;;  %v545_v50 = vlaneseq (!%p302_p9) }
  0x11   : > { %305 = sbr.rel (%p302_p9) target bundleno = 1331 (0x533), region = 52  ;;  %725 = vmatprep.subr.bf16.mxu0 (!%p302_p9), %v865_v1  ;;  %733 = vmatprep.subr.bf16.mxu1 (!%p302_p9), %v865_v1  ;;  %vm380_vm1 = vcmask (!%p302_p9), 261120   ;;  %v704_v5 = vld [vmem:[%s1084_s3] ss:$0 sm:$0xff] (!%p302_p9)  ;;  %v792_v27 = vld [vmem:[%s1087_s6 + $0x8] sm:$0xff] (!%p302_p9)   ;;  %v867_v38 = vmov (!%p302_p9), 0  }
  0x12   : > { %726 = vmatpush3.bf16.msra.mxu0 (!%p302_p9), %v789_v0  ;;  %729 = vmatprep.mubr.msk.bf16.mxu0 (!%p302_p9), %vm866_vm0, %v865_v1  ;;  %v791_v26 = vld [vmem:[%s1087_s6] sm:$0xff] (!%p302_p9)   ;;  %s335_s14 = sand.u32 (!%p302_p9), 1, %s855_s10   ;;  %vm530_vm2 = vcmask (!%p302_p9), 523264   ;;  %s1096_s1 = sld [smem:[#allocation6_spill]] (!%p302_p9)  ;;  %v1026_v51 = vand.u32 (!%p302_p9), 127, %v545_v50  ;;  %vm561_vm5 = vcmask (!%p302_p9), 7168  }
  0x13   : > { %727 = vmatprep.subr.bf16.mxu0 (!%p302_p9), %v865_v1  ;;  %737 = vmatprep.mubr.msk.bf16.mxu1 (!%p302_p9), %vm866_vm0, %v865_v1  ;;  %v708_v32 = vld [vmem:[%s1085_s4] ss:$0 sm:$0xff] (!%p302_p9)  ;;  %s1011_s16 = sshll.u32 (!%p302_p9), %s335_s14, 3  ;;  %s588_s23 = scalar_lea.sflag (!%p302_p9), [#allocation3], %s335_s14 }
  0x14   : > { %734 = vmatpush3.bf16.msra.mxu1 (!%p302_p9), %v791_v26  ;;  %v709_v34 = vld [vmem:[%s1086_s5] ss:$0 sm:$0xff] (!%p302_p9)  ;;  %787 = vset.pattern.permute.xlu1 (!%p302_p9), %v867_v38  ;;  %s337_s22 = scalar_lea.vmem (!%p302_p9), [#allocation2], %s1011_s16 }
  0x15   : > { %735 = vmatprep.subr.bf16.mxu1 (!%p302_p9), %v865_v1  ;;  %788 = vset.pattern.permute.xlu0 (!%p302_p9), %v867_v38  ;;  %v710_v39 = vld [vmem:[%s1088_s7] ss:$0 sm:$0xff] (!%p302_p9)  ;;  %s604_s28 = sshll.u32 (!%p302_p9), %s337_s22, 4  ;;  %s605_s28 = int_to_ptr.vmem [resolvable:$true] %s604_s28 }
  0x16   : > { %728 = vmatpush3.bf16.msra.mxu0 (!%p302_p9), %v790_v2  ;;  %s801_s24 = scalar_lea.vmem (!%p302_p9), %s605_s28, 128 }
  0x17   : > { %p802_p11 = scmp.ne.s32.totalorder (!%p302_p9), %s605_s28, %s801_s24 }
  0x18   : > { %s980_s25 = scalar_select %p343_p10, %s940_s13, 1  ;;  %736 = vmatpush3.bf16.msra.mxu1 %v792_v27 }
  0x19   : > { %p803_p12 = pnand %p802_p11, %p957_p5 }
  0x1a   : > { %s702_s26 = sshll.u32 %s980_s25, 3 }
  0x1b   : > { %s346_s29 = scalar_lea.vmem %s1095_s0, %s702_s26  ;;  %s350_s27 = scalar_lea.vmem %s1096_s1, %s702_s26 }
  0x1c   : > { %v355_v3 = vld [vmem:[%s346_s29] sm:$0xff]  ;;  %s716_s26 = sshll.u32 %s940_s13, 7  ;;  %p804_p13 = pneg %p803_p12 }
  0x1d   : > { %v356_v4 = vpack.c.bf16 %v355_v3, %v355_v3  ;;  %v532_v46 = vld [vmem:[%s350_s27] sm:$0xff]  ;;  %s1038_s21 = scalar_lea.hbm %s1089_s8, %s716_s26  ;;  %s868_s27 = smov [#allocation2]  }
  0x1e   : > { %vm555_vm4 = vcmp.ge.s32.totalorder %v532_v46, 0  ;;  %s805_s0 = sshll.u32 %s868_s27, 4  ;;  %s806_s0 = int_to_ptr.vmem [resolvable:$false] %s805_s0 }
  0x1f   : > { %730 = vmatmul.mubr.msk.bf16.vlgmr.msra.gmra.mrb[0].mxu0 %vm380_vm1, %v356_v4  ;;  %v714_v62 = vsel %vm555_vm4, 1.0, %v865_v1  ;;  %s807_s1 = scalar_lea.vmem %s806_s0, 256  ;;  %p808_p0 = scmp.lt.s32.totalorder %s605_s28, %s806_s0 }
  0x20   : > { %v572_v3 = vsel %vm561_vm5, %v714_v62, 0.0  ;;  %p809_p1 = scmp.lt.s32.totalorder %s807_s1, %s801_s24 }
  0x22   : > { %p810_p2 = por %p809_p1, %p808_p0 }
  0x24   : > { %p811_p3 = pnand %p810_p2, %p804_p13 }
  0xf2   : > { %v418_v6 = vpop.f32.mrb[0].mxu0 }
  0xf3   : > { %v419_v7 = vadd.f32 %v704_v5, %v418_v6  ;;  %v731_v8 = vpop.f32.mrb[1].mxu0 }
  0xf4   : > { %v421_v9 = vpop.f32.mrb[2].mxu0 }
  0xf5   : > { %v425_v10 = vmul.f32 0.044715, %v419_v7  ;;  %v732_v11 = vpop.f32.mrb[3].mxu0  ;;  %v424_v17 = vmul.f32 0.5, %v419_v7 }
  0xf7   : > { %v426_v12 = vmul.f32 %v425_v10, %v419_v7 }
  0xf9   : > { %v427_v13 = vmul.f32 %v426_v12, %v419_v7 }
  0xfb   : > { %v428_v14 = vadd.f32 %v427_v13, %v419_v7 }
  0xfd   : > { %v429_v15 = vmul.f32 0.7978846, %v428_v14 }
  0xff   : > { %793 = vtanh.f32 %v429_v15 }
 0x109   : > { %v794_v16 = vpop.eup %793 }
 0x10a   : > { %v431_v18 = vadd.f32 1.0, %v794_v16 }
 0x10c   : > { %v432_v19 = vmul.f32 %v431_v18, %v424_v17 }
 0x10e   : > { %v435_v20 = vsel %vm380_vm1, %v432_v19, 0.0 }
 0x10f   : > { %436 = vadd.xlane.f32.xlu0 %v435_v20 }
 0x19c   : > { %v437_v21 = vpop.xlane.xlu0 %436 }
 0x19d   : > { %v439_v22 = vmul.f32 0.03125, %v437_v21 }
 0x19f   : > { %v440_v23 = vsub.f32 %v432_v19, %v439_v22 }
 0x1a1   : > { %v441_v24 = vmul.f32 %v440_v23, %v440_v23 }
 0x1a3   : > { %v442_v25 = vsel %vm380_vm1, %v441_v24, 0.0 }
 0x1a4   : > { %443 = vadd.xlane.f32.xlu0 %v442_v25 }
 0x231   : > { %v444_v28 = vpop.xlane.xlu0 %443 }
 0x232   : > { %v445_v29 = vmul.f32 0.03125, %v444_v28 }
 0x234   : > { %v446_v30 = vadd.f32 1e-12, %v445_v29 }
 0x236   : > { %795 = vrsqrt.f32 %v446_v30 }
 0x240   : > { %v796_v31 = vpop.eup %795 }
 0x241   : > { %v448_v33 = vmul.f32 %v796_v31, %v440_v23 }
 0x243   : > { %v455_v35 = vmul.f32 %v708_v32, %v448_v33 }
 0x245   : > { %v462_v36 = vadd.f32 %v709_v34, %v455_v35 }
 0x247   : > { %v463_v37 = vpack.c.bf16 %v462_v36, %v462_v36 }
 0x249   : > { %738 = vmatmul.mubr.msk.bf16.vlgmr.msra.gmra.mrb[0].mxu1 %vm380_vm1, %v463_v37 }
 0x31c   : > { %v524_v40 = vpop.f32.mrb[0].mxu1 }
 0x31d   : > { %v525_v41 = vadd.f32 %v710_v39, %v524_v40  ;;  %v739_v42 = vpop.f32.mrb[1].mxu1 }
 0x31e   : > { %v527_v43 = vpop.f32.mrb[2].mxu1 }
 0x31f   : > { %v740_v44 = vpop.f32.mrb[3].mxu1  ;;  %v533_v45 = vsel %vm530_vm2, %v525_v41, -inf  ;;  %531 = vst.msk [vmem:[%s337_s22] sm:$0xff] %vm530_vm2, %v525_v41 }
 0x320   : > { %534 = vmax.xlane.f32.xlu1 %v533_v45 }
 0x331   : > { %548 = vperm.xlu1 %787, %v532_v46  }
 0x3ad   : > { %v535_v47 = vpop.xlane.xlu1 %534 }
 0x3ae   : > { %v536_v48 = vsub.f32 %v525_v41, %v535_v47 }
 0x3b0   : > { %v537_v49 = vmul.f32 1.442695, %v536_v48 }
 0x3b1   : > { %v549_v52 = vpop.permute.xlu1 %548 }
 0x3b2   : > { %797 = vpow2.f32 %v537_v49  ;;  %vm550_vm3 = vcmp.eq.s32.totalorder %v1026_v51, %v549_v52 }
 0x3b3   : > { %v551_v55 = vsel %vm550_vm3, %v525_v41, 0.0 }
 0x3b4   : > { %v552_v56 = vsel %vm530_vm2, %v551_v55, 0.0 }
 0x3bc   : > { %v798_v53 = vpop.eup %797 }
 0x3bd   : > { %v539_v54 = vsel %vm530_vm2, %v798_v53, 0.0 }
 0x3be   : > { %540 = vadd.xlane.f32.xlu0 %v539_v54 }
 0x3c2   : > { %553 = vadd.xlane.f32.xlu0 %v552_v56 }
 0x44b   : > { %v541_v57 = vpop.xlane.xlu0 %540 }
 0x44c   : > { %799 = vlog2.f32 %v541_v57 }
 0x44f   : > { %v554_v61 = vpop.xlane.xlu0 %553 }
 0x456   : > { %v800_v58 = vpop.eup %799 }
 0x457   : > { %v543_v59 = vmul.f32 0.6931472, %v800_v58 }
 0x459   : > { %v544_v60 = vadd.f32 %v543_v59, %v535_v47 }
 0x45b   : > { %v558_v63 = vsub.f32 %v544_v60, %v554_v61 }
 0x45d   : > { %v559_v0 = vmul.f32 %v714_v62, %v558_v63 }
 0x45f   : > { %v562_v2 = vsel %vm561_vm5, %v559_v0, 0.0 }
 0x460   : > { %563 = vadd.xlane.f32.xlu0 %v562_v2 }
 0x464   : > { %573 = vadd.xlane.f32.xlu0 %v572_v3 }
 0x465   : > { %814 = shalt.err (!%p811_p3)
}
 0x466   : > { %s815_s13 = scalar_lea.hbm %s1038_s21, 128  ;;  %s819_s22 = scalar_lea.hbm %s1089_s8, 256 }
 0x467   : > { %p816_p4 = scmp.ne.s32.totalorder %s1038_s21, %s815_s13  ;;  %p820_p9 = scmp.lt.u32.totalorder %s1038_s21, %s1089_s8 }
 0x468   : > { %p821_p10 = scmp.lt.u32.totalorder %s819_s22, %s815_s13  ;;  %p823_p12 = scmp.lt.u32.totalorder %s815_s13, %s1038_s21 }
 0x469   : > { %p817_p7 = pnand %p816_p4, %p957_p5 }
 0x46a   : > { %p822_p11 = por %p821_p10, %p820_p9 }
 0x46b   : > { %p818_p8 = pneg %p817_p7 }
 0x46c   : > { %p824_p13 = por %p823_p12, %p822_p11 }
 0x46e   : > { %p825_p0 = pnand %p824_p13, %p818_p8 }
 0x470   : > { %828 = shalt.err (!%p825_p0)
}
 0x471   : > { %745 = dma.vmem_to_hbm [thread:$0]  (%p957_p5), %s605_s28, 128, %s1038_s21, %s588_s23   ;;  %vm560_vm6 = vcmp.eq.s32.totalorder %v1026_v51, 0  ;;  %vm585_vm7 = vcmask 8192  }
 0x472   : > { %s353_s29 = scalar_lea.vmem %s1090_s9, %s980_s25 }
 0x4ed   : > { %v564_v1 = vpop.xlane.xlu0 %563 }
 0x4ee   : > { %v565_v4 = vrot.slane %v564_v1, 4 }
 0x4f0   : > { %v566_v5 = vadd.f32 %v565_v4, %v564_v1 }
 0x4f1   : > { %v574_v6 = vpop.xlane.xlu0 %573 }
 0x4f2   : > { %v567_v7 = vrot.slane %v566_v5, 2  ;;  %v575_v8 = vrot.slane %v574_v6, 4 }
 0x4f4   : > { %v576_v9 = vadd.f32 %v575_v8, %v574_v6  ;;  %v568_v10 = vadd.f32 %v567_v7, %v566_v5 }
 0x4f6   : > { %v577_v11 = vrot.slane %v576_v9, 2  ;;  %v569_v12 = vrot.slane %v568_v10, 1 }
 0x4f8   : > { %v578_v13 = vadd.f32 %v577_v11, %v576_v9  ;;  %v570_v14 = vadd.f32 %v569_v12, %v568_v10 }
 0x4fa   : > { %741 = vpush %v570_v14  ;;  %v579_v15 = vrot.slane %v578_v13, 1 }
 0x4fc   : > { %v580_v16 = vadd.f32 %v579_v15, %v578_v13 }
 0x4fe   : > { %743 = vpush %v580_v16 }
 0x52b   : > { %s742_s1 = spop %741 }
 0x52c   : > { %v582_v17 = vstv %s742_s1 }
 0x52f   : > { %s744_s17 = spop %743 }
 0x530   : > { %v583_v18 = vstv %s744_s17 }
 0x531   : > { %v584_v19 = vsel %vm560_vm6, %v582_v17, %v583_v18 }
 0x532   : > { %586 = vst.msk [vmem:[%s353_s29] sm:$0x1] %vm585_vm7, %v584_v19 }
 0x533 PF: > { %p751_p5 = scmp.ge.s32.totalorder %s863_s12, 2  ;;  %s619_s21 = sand.u32 1, %s851_s30  }
 0x534   : > { %s620_s23 = scalar_lea.sflag [#allocation3], %s619_s21 }
 0x535   : > { %p748_p1 = pnand %p751_p5, %p961_p6 }
 0x537   : > { %846 = dma.done.wait (!%p748_p1), %s620_s23, 128  }
 0x538   : > { %848 = vsyncadd (!%p748_p1), %s620_s23, 4294967168  ;;  %p20_p2 = scmp.ge.s32.totalorder %s944_s15, 4   ;;  %s1097_s30 = smov %s855_s10 }
 0x539   : > { %s1098_s10 = smov %s859_s11  ;;  %s1099_s11 = smov %s955_s18 }
 0x53a   : > { %s1100_s12 = smov %s944_s15  ;;  %22 = sbr.rel (!%p20_p2) target bundleno = 6 (0x6), region = 102 }
 0x541   :  { %631 = vsyncpa [#allocation3], 1 }
 0x542   :  { %633 = vsyncpa [#allocation3 + $0x1], 1 }

// kernel: bert2bert_forward.8
= control target key start
LH: loop header
LB: loop body
LE: loop exit
PB: predicated region body
PF: predicated region fallthrough
CT: control target
= control target key end

     0   :  { %s3309_s6 = smov 1   ;;  %s3310_s10 = smov 2   ;;  %s3773_s0 = inlined_call_operand.smem [shape: u32[31], index: -1, kind: input, shape index: {}] }
   0x1   :  { %s3351_s5 = sld [smem:[%s3773_s0]]   ;;  %s3311_s14 = smov 3  }
   0x2   :  { %s3356_s9 = sld [smem:[%s3773_s0 + %s3309_s6]]   ;;  %s3312_s18 = smov 4  }
   0x3   :  { %s3361_s13 = sld [smem:[%s3773_s0 + %s3310_s10]]   ;;  %s3313_s22 = smov 5  }
   0x4   :  { %s3366_s17 = sld [smem:[%s3773_s0 + %s3311_s14]]   ;;  %s3314_s26 = smov 6  }
   0x5   :  { %s3371_s21 = sld [smem:[%s3773_s0 + %s3312_s18]]   ;;  %s3315_s30 = smov 7  }
   0x6   :  { %s3376_s25 = sld [smem:[%s3773_s0 + %s3313_s22]]   ;;  %s3316_s4 = smov 8  }
   0x7   :  { %s3381_s29 = sld [smem:[%s3773_s0 + %s3314_s26]]   ;;  %s3317_s10 = smov 9  }
   0x8   :  { %s3386_s3 = sld [smem:[%s3773_s0 + %s3315_s30]]   ;;  %s3318_s15 = smov 10  }
   0x9   :  { %s3391_s8 = sld [smem:[%s3773_s0 + %s3316_s4]]   ;;  %s3319_s20 = smov 11  }
   0xa   :  { %3781 = sst [smem:[#allocation2_spill]] %s3366_s17  ;;  %s3320_s26 = smov 12  }
   0xb   :  { %s3396_s14 = sld [smem:[%s3773_s0 + %s3317_s10]]   ;;  %s3321_s1 = smov 13  }
   0xc   :  { %s3401_s19 = sld [smem:[%s3773_s0 + %s3318_s15]]   ;;  %s3322_s7 = smov 14  }
   0xd   :  { %s3406_s24 = sld [smem:[%s3773_s0 + %s3319_s20]]   ;;  %s3323_s15 = smov 15  }
   0xe   :  { %s3411_s30 = sld [smem:[%s3773_s0 + %s3320_s26]]   ;;  %s3324_s22 = smov 16  }
   0xf   :  { %s3416_s6 = sld [smem:[%s3773_s0 + %s3321_s1]]   ;;  %s3325_s28 = smov 17  }
  0x10   :  { %s3421_s12 = sld [smem:[%s3773_s0 + %s3322_s7]]   ;;  %s3326_s7 = smov 18  }
  0x11   :  { %s3426_s20 = sld [smem:[%s3773_s0 + %s3323_s15]]   ;;  %s3327_s15 = smov 19  }
  0x12   :  { %s3431_s27 = sld [smem:[%s3773_s0 + %s3324_s22]]   ;;  %s3328_s22 = smov 20  }
  0x13   :  { %s3436_s4 = sld [smem:[%s3773_s0 + %s3325_s28]]   ;;  %s3329_s28 = smov 21  }
  0x14   :  { %s3441_s17 = sld [smem:[%s3773_s0 + %s3326_s7]]   ;;  %s3330_s7 = smov 22  }
  0x15   :  { %3782 = sst [smem:[#allocation3_spill]] %s3416_s6 }
  0x16   :  { %s3451_s6 = sld [smem:[%s3773_s0 + %s3328_s22]]   ;;  %s3332_s22 = smov 24  }
  0x17   :  { %3783 = sst [smem:[#allocation4_spill]] %s3426_s20 }
  0x18   :  { %s3446_s20 = sld [smem:[%s3773_s0 + %s3327_s15]]   ;;  %s3331_s15 = smov 23  }
  0x19   :  { %3784 = sst [smem:[#allocation5_spill]] %s3436_s4 }
  0x1a   :  { %3785 = sst [smem:[#allocation6_spill]] %s3441_s17 }
  0x1b   :  { %s3456_s4 = sld [smem:[%s3773_s0 + %s3329_s28]]   ;;  %s3333_s28 = smov 25  }
  0x1c   :  { %3787 = sst [smem:[#allocation8_spill]] %s3451_s6 }
  0x1d   :  { %s3461_s17 = sld [smem:[%s3773_s0 + %s3330_s7]]   ;;  %s3334_s7 = smov 26  }
  0x1e   :  { %3786 = sst [smem:[#allocation7_spill]] %s3446_s20 }
  0x1f   :  { %s3466_s20 = sld [smem:[%s3773_s0 + %s3331_s15]]   ;;  %s3335_s15 = smov 27  }
  0x20   :  { %s3471_s6 = sld [smem:[%s3773_s0 + %s3332_s22]]   ;;  %s3336_s22 = smov 28  }
  0x21   :  { %3788 = sst [smem:[#allocation9_spill]] %s3456_s4 }
  0x22   :  { %s3476_s4 = sld [smem:[%s3773_s0 + %s3333_s28]]   ;;  %s3337_s28 = smov 29  }
  0x23   :  { %3789 = sst [smem:[#allocation10_spill]] %s3461_s17 }
  0x24   :  { %s3481_s17 = sld [smem:[%s3773_s0 + %s3334_s7]]   ;;  %s3338_s7 = smov 30  }
  0x25   :  { %3790 = sst [smem:[#allocation11_spill]] %s3466_s20 }
  0x26   :  { %3791 = sst [smem:[#allocation12_spill]] %s3471_s6 }
  0x27   :  { %s3486_s20 = sld [smem:[%s3773_s0 + %s3335_s15]]   ;;  %s3503_s15 = smov 0  }
  0x28   :  { %3792 = sst [smem:[#allocation13_spill]] %s3476_s4 }
  0x29   :  { %s3491_s6 = sld [smem:[%s3773_s0 + %s3336_s22]]  }
  0x2a   :  { %3793 = sst [smem:[#allocation14_spill]] %s3481_s17 }
  0x2b   :  { %s3496_s4 = sld [smem:[%s3773_s0 + %s3337_s28]]  }
  0x2c   :  { %s3501_s17 = sld [smem:[%s3773_s0 + %s3338_s7]]  }
  0x2d LB: > { %s2809_s16 = sadd.s32 4294967295, %s3307_s15   ;;  %p2813_p0 = scmp.ge.s32.totalorder %s3307_s15, 1  ;;  %s3307_s15 = sphi %s3503_s15, %s71_s15  }
  0x2e   : > { %p867_p1 = scmp.lt.s32.totalorder %s3307_s15, 3 }
  0x30   : > { %p868_p2 = pnand %p2813_p0, %p867_p1 }
  0x31   : > { %v3243_v0 = vld [vmem:[%s3381_s29] sm:$0xff] (!%p868_p2)   ;;  %v3339_v1 = vmov (!%p868_p2), 0.0   ;;  %v3245_v3 = vld [vmem:[%s3381_s29 + $0x8] sm:$0xff] (!%p868_p2)   ;;  %vm3340_vm0 = vmmov (!%p868_p2), 0   ;;  %p953_p3 = scmp.lt.s32.totalorder (!%p868_p2), %s2809_s16, 1  ;;  %vm1024_vm1 = vcmask (!%p868_p2), 261120   ;;  %v976_v25 = vlaneseq (!%p868_p2) }
  0x32   : > { %871 = sbr.rel (%p868_p2) target bundleno = 5774 (0x168e), region = 140  ;;  %3011 = vmatprep.subr.bf16.mxu1 (!%p868_p2), %v3339_v1  ;;  %3003 = vmatprep.subr.bf16.mxu0 (!%p868_p2), %v3339_v1  ;;  %v3244_v2 = vld [vmem:[%s3371_s21] sm:$0xff] (!%p868_p2)   ;;  %v3246_v4 = vld [vmem:[%s3371_s21 + $0x8] sm:$0xff] (!%p868_p2)   ;;  %vm1197_vm2 = vcmask (!%p868_p2), 130048   ;;  %v3341_v29 = vmov (!%p868_p2), 0   ;;  %vm1244_vm7 = vcmask (!%p868_p2), 64512  }
  0x33   : > { %3012 = vmatpush3.bf16.msra.mxu1 (!%p868_p2), %v3243_v0  ;;  %3015 = vmatprep.mubr.msk.bf16.mxu1 (!%p868_p2), %vm3340_vm0, %v3339_v1  ;;  %v2822_v7 = vld [vmem:[%s3386_s3] ss:$0 sm:$0xff] (!%p868_p2)  ;;  %v3248_v24 = vld [vmem:[%s3391_s8 + $0x8] sm:$0xff] (!%p868_p2)   ;;  %v3562_v27 = vshrl.u32 (!%p868_p2), %v976_v25, 7  ;;  %v979_v31 = vand.u32 (!%p868_p2), 127, %v976_v25  ;;  %vm1261_vm8 = vcmask (!%p868_p2), 1043456  }
  0x34   : > { %3004 = vmatpush3.bf16.msra.mxu0 (!%p868_p2), %v3244_v2  ;;  %3013 = vmatprep.subr.bf16.mxu1 (!%p868_p2), %v3339_v1  ;;  %v2818_v8 = vld [vmem:[%s3376_s25] ss:$0 sm:$0xff] (!%p868_p2)  ;;  %v3342_v33 = vmov (!%p868_p2), -1e+09   ;;  %v3251_v59 = vld [vmem:[%s3371_s21 + $0x10] sm:$0xff] (!%p868_p2)   ;;  %v3253_v60 = vld [vmem:[%s3371_s21 + $0x18] sm:$0xff] (!%p868_p2)  }
  0x35   : > { %3005 = vmatprep.subr.bf16.mxu0 (!%p868_p2), %v3339_v1  ;;  %3007 = vmatprep.mubr.msk.bf16.mxu0 (!%p868_p2), %vm3340_vm0, %v3339_v1  ;;  %v3247_v23 = vld [vmem:[%s3391_s8] sm:$0xff] (!%p868_p2)   ;;  %v984_v28 = vsub.s32 (!%p868_p2), 0, %v3562_v27  ;;  %vm980_vm4 = vcmp.le.s32.totalorder (!%p868_p2), %v979_v31, %v3562_v27  ;;  %v3250_v62 = vld [vmem:[%s3381_s29 + $0x10] sm:$0xff] (!%p868_p2)   ;;  %s3794_s28 = sld [smem:[#allocation3_spill]] (!%p868_p2)  ;;  %s3795_s1 = sld [smem:[#allocation5_spill]] (!%p868_p2)  ;;  %vm2005_vm10 = vcmask (!%p868_p2), 31744  }
  0x36   : > { %v2826_v49 = vld [vmem:[%s3396_s14] ss:$0 sm:$0xff] (!%p868_p2)  ;;  %s3796_s2 = sld [smem:[#allocation4_spill]] (!%p868_p2)  ;;  %s3797_s7 = sld [smem:[#allocation6_spill]] (!%p868_p2)  ;;  %vm2022_vm11 = vcmask (!%p868_p2), 1041408   ;;  %vm2621_vm12 = vcmask (!%p868_p2), 523264  }
  0x37   : > { %3014 = vmatpush3.bf16.msra.mxu1 (!%p868_p2), %v3245_v3  ;;  %v3249_v54 = vld [vmem:[%s3401_s19] sm:$0xff] (!%p868_p2)   ;;  %s3798_s10 = sld [smem:[#allocation2_spill]] (!%p868_p2) }
  0x38   : > { %3006 = vmatpush3.bf16.msra.mxu0 (!%p868_p2), %v3246_v4  ;;  %3027 = vmatprep.subr.bf16.mxu1 (!%p868_p2), %v3339_v1  ;;  %v3252_v4 = vld [vmem:[%s3381_s29 + $0x18] sm:$0xff] (!%p868_p2)  }
  0x39   : > { %s3808_s16 = smov (!%p953_p3, %s2809_s16), 1  ;;  %3019 = vmatprep.subr.bf16.mxu0 %v3339_v1 }
  0x3a   : > { %s2814_s0 = sshll.u32 %s3808_s16, 3  ;;  %s959_s22 = scalar_lea.vmem %s3356_s9, %s3808_s16 }
  0x3b   : > { %s956_s18 = scalar_lea.vmem %s3351_s5, %s2814_s0  ;;  %v974_v26 = vld [vmem:[%s959_s22] sm:$0x1]  ;;  %s2815_s23 = sshll.u32 %s3808_s16, 2 }
  0x3c   : > { %v3530_v5 = vld [vmem:[%s956_s18] sm:$0xff]  ;;  %vm975_vm3 = vcmp.ne.s32.totalorder %v974_v26, 0  ;;  %s963_s26 = scalar_lea.vmem %s3361_s13, %s2815_s23  ;;  %s3799_s18 = sld [smem:[#allocation7_spill]] }
  0x3d   : > { %v3535_v6 = vpack.c.bf16 %v3530_v5, %v3530_v5  ;;  %v981_v30 = vsel %vm975_vm3, 1, %v3341_v29  ;;  %s966_s11 = scalar_lea.vmem %s3798_s10, %s3808_s16  ;;  %s3800_s22 = sld [smem:[#allocation8_spill]] }
  0x3e   : > { %v985_v32 = vrot.slane %v981_v30, %v984_v28  ;;  %s3801_s23 = sld [smem:[#allocation9_spill]]  ;;  %s3804_s10 = sld [smem:[#allocation11_spill]] }
  0x3f   : > { %3016 = vmatmul.mubr.msk.bf16.vlgmr.msra.gmra.mrb[0].mxu1 %vm1024_vm1, %v3535_v6  ;;  %3008 = vmatmul.mubr.msk.bf16.vlgmr.msra.gmra.mrb[0].mxu0 %vm1024_vm1, %v3535_v6 }
  0x40   : > { %3029 = vmatprep.mubr.msk.bf16.mxu1 %vm3340_vm0, %v3339_v1  ;;  %3023 = vmatprep.mubr.msk.bf16.mxu0 %vm3340_vm0, %v3339_v1  ;;  %vm986_vm5 = vcmp.eq.s32.totalorder %v985_v32, 1 }
  0x41   : > { %3020 = vmatpush3.bf16.msra.mxu0 %v3247_v23  ;;  %vm987_vm6 = vmand %vm986_vm5, %vm980_vm4  ;;  %v3254_v23 = vld [vmem:[%s3391_s8 + $0x10] sm:$0xff]  }
  0x42   : > { %3021 = vmatprep.subr.bf16.mxu0 %v3339_v1  ;;  %v3569_v34 = vsel %vm987_vm6, 0.0, %v3342_v33 }
  0x45   : > { %3022 = vmatpush3.bf16.msra.mxu0 %v3248_v24  ;;  %v3255_v24 = vld [vmem:[%s3391_s8 + $0x18] sm:$0xff]  }
  0x46   : > { %3033 = vmatprep.subr.bf16.mxu0 %v3339_v1 }
  0x48   : > { %3024 = vmatmul.mubr.msk.bf16.vlgmr.msra.gmra.mrb[4].mxu0 %vm1024_vm1, %v3535_v6 }
  0x49   : > { %3035 = vmatprep.mubr.msk.bf16.mxu0 %vm3340_vm0, %v3339_v1 }
 0x112   : > { %v1126_v9 = vpop.f32.mrb[0].mxu1  ;;  %v1062_v10 = vpop.f32.mrb[0].mxu0 }
 0x113   : > { %v1127_v11 = vadd.f32 %v2822_v7, %v1126_v9  ;;  %v3017_v12 = vpop.f32.mrb[1].mxu1  ;;  %v1063_v13 = vadd.f32 %v2818_v8, %v1062_v10  ;;  %v3009_v14 = vpop.f32.mrb[1].mxu0 }
 0x114   : > { %v1129_v15 = vpop.f32.mrb[2].mxu1  ;;  %v1065_v16 = vpop.f32.mrb[2].mxu0  ;;  %v2839_v12 = vld [vmem:[%s3376_s25 + $0x1] ss:$0 sm:$0xff] }
 0x115   : > { %v1196_v17 = vpack.c.bf16 %v1127_v11, %v1127_v11  ;;  %v3018_v18 = vpop.f32.mrb[3].mxu1  ;;  %v3010_v19 = vpop.f32.mrb[3].mxu0  ;;  %v1068_v21 = vmul.f32 0.25, %v1063_v13  ;;  %v2848_v11 = vld [vmem:[%s3386_s3 + $0x1] ss:$0 sm:$0xff] }
 0x117   : > { %v1202_v20 = vsel %vm1197_vm2, %v1196_v17, 0  ;;  %v1195_v22 = vpack.c.bf16 %v1068_v21, %v1068_v21 }
 0x118   : > { %3028 = vmatpush3.bf16.xpose.msra.mxu1 %v1202_v20 }
 0x119   : > { %3039 = vmatprep.subr.bf16.mxu1 %v3339_v1 }
 0x11b   : > { %v1189_v46 = vpop.f32.mrb[4].mxu0 }
 0x11c   : > { %v3025_v47 = vpop.f32.mrb[5].mxu0  ;;  %v1190_v51 = vadd.f32 %v2826_v49, %v1189_v46  ;;  %v3256_v46 = vld [vmem:[%s3401_s19 + $0x8] sm:$0xff]  }
 0x11d   : > { %v1192_v48 = vpop.f32.mrb[6].mxu0 }
 0x11e   : > { %v3026_v50 = vpop.f32.mrb[7].mxu0  ;;  %v1257_v52 = vpack.c.bf16 %v1190_v51, %v1190_v51 }
 0x11f   : > { %3030 = vmatmul.mubr.msk.bf16.vlgmr.msra.gmra.mrb[4].mxu1 %vm1197_vm2, %v1195_v22 }
 0x120   : > { %3041 = vmatprep.mubr.msk.bf16.mxu1 %vm3340_vm0, %v3339_v1  ;;  %v1263_v53 = vsel %vm1261_vm8, %v1257_v52, 0  ;;  %3040 = vmatpush3.bf16.msra.mxu1 %v3249_v54 }
 0x121   : > { %3034 = vmatpush3.bf16.msra.mxu0 %v1263_v53  ;;  %3053 = vmatprep.subr.bf16.mxu1 %v3339_v1 }
 0x122   : > { %3045 = vmatprep.subr.bf16.mxu0 %v3339_v1 }
 0x1f2   : > { %v1238_v35 = vpop.f32.mrb[4].mxu1 }
 0x1f3   : > { %v1239_v36 = vadd.f32 %v1238_v35, %v3569_v34  ;;  %v3031_v37 = vpop.f32.mrb[5].mxu1 }
 0x1f4   : > { %v1241_v38 = vpop.f32.mrb[6].mxu1 }
 0x1f5   : > { %v3032_v39 = vpop.f32.mrb[7].mxu1  ;;  %v1245_v40 = vsel %vm1244_vm7, %v1239_v36, -inf }
 0x1f6   : > { %1246 = vmax.xlane.f32.xlu0 %v1245_v40 }
 0x283   : > { %v1247_v41 = vpop.xlane.xlu0 %1246 }
 0x284   : > { %v1248_v42 = vsub.f32 %v1239_v36, %v1247_v41 }
 0x286   : > { %v1249_v43 = vmul.f32 1.442695, %v1248_v42 }
 0x288   : > { %3277 = vpow2.f32 %v1249_v43 }
 0x292   : > { %v3278_v44 = vpop.eup %3277 }
 0x293   : > { %v1251_v45 = vsel %vm1244_vm7, %v3278_v44, 0.0 }
 0x294   : > { %1252 = vadd.xlane.f32.xlu0 %v1251_v45 }
 0x321   : > { %v1253_v55 = vpop.xlane.xlu0 %1252 }
 0x322   : > { %3279 = vrcp.f32 %v1253_v55 }
 0x32c   : > { %v3280_v56 = vpop.eup %3279 }
 0x32d   : > { %v1255_v57 = vmul.f32 %v3280_v56, %v3278_v44  ;;  %v2817_v56 = vld [vmem:[%s3406_s24] ss:$0 sm:$0xff] }
 0x32f   : > { %v1256_v58 = vpack.c.bf16 %v1255_v57, %v1255_v57  ;;  %v1000_v57 = vadd.f32 %v2817_v56, %v3530_v5  ;;  %v3257_v5 = vld [vmem:[%s3431_s27] sm:$0xff]  }
 0x331   : > { %3036 = vmatmul.mubr.msk.bf16.vlgmr.msra.gmra.mrb[8].mxu0 %vm1244_vm7, %v1256_v58 }
 0x332   : > { %3049 = vmatprep.mubr.msk.bf16.mxu0 %vm3340_vm0, %v3339_v1  ;;  %3046 = vmatpush3.bf16.msra.mxu0 %v3251_v59 }
 0x333   : > { %3047 = vmatprep.subr.bf16.mxu0 %v3339_v1 }
 0x336   : > { %3048 = vmatpush3.bf16.msra.mxu0 %v3253_v60 }
 0x337   : > { %3061 = vmatprep.subr.bf16.mxu0 %v3339_v1 }
 0x339   : > { %3050 = vmatmul.mubr.msk.bf16.vlgmr.msra.gmra.mrb[12].mxu0 %vm1024_vm1, %v3535_v6 }
 0x33a   : > { %3065 = vmatprep.mubr.msk.bf16.mxu0 %vm3340_vm0, %v3339_v1  ;;  %3062 = vmatpush3.bf16.msra.mxu0 %v3254_v23  ;;  %v2874_v23 = vld [vmem:[%s3795_s1] ss:$0 sm:$0xff] }
 0x33b   : > { %3063 = vmatprep.subr.bf16.mxu0 %v3339_v1 }
 0x33e   : > { %3064 = vmatpush3.bf16.msra.mxu0 %v3255_v24 }
 0x33f   : > { %3075 = vmatprep.subr.bf16.mxu0 %v3339_v1 }
 0x341   : > { %3066 = vmatmul.mubr.msk.bf16.vlgmr.msra.gmra.mrb[16].mxu0 %vm1024_vm1, %v3535_v6 }
 0x342   : > { %3077 = vmatprep.mubr.msk.bf16.mxu0 %vm3340_vm0, %v3339_v1 }
 0x404   : > { %v1299_v61 = vpop.f32.mrb[8].mxu0 }
 0x405   : > { %v1305_v63 = vpack.c.bf16 %v1299_v61, %v1299_v61  ;;  %v3037_v0 = vpop.f32.mrb[9].mxu0 }
 0x406   : > { %v1302_v2 = vpop.f32.mrb[10].mxu0 }
 0x407   : > { %v3038_v3 = vpop.f32.mrb[11].mxu0  ;;  %3042 = vmatmul.mubr.msk.bf16.vlgmr.msra.gmra.mrb[8].mxu1 %vm1197_vm2, %v1305_v63 }
 0x408   : > { %3054 = vmatpush3.bf16.msra.mxu1 %v3250_v62  ;;  %3057 = vmatprep.mubr.msk.bf16.mxu1 %vm3340_vm0, %v3339_v1 }
 0x409   : > { %3055 = vmatprep.subr.bf16.mxu1 %v3339_v1 }
 0x40c   : > { %3056 = vmatpush3.bf16.msra.mxu1 %v3252_v4  ;;  %v1417_v7 = vpop.f32.mrb[12].mxu0 }
 0x40d   : > { %3069 = vmatprep.subr.bf16.mxu1 %v3339_v1  ;;  %v3051_v8 = vpop.f32.mrb[13].mxu0  ;;  %v1418_v16 = vadd.f32 %v2839_v12, %v1417_v7  ;;  %v3260_v12 = vld [vmem:[%s3421_s12 + $0x8] sm:$0xff]  }
 0x40e   : > { %v1420_v9 = vpop.f32.mrb[14].mxu0  ;;  %v3258_v8 = vld [vmem:[%s3431_s27 + $0x8] sm:$0xff]  }
 0x40f   : > { %3058 = vmatmul.mubr.msk.bf16.vlgmr.msra.gmra.mrb[12].mxu1 %vm1024_vm1, %v3535_v6  ;;  %v3052_v10 = vpop.f32.mrb[15].mxu0  ;;  %v1423_v21 = vmul.f32 0.25, %v1418_v16  ;;  %v973_v9 = vld [vmem:[%s963_s26] sm:$0xf]  ;;  %s3802_s26 = sld [smem:[#allocation12_spill]] }
 0x410   : > { %3071 = vmatprep.mubr.msk.bf16.mxu1 %vm3340_vm0, %v3339_v1  ;;  %v3639_v10 = vpack.c.bf16 %v973_v9, %v973_v9 }
 0x411   : > { %v1554_v22 = vpack.c.bf16 %v1423_v21, %v1423_v21 }
 0x414   : > { %v1548_v39 = vpop.f32.mrb[16].mxu0 }
 0x415   : > { %v3067_v40 = vpop.f32.mrb[17].mxu0 }
 0x416   : > { %v1551_v41 = vpop.f32.mrb[18].mxu0 }
 0x417   : > { %v3068_v42 = vpop.f32.mrb[19].mxu0 }
 0x418   : > { %v3262_v42 = vld [vmem:[%s3797_s7 + $0x8] sm:$0xff]  }
 0x4e2   : > { %v1483_v13 = vpop.f32.mrb[12].mxu1 }
 0x4e3   : > { %v1484_v14 = vadd.f32 %v2848_v11, %v1483_v13  ;;  %v3059_v15 = vpop.f32.mrb[13].mxu1  ;;  %v3259_v11 = vld [vmem:[%s3421_s12] sm:$0xff]  }
 0x4e4   : > { %v1486_v17 = vpop.f32.mrb[14].mxu1 }
 0x4e5   : > { %v1555_v18 = vpack.c.bf16 %v1484_v14, %v1484_v14  ;;  %v3060_v19 = vpop.f32.mrb[15].mxu1  ;;  %v2867_v17 = vld [vmem:[%s3411_s30] ss:$0 sm:$0xff] }
 0x4e6   : > { %v2868_v19 = vld [vmem:[%s3794_s28] ss:$0 sm:$0xff]  ;;  %s3803_s28 = sld [smem:[#allocation10_spill]] }
 0x4e7   : > { %v1560_v20 = vsel %vm1197_vm2, %v1555_v18, 0 }
 0x4e8   : > { %3070 = vmatpush3.bf16.xpose.msra.mxu1 %v1560_v20 }
 0x4e9   : > { %3081 = vmatprep.subr.bf16.mxu1 %v3339_v1 }
 0x4ef   : > { %3072 = vmatmul.mubr.msk.bf16.vlgmr.msra.gmra.mrb[16].mxu1 %vm1197_vm2, %v1554_v22 }
 0x4f0   : > { %3083 = vmatprep.mubr.msk.bf16.mxu1 %vm3340_vm0, %v3339_v1  ;;  %3082 = vmatpush3.bf16.msra.mxu1 %v3256_v46 }
 0x4f1   : > { %3095 = vmatprep.subr.bf16.mxu1 %v3339_v1 }
 0x5c2   : > { %v1596_v25 = vpop.f32.mrb[16].mxu1 }
 0x5c3   : > { %v1597_v26 = vadd.f32 %v1596_v25, %v3569_v34  ;;  %v3073_v29 = vpop.f32.mrb[17].mxu1  ;;  %v2857_v34 = vld [vmem:[%s3396_s14 + $0x1] ss:$0 sm:$0xff] }
 0x5c4   : > { %v1599_v30 = vpop.f32.mrb[18].mxu1  ;;  %v1549_v43 = vadd.f32 %v2857_v34, %v1548_v39  ;;  %v3261_v34 = vld [vmem:[%s3797_s7] sm:$0xff]  }
 0x5c5   : > { %v3074_v31 = vpop.f32.mrb[19].mxu1  ;;  %v1602_v32 = vsel %vm1244_vm7, %v1597_v26, -inf }
 0x5c6   : > { %1603 = vmax.xlane.f32.xlu1 %v1602_v32  ;;  %v1614_v44 = vpack.c.bf16 %v1549_v43, %v1549_v43  ;;  %v989_v43 = vld [vmem:[%s966_s11] sm:$0x1]  ;;  %s3805_s11 = sld [smem:[#allocation14_spill]] }
 0x5c7   : > { %vm990_vm9 = vcmp.ne.s32.totalorder %v989_v43, 0 }
 0x5c8   : > { %v1619_v45 = vsel %vm1261_vm8, %v1614_v44, 0  ;;  %v991_v44 = vsel %vm990_vm9, 0.0, %v3342_v33 }
 0x5c9   : > { %3076 = vmatpush3.bf16.msra.mxu0 %v1619_v45  ;;  %v3682_v45 = vrot.slane %v991_v44, %v984_v28 }
 0x5ca   : > { %3087 = vmatprep.subr.bf16.mxu0 %v3339_v1 }
 0x653   : > { %v1604_v35 = vpop.xlane.xlu1 %1603 }
 0x654   : > { %v1605_v36 = vsub.f32 %v1597_v26, %v1604_v35  ;;  %v2870_v35 = vld [vmem:[%s3796_s2] ss:$0 sm:$0xff] }
 0x656   : > { %v1606_v37 = vmul.f32 1.442695, %v1605_v36 }
 0x658   : > { %3281 = vpow2.f32 %v1606_v37 }
 0x662   : > { %v3282_v38 = vpop.eup %3281 }
 0x663   : > { %v1608_v6 = vsel %vm1244_vm7, %v3282_v38, 0.0 }
 0x664   : > { %1609 = vadd.xlane.f32.xlu1 %v1608_v6 }
 0x6f1   : > { %v1610_v47 = vpop.xlane.xlu1 %1609 }
 0x6f2   : > { %3283 = vrcp.f32 %v1610_v47 }
 0x6fc   : > { %v3284_v48 = vpop.eup %3283 }
 0x6fd   : > { %v1612_v49 = vmul.f32 %v3284_v48, %v3282_v38 }
 0x6ff   : > { %v1613_v50 = vpack.c.bf16 %v1612_v49, %v1612_v49 }
 0x701   : > { %3078 = vmatmul.mubr.msk.bf16.vlgmr.msra.gmra.mrb[20].mxu0 %vm1244_vm7, %v1613_v50 }
 0x702   : > { %3091 = vmatprep.mubr.msk.bf16.mxu0 %vm3340_vm0, %v3339_v1  ;;  %3088 = vmatpush3.bf16.msra.mxu0 %v3259_v11 }
 0x703   : > { %3089 = vmatprep.subr.bf16.mxu0 %v3339_v1 }
 0x706   : > { %3090 = vmatpush3.bf16.msra.mxu0 %v3260_v12 }
 0x707   : > { %3103 = vmatprep.subr.bf16.mxu0 %v3339_v1 }
 0x7d4   : > { %v1655_v51 = vpop.f32.mrb[20].mxu0 }
 0x7d5   : > { %v1661_v52 = vpack.c.bf16 %v1655_v51, %v1655_v51  ;;  %v3079_v53 = vpop.f32.mrb[21].mxu0 }
 0x7d6   : > { %v1658_v54 = vpop.f32.mrb[22].mxu0 }
 0x7d7   : > { %v3080_v55 = vpop.f32.mrb[23].mxu0  ;;  %3084 = vmatmul.mubr.msk.bf16.vlgmr.msra.gmra.mrb[8].mxu1 %vm1197_vm2, %v1661_v52 }
 0x7d8   : > { %3099 = vmatprep.mubr.msk.bf16.mxu1 %vm3340_vm0, %v3339_v1  ;;  %3096 = vmatpush3.bf16.msra.mxu1 %v3257_v5 }
 0x7d9   : > { %3097 = vmatprep.subr.bf16.mxu1 %v3339_v1 }
 0x7dc   : > { %3098 = vmatpush3.bf16.msra.mxu1 %v3258_v8  ;;  %v3266_v8 = vld [vmem:[%s3431_s27 + $0x10] sm:$0xff]  }
 0x7dd   : > { %3111 = vmatprep.subr.bf16.mxu1 %v3339_v1 }
 0x7df   : > { %3100 = vmatmul.mubr.msk.bf16.vlgmr.msra.gmra.mrb[20].mxu1 %vm1024_vm1, %v3639_v10 }
 0x7e0   : > { %3113 = vmatprep.mubr.msk.bf16.mxu1 %vm3340_vm0, %v3339_v1 }
 0x8aa   : > { %v1708_v58 = vpop.f32.mrb[8].mxu1 }
 0x8ab   : > { %v3191_v59 = vadd.f32 %v1708_v58, %v1000_v57  ;;  %v3085_v60 = vpop.f32.mrb[9].mxu1  ;;  %v2878_v57 = vld [vmem:[%s3799_s18] ss:$0 sm:$0xff] }
 0x8ac   : > { %v1711_v61 = vpop.f32.mrb[10].mxu1 }
 0x8ad   : > { %v3086_v62 = vpop.f32.mrb[11].mxu1  ;;  %v1717_v63 = vsel %vm1024_vm1, %v3191_v59, 0.0 }
 0x8ae   : > { %1718 = vadd.xlane.f32.xlu0 %v1717_v63  ;;  %v3265_v62 = vld [vmem:[%s3800_s22] sm:$0xff]  }
 0x8b2   : > { %v1882_v24 = vpop.f32.mrb[20].mxu1 }
 0x8b3   : > { %v1883_v25 = vadd.f32 %v2874_v23, %v1882_v24  ;;  %v3101_v26 = vpop.f32.mrb[21].mxu1 }
 0x8b4   : > { %v1885_v29 = vpop.f32.mrb[22].mxu1 }
 0x8b5   : > { %v1952_v30 = vpack.c.bf16 %v1883_v25, %v1883_v25  ;;  %v3102_v31 = vpop.f32.mrb[23].mxu1 }
 0x8b7   : > { %v1963_v32 = vsel %vm1197_vm2, %v1952_v30, 0 }
 0x8b8   : > { %3112 = vmatpush3.bf16.xpose.msra.mxu1 %v1963_v32 }
 0x8b9   : > { %3123 = vmatprep.subr.bf16.mxu1 %v3339_v1 }
 0x93b   : > { %v1719_v0 = vpop.xlane.xlu0 %1718 }
 0x93c   : > { %v1721_v2 = vmul.f32 0.03125, %v1719_v0 }
 0x93e   : > { %v1722_v3 = vsub.f32 %v3191_v59, %v1721_v2 }
 0x940   : > { %v1723_v4 = vmul.f32 %v1722_v3, %v1722_v3 }
 0x942   : > { %v1724_v7 = vsel %vm1024_vm1, %v1723_v4, 0.0 }
 0x943   : > { %1725 = vadd.xlane.f32.xlu1 %v1724_v7  ;;  %v3264_v7 = vld [vmem:[%s3421_s12 + $0x18] sm:$0xff]  }
 0x9d0   : > { %v1726_v13 = vpop.xlane.xlu1 %1725 }
 0x9d1   : > { %v1727_v14 = vmul.f32 0.03125, %v1726_v13 }
 0x9d3   : > { %v1728_v15 = vadd.f32 1e-12, %v1727_v14  ;;  %v3267_v14 = vld [vmem:[%s3431_s27 + $0x18] sm:$0xff]  }
 0x9d5   : > { %3285 = vrsqrt.f32 %v1728_v15 }
 0x9df   : > { %v3286_v16 = vpop.eup %3285 }
 0x9e0   : > { %v1730_v18 = vmul.f32 %v3286_v16, %v1722_v3  ;;  %v3263_v3 = vld [vmem:[%s3421_s12 + $0x10] sm:$0xff]  }
 0x9e2   : > { %v1737_v20 = vmul.f32 %v2867_v17, %v1730_v18 }
 0x9e4   : > { %v3652_v21 = vadd.f32 %v2868_v19, %v1737_v20  ;;  %v2900_v19 = vld [vmem:[%s3795_s1 + $0x1] ss:$0 sm:$0xff] }
 0x9e5   : > { %v2891_v20 = vld [vmem:[%s3796_s2 + $0x1] ss:$0 sm:$0xff] }
 0x9e6   : > { %v3656_v22 = vpack.c.bf16 %v3652_v21, %v3652_v21 }
 0x9e8   : > { %3092 = vmatmul.mubr.msk.bf16.vlgmr.msra.gmra.mrb[24].mxu0 %vm1024_vm1, %v3656_v22 }
 0x9e9   : > { %3107 = vmatprep.mubr.msk.bf16.mxu0 %vm3340_vm0, %v3339_v1  ;;  %3104 = vmatpush3.bf16.msra.mxu0 %v3261_v34 }
 0x9ea   : > { %3105 = vmatprep.subr.bf16.mxu0 %v3339_v1 }
 0x9ed   : > { %3106 = vmatpush3.bf16.msra.mxu0 %v3262_v42 }
 0x9ee   : > { %3117 = vmatprep.subr.bf16.mxu0 %v3339_v1 }
 0x9f0   : > { %3108 = vmatmul.mubr.msk.bf16.vlgmr.msra.gmra.mrb[28].mxu0 %vm1024_vm1, %v3639_v10 }
 0x9f1   : > { %3119 = vmatprep.mubr.msk.bf16.mxu0 %vm3340_vm0, %v3339_v1 }
 0xabb   : > { %v1815_v36 = vpop.f32.mrb[24].mxu0 }
 0xabc   : > { %v1816_v37 = vadd.f32 %v2870_v35, %v1815_v36  ;;  %v3093_v38 = vpop.f32.mrb[25].mxu0  ;;  %v3268_v36 = vld [vmem:[%s3797_s7 + $0x10] sm:$0xff]  }
 0xabd   : > { %v1818_v6 = vpop.f32.mrb[26].mxu0 }
 0xabe   : > { %v1821_v39 = vmul.f32 0.25, %v1816_v37  ;;  %v3094_v40 = vpop.f32.mrb[27].mxu0  ;;  %v3269_v37 = vld [vmem:[%s3797_s7 + $0x18] sm:$0xff]  }
 0xac0   : > { %v1951_v41 = vpack.c.bf16 %v1821_v39, %v1821_v39 }
 0xac2   : > { %3114 = vmatmul.mubr.msk.bf16.vlgmr.msra.gmra.mrb[24].mxu1 %vm1197_vm2, %v1951_v41 }
 0xac3   : > { %3125 = vmatprep.mubr.msk.bf16.mxu1 %vm3340_vm0, %v3339_v1  ;;  %v1945_v28 = vpop.f32.mrb[28].mxu0  ;;  %3124 = vmatpush3.bf16.msra.mxu1 %v3265_v62 }
 0xac4   : > { %v3109_v55 = vpop.f32.mrb[29].mxu0  ;;  %v1946_v59 = vadd.f32 %v2878_v57, %v1945_v28  ;;  %3137 = vmatprep.subr.bf16.mxu1 %v3339_v1 }
 0xac5   : > { %v1948_v56 = vpop.f32.mrb[30].mxu0 }
 0xac6   : > { %v3110_v58 = vpop.f32.mrb[31].mxu0  ;;  %v2018_v60 = vpack.c.bf16 %v1946_v59, %v1946_v59 }
 0xac8   : > { %v2024_v61 = vsel %vm2022_vm11, %v2018_v60, 0 }
 0xac9   : > { %3118 = vmatpush3.bf16.msra.mxu0 %v2024_v61  ;;  %v2869_v61 = vld [vmem:[%s3801_s23] ss:$0 sm:$0xff]  ;;  %s3806_s23 = sld [smem:[#allocation13_spill]] }
 0xaca   : > { %3129 = vmatprep.subr.bf16.mxu0 %v3339_v1  ;;  %v1754_v62 = vadd.f32 %v2869_v61, %v3652_v21  ;;  %v3272_v21 = vld [vmem:[%s3802_s26 + $0x8] sm:$0xff]   ;;  %v2932_v61 = vld [vmem:[%s3496_s4] ss:$0 sm:$0xff] }
 0xb95   : > { %v1999_v46 = vpop.f32.mrb[24].mxu1 }
 0xb96   : > { %v2000_v47 = vadd.f32 %v1999_v46, %v3682_v45  ;;  %v3115_v48 = vpop.f32.mrb[25].mxu1 }
 0xb97   : > { %v2002_v49 = vpop.f32.mrb[26].mxu1 }
 0xb98   : > { %v3116_v50 = vpop.f32.mrb[27].mxu1  ;;  %v2006_v51 = vsel %vm2005_vm10, %v2000_v47, -inf }
 0xb99   : > { %2007 = vmax.xlane.f32.xlu0 %v2006_v51 }
 0xc26   : > { %v2008_v52 = vpop.xlane.xlu0 %2007 }
 0xc27   : > { %v2009_v53 = vsub.f32 %v2000_v47, %v2008_v52 }
 0xc29   : > { %v2010_v54 = vmul.f32 1.442695, %v2009_v53 }
 0xc2b   : > { %3287 = vpow2.f32 %v2010_v54  ;;  %v3270_v54 = vld [vmem:[%s3800_s22 + $0x8] sm:$0xff]  }
 0xc35   : > { %v3288_v33 = vpop.eup %3287 }
 0xc36   : > { %v2012_v27 = vsel %vm2005_vm10, %v3288_v33, 0.0 }
 0xc37   : > { %2013 = vadd.xlane.f32.xlu1 %v2012_v27 }
 0xcc4   : > { %v2014_v63 = vpop.xlane.xlu1 %2013 }
 0xcc5   : > { %3289 = vrcp.f32 %v2014_v63 }
 0xccf   : > { %v3290_v0 = vpop.eup %3289 }
 0xcd0   : > { %v2016_v2 = vmul.f32 %v3290_v0, %v3288_v33 }
 0xcd2   : > { %v2017_v4 = vpack.c.bf16 %v2016_v2, %v2016_v2 }
 0xcd4   : > { %3120 = vmatmul.mubr.msk.bf16.vlgmr.msra.gmra.mrb[32].mxu0 %vm2005_vm10, %v2017_v4 }
 0xcd5   : > { %3130 = vmatpush3.bf16.msra.mxu0 %v3263_v3  ;;  %3133 = vmatprep.mubr.msk.bf16.mxu0 %vm3340_vm0, %v3339_v1 }
 0xcd6   : > { %3131 = vmatprep.subr.bf16.mxu0 %v3339_v1 }
 0xcd9   : > { %3132 = vmatpush3.bf16.msra.mxu0 %v3264_v7 }
 0xcda   : > { %3145 = vmatprep.subr.bf16.mxu0 %v3339_v1 }
 0xcdc   : > { %3134 = vmatmul.mubr.msk.bf16.vlgmr.msra.gmra.mrb[36].mxu0 %vm1024_vm1, %v3656_v22 }
 0xcdd   : > { %3149 = vmatprep.mubr.msk.bf16.mxu0 %vm3340_vm0, %v3339_v1  ;;  %3146 = vmatpush3.bf16.msra.mxu0 %v3268_v36 }
 0xcde   : > { %3147 = vmatprep.subr.bf16.mxu0 %v3339_v1 }
 0xce1   : > { %3148 = vmatpush3.bf16.msra.mxu0 %v3269_v37 }
 0xce2   : > { %3159 = vmatprep.subr.bf16.mxu0 %v3339_v1 }
 0xce4   : > { %3150 = vmatmul.mubr.msk.bf16.vlgmr.msra.gmra.mrb[40].mxu0 %vm1024_vm1, %v3639_v10 }
 0xce5   : > { %3161 = vmatprep.mubr.msk.bf16.mxu0 %vm3340_vm0, %v3339_v1 }
 0xda7   : > { %v2060_v5 = vpop.f32.mrb[32].mxu0 }
 0xda8   : > { %v2066_v9 = vpack.c.bf16 %v2060_v5, %v2060_v5  ;;  %v3121_v11 = vpop.f32.mrb[33].mxu0 }
 0xda9   : > { %v2063_v12 = vpop.f32.mrb[34].mxu0 }
 0xdaa   : > { %v3122_v13 = vpop.f32.mrb[35].mxu0  ;;  %3126 = vmatmul.mubr.msk.bf16.vlgmr.msra.gmra.mrb[28].mxu1 %vm1197_vm2, %v2066_v9 }
 0xdab   : > { %3138 = vmatpush3.bf16.msra.mxu1 %v3266_v8  ;;  %3141 = vmatprep.mubr.msk.bf16.mxu1 %vm3340_vm0, %v3339_v1  ;;  %v3271_v13 = vld [vmem:[%s3802_s26] sm:$0xff]  }
 0xdac   : > { %3139 = vmatprep.subr.bf16.mxu1 %v3339_v1 }
 0xdaf   : > { %v2178_v15 = vpop.f32.mrb[36].mxu0  ;;  %3140 = vmatpush3.bf16.msra.mxu1 %v3267_v14 }
 0xdb0   : > { %v3135_v16 = vpop.f32.mrb[37].mxu0  ;;  %3153 = vmatprep.subr.bf16.mxu1 %v3339_v1  ;;  %v2179_v26 = vadd.f32 %v2891_v20, %v2178_v15  ;;  %v2920_v20 = vld [vmem:[%s3804_s10] ss:$0 sm:$0xff] }
 0xdb1   : > { %v2181_v17 = vpop.f32.mrb[38].mxu0 }
 0xdb2   : > { %v3136_v18 = vpop.f32.mrb[39].mxu0  ;;  %3142 = vmatmul.mubr.msk.bf16.vlgmr.msra.gmra.mrb[32].mxu1 %vm1024_vm1, %v3639_v10  ;;  %v2184_v32 = vmul.f32 0.25, %v2179_v26  ;;  %v3274_v26 = vld [vmem:[%s3805_s11 + $0x8] sm:$0xff]  }
 0xdb3   : > { %3155 = vmatprep.mubr.msk.bf16.mxu1 %vm3340_vm0, %v3339_v1  ;;  %v2919_v18 = vld [vmem:[%s3803_s28] ss:$0 sm:$0xff]  ;;  %s970_s28 = scalar_lea.vmem %s3501_s17, %s2814_s0 }
 0xdb4   : > { %v2315_v35 = vpack.c.bf16 %v2184_v32, %v2184_v32 }
 0xdb7   : > { %v2309_v47 = vpop.f32.mrb[40].mxu0 }
 0xdb8   : > { %v3151_v48 = vpop.f32.mrb[41].mxu0 }
 0xdb9   : > { %v2312_v49 = vpop.f32.mrb[42].mxu0 }
 0xdba   : > { %v3152_v50 = vpop.f32.mrb[43].mxu0 }
 0xe85   : > { %v2244_v22 = vpop.f32.mrb[32].mxu1 }
 0xe86   : > { %v2245_v23 = vadd.f32 %v2900_v19, %v2244_v22  ;;  %v3143_v24 = vpop.f32.mrb[33].mxu1 }
 0xe87   : > { %v2247_v25 = vpop.f32.mrb[34].mxu1 }
 0xe88   : > { %v2316_v29 = vpack.c.bf16 %v2245_v23, %v2245_v23  ;;  %v3144_v30 = vpop.f32.mrb[35].mxu1  ;;  %v3273_v25 = vld [vmem:[%s3805_s11] sm:$0xff]  }
 0xe89   : > { %v3276_v30 = vld [vmem:[%s3805_s11 + $0x18] sm:$0xff]  }
 0xe8a   : > { %v2321_v31 = vsel %vm1197_vm2, %v2316_v29, 0  ;;  %v3275_v29 = vld [vmem:[%s3805_s11 + $0x10] sm:$0xff]  }
 0xe8b   : > { %3154 = vmatpush3.bf16.xpose.msra.mxu1 %v2321_v31  ;;  %v2921_v31 = vld [vmem:[%s3806_s23] ss:$0 sm:$0xff] }
 0xe8c   : > { %3165 = vmatprep.subr.bf16.mxu1 %v3339_v1 }
 0xe92   : > { %3156 = vmatmul.mubr.msk.bf16.vlgmr.msra.gmra.mrb[36].mxu1 %vm1197_vm2, %v2315_v35 }
 0xe93   : > { %3167 = vmatprep.mubr.msk.bf16.mxu1 %vm3340_vm0, %v3339_v1  ;;  %3166 = vmatpush3.bf16.msra.mxu1 %v3270_v54 }
 0xe94   : > { %3179 = vmatprep.subr.bf16.mxu1 %v3339_v1 }
 0xf65   : > { %v2357_v38 = vpop.f32.mrb[36].mxu1 }
 0xf66   : > { %v2358_v6 = vadd.f32 %v2357_v38, %v3682_v45  ;;  %v3157_v39 = vpop.f32.mrb[37].mxu1  ;;  %v2909_v45 = vld [vmem:[%s3799_s18 + $0x1] ss:$0 sm:$0xff] }
 0xf67   : > { %v2360_v40 = vpop.f32.mrb[38].mxu1  ;;  %v2310_v51 = vadd.f32 %v2909_v45, %v2309_v47 }
 0xf68   : > { %v3158_v41 = vpop.f32.mrb[39].mxu1  ;;  %v2363_v34 = vsel %vm2005_vm10, %v2358_v6, -inf }
 0xf69   : > { %2364 = vmax.xlane.f32.xlu0 %v2363_v34  ;;  %v2375_v52 = vpack.c.bf16 %v2310_v51, %v2310_v51 }
 0xf6b   : > { %v2380_v53 = vsel %vm2022_vm11, %v2375_v52, 0 }
 0xf6c   : > { %3160 = vmatpush3.bf16.msra.mxu0 %v2380_v53 }
 0xf6d   : > { %3171 = vmatprep.subr.bf16.mxu0 %v3339_v1 }
 0xff6   : > { %v2365_v42 = vpop.xlane.xlu0 %2364 }
 0xff7   : > { %v2366_v43 = vsub.f32 %v2358_v6, %v2365_v42 }
 0xff9   : > { %v2367_v44 = vmul.f32 1.442695, %v2366_v43 }
 0xffb   : > { %3291 = vpow2.f32 %v2367_v44 }
0x1005   : > { %v3292_v46 = vpop.eup %3291 }
0x1006   : > { %v2369_v10 = vsel %vm2005_vm10, %v3292_v46, 0.0 }
0x1007   : > { %2370 = vadd.xlane.f32.xlu1 %v2369_v10  ;;  %v2925_v10 = vld [vmem:[%s3486_s20] ss:$0 sm:$0xff] }
0x1094   : > { %v2371_v33 = vpop.xlane.xlu1 %2370 }
0x1095   : > { %3293 = vrcp.f32 %v2371_v33 }
0x109f   : > { %v3294_v27 = vpop.eup %3293 }
0x10a0   : > { %v2373_v28 = vmul.f32 %v3294_v27, %v3292_v46 }
0x10a2   : > { %v2374_v55 = vpack.c.bf16 %v2373_v28, %v2373_v28 }
0x10a4   : > { %3162 = vmatmul.mubr.msk.bf16.vlgmr.msra.gmra.mrb[44].mxu0 %vm2005_vm10, %v2374_v55 }
0x10a5   : > { %3175 = vmatprep.mubr.msk.bf16.mxu0 %vm3340_vm0, %v3339_v1  ;;  %3172 = vmatpush3.bf16.msra.mxu0 %v3271_v13 }
0x10a6   : > { %3173 = vmatprep.subr.bf16.mxu0 %v3339_v1 }
0x10a9   : > { %3174 = vmatpush3.bf16.msra.mxu0 %v3272_v21 }
0x1177   : > { %v2416_v56 = vpop.f32.mrb[44].mxu0 }
0x1178   : > { %v2422_v57 = vpack.c.bf16 %v2416_v56, %v2416_v56  ;;  %v3163_v58 = vpop.f32.mrb[45].mxu0 }
0x1179   : > { %v2419_v59 = vpop.f32.mrb[46].mxu0 }
0x117a   : > { %v3164_v60 = vpop.f32.mrb[47].mxu0  ;;  %3168 = vmatmul.mubr.msk.bf16.vlgmr.msra.gmra.mrb[28].mxu1 %vm1197_vm2, %v2422_v57  ;;  %v2931_v59 = vld [vmem:[%s3491_s6] ss:$0 sm:$0xff] }
0x117b   : > { %3187 = vmatprep.mubr.msk.bf16.mxu1 %vm3340_vm0, %v3339_v1  ;;  %3180 = vmatpush3.bf16.msra.mxu1 %v3273_v25 }
0x117c   : > { %3181 = vmatprep.subr.bf16.mxu1 %v3339_v1 }
0x117f   : > { %3182 = vmatpush3.bf16.msra.mxu1 %v3274_v26 }
0x1180   : > { %3183 = vmatprep.subr.bf16.mxu1 %v3339_v1 }
0x1183   : > { %3184 = vmatpush3.bf16.msra.mxu1 %v3275_v29 }
0x1184   : > { %3185 = vmatprep.subr.bf16.mxu1 %v3339_v1 }
0x1187   : > { %3186 = vmatpush3.bf16.msra.mxu1 %v3276_v30 }
0x124d   : > { %v2469_v63 = vpop.f32.mrb[28].mxu1 }
0x124e   : > { %v3192_v0 = vadd.f32 %v2469_v63, %v1754_v62  ;;  %v3169_v2 = vpop.f32.mrb[29].mxu1 }
0x124f   : > { %v2472_v3 = vpop.f32.mrb[30].mxu1 }
0x1250   : > { %v3170_v4 = vpop.f32.mrb[31].mxu1  ;;  %v2478_v7 = vsel %vm1024_vm1, %v3192_v0, 0.0 }
0x1251   : > { %2479 = vadd.xlane.f32.xlu0 %v2478_v7 }
0x12de   : > { %v2480_v5 = vpop.xlane.xlu0 %2479 }
0x12df   : > { %v2481_v8 = vmul.f32 0.03125, %v2480_v5 }
0x12e1   : > { %v2482_v9 = vsub.f32 %v3192_v0, %v2481_v8 }
0x12e3   : > { %v2483_v11 = vmul.f32 %v2482_v9, %v2482_v9 }
0x12e5   : > { %v2484_v12 = vsel %vm1024_vm1, %v2483_v11, 0.0 }
0x12e6   : > { %2485 = vadd.xlane.f32.xlu1 %v2484_v12 }
0x1373   : > { %v2486_v14 = vpop.xlane.xlu1 %2485 }
0x1374   : > { %v2487_v15 = vmul.f32 0.03125, %v2486_v14 }
0x1376   : > { %v2488_v16 = vadd.f32 1e-12, %v2487_v15 }
0x1378   : > { %3295 = vrsqrt.f32 %v2488_v16 }
0x1382   : > { %v3296_v17 = vpop.eup %3295 }
0x1383   : > { %v2490_v19 = vmul.f32 %v3296_v17, %v2482_v9 }
0x1385   : > { %v2497_v22 = vmul.f32 %v2919_v18, %v2490_v19 }
0x1387   : > { %v2504_v23 = vadd.f32 %v2920_v20, %v2497_v22 }
0x1389   : > { %v2505_v24 = vpack.c.bf16 %v2504_v23, %v2504_v23 }
0x138b   : > { %3176 = vmatmul.mubr.msk.bf16.vlgmr.msra.gmra.mrb[48].mxu0 %vm1024_vm1, %v2505_v24 }
0x145e   : > { %v2566_v32 = vpop.f32.mrb[48].mxu0 }
0x145f   : > { %v2567_v35 = vadd.f32 %v2921_v31, %v2566_v32  ;;  %v3177_v36 = vpop.f32.mrb[49].mxu0 }
0x1460   : > { %v2569_v37 = vpop.f32.mrb[50].mxu0 }
0x1461   : > { %v2573_v38 = vmul.f32 0.044715, %v2567_v35  ;;  %v3178_v6 = vpop.f32.mrb[51].mxu0  ;;  %v2572_v43 = vmul.f32 0.5, %v2567_v35 }
0x1463   : > { %v2574_v39 = vmul.f32 %v2573_v38, %v2567_v35 }
0x1465   : > { %v2575_v40 = vmul.f32 %v2574_v39, %v2567_v35 }
0x1467   : > { %v2576_v41 = vadd.f32 %v2575_v40, %v2567_v35 }
0x1469   : > { %v2577_v34 = vmul.f32 0.7978846, %v2576_v41 }
0x146b   : > { %3297 = vtanh.f32 %v2577_v34 }
0x1475   : > { %v3298_v42 = vpop.eup %3297 }
0x1476   : > { %v2579_v44 = vadd.f32 1.0, %v3298_v42 }
0x1478   : > { %v2580_v46 = vmul.f32 %v2579_v44, %v2572_v43 }
0x147a   : > { %v2581_v1 = vpack.c.bf16 %v2580_v46, %v2580_v46 }
0x147c   : > { %3188 = vmatmul.mubr.msk.bf16.vlgmr.msra.gmra.mrb[40].mxu1 %vm2621_vm12, %v2581_v1 }
0x154f   : > { %v2659_v47 = vpop.f32.mrb[40].mxu1 }
0x1550   : > { %v2660_v48 = vadd.f32 %v2925_v10, %v2659_v47  ;;  %v3189_v49 = vpop.f32.mrb[41].mxu1 }
0x1551   : > { %v2662_v45 = vpop.f32.mrb[42].mxu1 }
0x1552   : > { %v3190_v50 = vpop.f32.mrb[43].mxu1  ;;  %v2665_v51 = vadd.f32 %v2660_v48, %v2504_v23 }
0x1554   : > { %v2668_v52 = vsel %vm1024_vm1, %v2665_v51, 0.0 }
0x1555   : > { %2669 = vadd.xlane.f32.xlu0 %v2668_v52 }
0x15e2   : > { %v2670_v53 = vpop.xlane.xlu0 %2669 }
0x15e3   : > { %v2671_v54 = vmul.f32 0.03125, %v2670_v53 }
0x15e5   : > { %v2672_v33 = vsub.f32 %v2665_v51, %v2671_v54 }
0x15e7   : > { %v2673_v27 = vmul.f32 %v2672_v33, %v2672_v33 }
0x15e9   : > { %v2674_v28 = vsel %vm1024_vm1, %v2673_v27, 0.0 }
0x15ea   : > { %2675 = vadd.xlane.f32.xlu1 %v2674_v28 }
0x1677   : > { %v2676_v55 = vpop.xlane.xlu1 %2675 }
0x1678   : > { %v2677_v56 = vmul.f32 0.03125, %v2676_v55 }
0x167a   : > { %v2678_v57 = vadd.f32 1e-12, %v2677_v56 }
0x167c   : > { %3299 = vrsqrt.f32 %v2678_v57 }
0x1686   : > { %v3300_v58 = vpop.eup %3299 }
0x1687   : > { %v2680_v60 = vmul.f32 %v3300_v58, %v2672_v33 }
0x1689   : > { %v2687_v62 = vmul.f32 %v2931_v59, %v2680_v60 }
0x168b   : > { %v2694_v63 = vadd.f32 %v2932_v61, %v2687_v62 }
0x168d   : > { %2695 = vst.msk [vmem:[%s970_s28] sm:$0xff] %vm1024_vm1, %v2694_v63 }
0x168e PF: > { %s71_s15 = sadd.s32 1, %s3307_s15  }
0x168f   : > { %p68_p4 = scmp.ge.s32.totalorder %s71_s15, 4  }
0x1691   :  { %70 = sbr.rel (!%p68_p4) target bundleno = 45 (0x2d), region = 223 }

</bundles_post_ra>
